<compile_context>
chip_gen: v6e
topology: v6e:2x2x1
jax: 0.10.0
libtpu: 0.0.40
codegen_flags: <defaults>
</compile_context>

<pallas_src>
import functools

import jax
import jax.numpy as jnp
from jax.experimental import pallas as pl
from jax.experimental.pallas import tpu as pltpu


# ------------------------------ Pallas kernel ------------------------------- #

def _conv3x3_kernel(x_ref, w_ref, o_ref, xpad_ref, *, th, h, w, cin, cout):
    """3x3 stride-1 'same' conv (no bias), NCHW, NB images x one row tile.

    x_ref   : (NB, Cin, H, W)     image block, VMEM-resident across row tiles
    w_ref   : (Cout*Cin*9,)       flattened conv weights in SMEM (scalar taps)
    o_ref   : (NB, Cout, TH, W)   output row tile (lane axis = W)
    xpad_ref: (NB, Cin, H+2, W+2) f32 VMEM scratch, zero-padded copy of images
    """
    r = pl.program_id(1)

    # Build the zero-padded image block once per image block (row tile 0).
    @pl.when(r == 0)
    def _():
        xpad_ref[...] = jnp.zeros_like(xpad_ref)
        xpad_ref[:, :, pl.ds(1, h), pl.ds(1, w)] = x_ref[...].astype(jnp.float32)

    row0 = r * th
    if th % 8 == 0:
        row0 = pl.multiple_of(row0, 8)

    # 9 taps x Cin input channels; each patch slab (NB, TH, W) is loaded once
    # and shared across the Cout accumulators (scalar-broadcast FMAs on VPU).
    accs = [None] * cout
    for ci in range(cin):
        for di in range(3):
            for dj in range(3):
                patch = xpad_ref[:, ci, pl.ds(row0 + di, th), pl.ds(dj, w)]
                for co in range(cout):
                    tap = w_ref[((co * cin + ci) * 3 + di) * 3 + dj]
                    term = patch * tap
                    accs[co] = term if accs[co] is None else accs[co] + term

    for co in range(cout):
        o_ref[:, co] = accs[co].astype(o_ref.dtype)


# ------------------------------ kernel wrapper ------------------------------ #

def _pick_row_tile(h, max_tile_rows=256):
    """Largest row tile that is a multiple of 8 and divides H (capped); the
    input block is whole-image resident, so fewer row tiles = fewer grid
    steps with no extra input DMA."""
    cands = [t for t in range(8, min(h, max_tile_rows) + 1, 8) if h % t == 0]
    return max(cands) if cands else h


def _pick_image_block(n, per_image_bytes, budget, cap=8):
    """Largest divisor of N (<= cap) whose working set fits the VMEM budget."""
    nb = 1
    for cand in range(1, min(n, cap) + 1):
        if n % cand == 0 and cand * per_image_bytes <= budget:
            nb = cand
    return nb


def conv3x3_same_nchw(x_nchw, weight):
    """x: (N, Cin, H, W); weight: (Cout, Cin, 3, 3) (PyTorch OIHW); no bias."""
    n, cin, h, w = x_nchw.shape
    cout = weight.shape[0]
    th = _pick_row_tile(h)

    vmem_limit = 32 * 1024 * 1024
    itemsize = jnp.dtype(x_nchw.dtype).itemsize
    per_image = (2 * cin * h * w * itemsize        # resident images (double-buffered)
                 + 2 * cout * th * w * itemsize    # output tile (double-buffered)
                 + cin * (h + 2) * (w + 2) * 4)    # f32 padded scratch
    budget = vmem_limit // 2
    if per_image > budget:
        raise ValueError(
            f"image too large for whole-image-resident conv ({per_image} bytes); "
            "use a halo-DMA row-tiled variant")
    nb = _pick_image_block(n, per_image, budget)
    grid = (n // nb, h // th)

    kernel = functools.partial(_conv3x3_kernel, th=th, h=h, w=w, cin=cin, cout=cout)
    return pl.pallas_call(
        kernel,
        out_shape=jax.ShapeDtypeStruct((n, cout, h, w), x_nchw.dtype),
        grid=grid,
        in_specs=[
            # NB whole images; constant block index across the row-tile axis
            # -> DMA'd once per image block and kept VMEM-resident.
            pl.BlockSpec((nb, cin, h, w), lambda i, r: (i, 0, 0, 0)),
            # Tiny weight table: scalars in SMEM (1-D to avoid SMEM padding),
            # resident for the whole grid.
            pl.BlockSpec(memory_space=pltpu.MemorySpace.SMEM),
        ],
        out_specs=pl.BlockSpec((nb, cout, th, w), lambda i, r: (i, 0, r, 0)),
        scratch_shapes=[pltpu.VMEM((nb, cin, h + 2, w + 2), jnp.float32)],
        compiler_params=pltpu.CompilerParams(
            dimension_semantics=("parallel", "arbitrary"),
            vmem_limit_bytes=vmem_limit),
    )(x_nchw, weight.reshape(-1).astype(jnp.float32))


def downsample_forward(x_btchw, weight):
    """Downsample.forward: (b, t, C, H, W) -> (b, t, 2*C, H/2, W/2)."""
    b, t, c, h, w = x_btchw.shape
    cout, cin, kh, kw = weight.shape
    assert (cin, kh, kw) == (c, 3, 3) and cout == c // 2
    assert h % 2 == 0 and w % 2 == 0

    x = x_btchw.reshape(b * t, c, h, w)                 # 'b t c h w -> (b t) c h w'
    y = conv3x3_same_nchw(x, weight)                    # (N, C//2, H, W)  Pallas

    # PixelUnshuffle(2) + the (b t) split: pure layout plumbing, one fused XLA
    # reshape/transpose of the conv output.
    y = y.reshape(b * t, cout, h // 2, 2, w // 2, 2)    # (n, co, yy, i, xx, j)
    y = jnp.transpose(y, (0, 1, 3, 5, 2, 4))            # (n, co, i, j, yy, xx)
    return y.reshape(b, t, cout * 4, h // 2, w // 2)    # co*4 + 2*i + j channel order


# --------------------------- pure-JAX reference ----------------------------- #

def reference_forward(x_btchw, weight):
    b, t, c, h, w = x_btchw.shape
    cout = weight.shape[0]
    x = x_btchw.reshape(b * t, c, h, w)
    y = jax.lax.conv_general_dilated(
        x, weight, window_strides=(1, 1), padding=[(1, 1), (1, 1)],
        dimension_numbers=("NCHW", "OIHW", "NCHW"))
    y = y.reshape(b * t, cout, h // 2, 2, w // 2, 2)
    y = jnp.transpose(y, (0, 1, 3, 5, 2, 4))
    return y.reshape(b, t, cout * 4, h // 2, w // 2)


# ----------------------------------- main ----------------------------------- #

if __name__ == "__main__":
    key = jax.random.PRNGKey(0)
    kx, kw = jax.random.split(key)

    b, t, n_feat, H, W = 2, 2, 4, 16, 16
    x = jax.random.normal(kx, (b, t, n_feat, H, W), jnp.float32)
    weight = 0.1 * jax.random.normal(kw, (n_feat // 2, n_feat, 3, 3), jnp.float32)

    out = jax.jit(downsample_forward)(x, weight)
    out = jax.block_until_ready(out)

    ref = reference_forward(x, weight)
    assert out.shape == (b, t, 2 * n_feat, H // 2, W // 2), out.shape
    assert jnp.allclose(out, ref, atol=1e-4, rtol=1e-4), float(jnp.max(jnp.abs(out - ref)))
    print("KERNEL_OK")
</pallas_src>

<mosaic_0001>
module attributes {stable_mosaic.version = 11 : i64} {
  func.func @_conv3x3_kernel(%arg0: i32, %arg1: i32, %arg2: memref<4x4x16x16xf32, #tpu.memory_space<vmem>>, %arg3: memref<72xf32, #tpu.memory_space<smem>>, %arg4: memref<4x2x16x16xf32, #tpu.memory_space<vmem>>, %arg5: memref<4x4x18x18xf32, #tpu.memory_space<vmem>>) attributes {dimension_semantics = [#tpu.dimension_semantics<parallel>, #tpu.dimension_semantics<arbitrary>], iteration_bounds = array<i64: 1, 1>, scalar_prefetch = 0 : i64, scratch_operands = 1 : i64, tpu.core_type = #tpu.core_type<tc>, window_params = [{transform_indices = @transform_0, window_bounds = array<i64: 4, 4, 16, 16>}, {transform_indices = @transform_1, window_bounds = array<i64: 72>}, {transform_indices = @transform_2, window_bounds = array<i64: 4, 2, 16, 16>}]} {
    %c0_i32 = arith.constant 0 : i32
    %0 = arith.cmpi eq, %arg1, %c0_i32 : i32
    %1 = arith.extui %0 : i1 to i32
    %c0_i32_0 = arith.constant 0 : i32
    %2 = arith.cmpi ne, %1, %c0_i32_0 : i32
    scf.if %2 {
      %cst = arith.constant 0.000000e+00 : f32
      %441 = vector.broadcast %cst : f32 to vector<4x4x18x18xf32>
      %c0_151 = arith.constant 0 : index
      %c0_152 = arith.constant 0 : index
      %c0_153 = arith.constant 0 : index
      %c0_154 = arith.constant 0 : index
      %442 = vector.load %arg5[%c0_151, %c0_152, %c0_153, %c0_154] : memref<4x4x18x18xf32, #tpu.memory_space<vmem>>, vector<4x4x18x18xf32>
      tpu.vector_store %arg5[%c0_151, %c0_152, %c0_153, %c0_154], %441 {strides = array<i32>} : memref<4x4x18x18xf32, #tpu.memory_space<vmem>>, vector<4x4x18x18xf32>,
      %c0_155 = arith.constant 0 : index
      %c0_156 = arith.constant 0 : index
      %c0_157 = arith.constant 0 : index
      %c0_158 = arith.constant 0 : index
      %443 = vector.load %arg2[%c0_155, %c0_156, %c0_157, %c0_158] : memref<4x4x16x16xf32, #tpu.memory_space<vmem>>, vector<4x4x16x16xf32>
      %c0_159 = arith.constant 0 : index
      %c0_160 = arith.constant 0 : index
      %c1_161 = arith.constant 1 : index
      %c1_162 = arith.constant 1 : index
      %444 = vector.load %arg5[%c0_159, %c0_160, %c1_161, %c1_162] : memref<4x4x18x18xf32, #tpu.memory_space<vmem>>, vector<4x4x16x16xf32>
      tpu.vector_store %arg5[%c0_159, %c0_160, %c1_161, %c1_162], %443 {strides = array<i32>} : memref<4x4x18x18xf32, #tpu.memory_space<vmem>>, vector<4x4x16x16xf32>,
    } else {
    }
    %c16_i32 = arith.constant 16 : i32
    %3 = arith.muli %arg1, %c16_i32 : i32
    %4 = tpu.assume_multiple %3, 8 : i32
    %c0_i32_1 = arith.constant 0 : i32
    %5 = arith.addi %4, %c0_i32_1 : i32
    %c0 = arith.constant 0 : index
    %c0_2 = arith.constant 0 : index
    %6 = arith.index_cast %5 : i32 to index
    %c0_3 = arith.constant 0 : index
    %7 = vector.load %arg5[%c0, %c0_2, %6, %c0_3] : memref<4x4x18x18xf32, #tpu.memory_space<vmem>>, vector<4x1x16x16xf32>
    %8 = vector.shape_cast %7 : vector<4x1x16x16xf32> to vector<4x16x16xf32>
    %c0_4 = arith.constant 0 : index
    %9 = memref.load %arg3[%c0_4] : memref<72xf32, #tpu.memory_space<smem>>
    %10 = vector.broadcast %9 : f32 to vector<4x16x16xf32>
    %11 = arith.mulf %8, %10 : vector<4x16x16xf32>
    %c36 = arith.constant 36 : index
    %12 = memref.load %arg3[%c36] : memref<72xf32, #tpu.memory_space<smem>>
    %13 = vector.broadcast %12 : f32 to vector<4x16x16xf32>
    %14 = arith.mulf %8, %13 : vector<4x16x16xf32>
    %c0_i32_5 = arith.constant 0 : i32
    %15 = arith.addi %4, %c0_i32_5 : i32
    %c0_6 = arith.constant 0 : index
    %c0_7 = arith.constant 0 : index
    %16 = arith.index_cast %15 : i32 to index
    %c1 = arith.constant 1 : index
    %17 = vector.load %arg5[%c0_6, %c0_7, %16, %c1] : memref<4x4x18x18xf32, #tpu.memory_space<vmem>>, vector<4x1x16x16xf32>
    %18 = vector.shape_cast %17 : vector<4x1x16x16xf32> to vector<4x16x16xf32>
    %c1_8 = arith.constant 1 : index
    %19 = memref.load %arg3[%c1_8] : memref<72xf32, #tpu.memory_space<smem>>
    %20 = vector.broadcast %19 : f32 to vector<4x16x16xf32>
    %21 = arith.mulf %18, %20 : vector<4x16x16xf32>
    %22 = arith.addf %11, %21 : vector<4x16x16xf32>
    %c37 = arith.constant 37 : index
    %23 = memref.load %arg3[%c37] : memref<72xf32, #tpu.memory_space<smem>>
    %24 = vector.broadcast %23 : f32 to vector<4x16x16xf32>
    %25 = arith.mulf %18, %24 : vector<4x16x16xf32>
    %26 = arith.addf %14, %25 : vector<4x16x16xf32>
    %c0_i32_9 = arith.constant 0 : i32
    %27 = arith.addi %4, %c0_i32_9 : i32
    %c0_10 = arith.constant 0 : index
    %c0_11 = arith.constant 0 : index
    %28 = arith.index_cast %27 : i32 to index
    %c2 = arith.constant 2 : index
    %29 = vector.load %arg5[%c0_10, %c0_11, %28, %c2] : memref<4x4x18x18xf32, #tpu.memory_space<vmem>>, vector<4x1x16x16xf32>
    %30 = vector.shape_cast %29 : vector<4x1x16x16xf32> to vector<4x16x16xf32>
    %c2_12 = arith.constant 2 : index
    %31 = memref.load %arg3[%c2_12] : memref<72xf32, #tpu.memory_space<smem>>
    %32 = vector.broadcast %31 : f32 to vector<4x16x16xf32>
    %33 = arith.mulf %30, %32 : vector<4x16x16xf32>
    %34 = arith.addf %22, %33 : vector<4x16x16xf32>
    %c38 = arith.constant 38 : index
    %35 = memref.load %arg3[%c38] : memref<72xf32, #tpu.memory_space<smem>>
    %36 = vector.broadcast %35 : f32 to vector<4x16x16xf32>
    %37 = arith.mulf %30, %36 : vector<4x16x16xf32>
    %38 = arith.addf %26, %37 : vector<4x16x16xf32>
    %c1_i32 = arith.constant 1 : i32
    %39 = arith.addi %4, %c1_i32 : i32
    %c0_13 = arith.constant 0 : index
    %c0_14 = arith.constant 0 : index
    %40 = arith.index_cast %39 : i32 to index
    %c0_15 = arith.constant 0 : index
    %41 = vector.load %arg5[%c0_13, %c0_14, %40, %c0_15] : memref<4x4x18x18xf32, #tpu.memory_space<vmem>>, vector<4x1x16x16xf32>
    %42 = vector.shape_cast %41 : vector<4x1x16x16xf32> to vector<4x16x16xf32>
    %c3 = arith.constant 3 : index
    %43 = memref.load %arg3[%c3] : memref<72xf32, #tpu.memory_space<smem>>
    %44 = vector.broadcast %43 : f32 to vector<4x16x16xf32>
    %45 = arith.mulf %42, %44 : vector<4x16x16xf32>
    %46 = arith.addf %34, %45 : vector<4x16x16xf32>
    %c39 = arith.constant 39 : index
    %47 = memref.load %arg3[%c39] : memref<72xf32, #tpu.memory_space<smem>>
    %48 = vector.broadcast %47 : f32 to vector<4x16x16xf32>
    %49 = arith.mulf %42, %48 : vector<4x16x16xf32>
    %50 = arith.addf %38, %49 : vector<4x16x16xf32>
    %c1_i32_16 = arith.constant 1 : i32
    %51 = arith.addi %4, %c1_i32_16 : i32
    %c0_17 = arith.constant 0 : index
    %c0_18 = arith.constant 0 : index
    %52 = arith.index_cast %51 : i32 to index
    %c1_19 = arith.constant 1 : index
    %53 = vector.load %arg5[%c0_17, %c0_18, %52, %c1_19] : memref<4x4x18x18xf32, #tpu.memory_space<vmem>>, vector<4x1x16x16xf32>
    %54 = vector.shape_cast %53 : vector<4x1x16x16xf32> to vector<4x16x16xf32>
    %c4 = arith.constant 4 : index
    %55 = memref.load %arg3[%c4] : memref<72xf32, #tpu.memory_space<smem>>
    %56 = vector.broadcast %55 : f32 to vector<4x16x16xf32>
    %57 = arith.mulf %54, %56 : vector<4x16x16xf32>
    %58 = arith.addf %46, %57 : vector<4x16x16xf32>
    %c40 = arith.constant 40 : index
    %59 = memref.load %arg3[%c40] : memref<72xf32, #tpu.memory_space<smem>>
    %60 = vector.broadcast %59 : f32 to vector<4x16x16xf32>
    %61 = arith.mulf %54, %60 : vector<4x16x16xf32>
    %62 = arith.addf %50, %61 : vector<4x16x16xf32>
    %c1_i32_20 = arith.constant 1 : i32
    %63 = arith.addi %4, %c1_i32_20 : i32
    %c0_21 = arith.constant 0 : index
    %c0_22 = arith.constant 0 : index
    %64 = arith.index_cast %63 : i32 to index
    %c2_23 = arith.constant 2 : index
    %65 = vector.load %arg5[%c0_21, %c0_22, %64, %c2_23] : memref<4x4x18x18xf32, #tpu.memory_space<vmem>>, vector<4x1x16x16xf32>
    %66 = vector.shape_cast %65 : vector<4x1x16x16xf32> to vector<4x16x16xf32>
    %c5 = arith.constant 5 : index
    %67 = memref.load %arg3[%c5] : memref<72xf32, #tpu.memory_space<smem>>
    %68 = vector.broadcast %67 : f32 to vector<4x16x16xf32>
    %69 = arith.mulf %66, %68 : vector<4x16x16xf32>
    %70 = arith.addf %58, %69 : vector<4x16x16xf32>
    %c41 = arith.constant 41 : index
    %71 = memref.load %arg3[%c41] : memref<72xf32, #tpu.memory_space<smem>>
    %72 = vector.broadcast %71 : f32 to vector<4x16x16xf32>
    %73 = arith.mulf %66, %72 : vector<4x16x16xf32>
    %74 = arith.addf %62, %73 : vector<4x16x16xf32>
    %c2_i32 = arith.constant 2 : i32
    %75 = arith.addi %4, %c2_i32 : i32
    %c0_24 = arith.constant 0 : index
    %c0_25 = arith.constant 0 : index
    %76 = arith.index_cast %75 : i32 to index
    %c0_26 = arith.constant 0 : index
    %77 = vector.load %arg5[%c0_24, %c0_25, %76, %c0_26] : memref<4x4x18x18xf32, #tpu.memory_space<vmem>>, vector<4x1x16x16xf32>
    %78 = vector.shape_cast %77 : vector<4x1x16x16xf32> to vector<4x16x16xf32>
    %c6 = arith.constant 6 : index
    %79 = memref.load %arg3[%c6] : memref<72xf32, #tpu.memory_space<smem>>
    %80 = vector.broadcast %79 : f32 to vector<4x16x16xf32>
    %81 = arith.mulf %78, %80 : vector<4x16x16xf32>
    %82 = arith.addf %70, %81 : vector<4x16x16xf32>
    %c42 = arith.constant 42 : index
    %83 = memref.load %arg3[%c42] : memref<72xf32, #tpu.memory_space<smem>>
    %84 = vector.broadcast %83 : f32 to vector<4x16x16xf32>
    %85 = arith.mulf %78, %84 : vector<4x16x16xf32>
    %86 = arith.addf %74, %85 : vector<4x16x16xf32>
    %c2_i32_27 = arith.constant 2 : i32
    %87 = arith.addi %4, %c2_i32_27 : i32
    %c0_28 = arith.constant 0 : index
    %c0_29 = arith.constant 0 : index
    %88 = arith.index_cast %87 : i32 to index
    %c1_30 = arith.constant 1 : index
    %89 = vector.load %arg5[%c0_28, %c0_29, %88, %c1_30] : memref<4x4x18x18xf32, #tpu.memory_space<vmem>>, vector<4x1x16x16xf32>
    %90 = vector.shape_cast %89 : vector<4x1x16x16xf32> to vector<4x16x16xf32>
    %c7 = arith.constant 7 : index
    %91 = memref.load %arg3[%c7] : memref<72xf32, #tpu.memory_space<smem>>
    %92 = vector.broadcast %91 : f32 to vector<4x16x16xf32>
    %93 = arith.mulf %90, %92 : vector<4x16x16xf32>
    %94 = arith.addf %82, %93 : vector<4x16x16xf32>
    %c43 = arith.constant 43 : index
    %95 = memref.load %arg3[%c43] : memref<72xf32, #tpu.memory_space<smem>>
    %96 = vector.broadcast %95 : f32 to vector<4x16x16xf32>
    %97 = arith.mulf %90, %96 : vector<4x16x16xf32>
    %98 = arith.addf %86, %97 : vector<4x16x16xf32>
    %c2_i32_31 = arith.constant 2 : i32
    %99 = arith.addi %4, %c2_i32_31 : i32
    %c0_32 = arith.constant 0 : index
    %c0_33 = arith.constant 0 : index
    %100 = arith.index_cast %99 : i32 to index
    %c2_34 = arith.constant 2 : index
    %101 = vector.load %arg5[%c0_32, %c0_33, %100, %c2_34] : memref<4x4x18x18xf32, #tpu.memory_space<vmem>>, vector<4x1x16x16xf32>
    %102 = vector.shape_cast %101 : vector<4x1x16x16xf32> to vector<4x16x16xf32>
    %c8 = arith.constant 8 : index
    %103 = memref.load %arg3[%c8] : memref<72xf32, #tpu.memory_space<smem>>
    %104 = vector.broadcast %103 : f32 to vector<4x16x16xf32>
    %105 = arith.mulf %102, %104 : vector<4x16x16xf32>
    %106 = arith.addf %94, %105 : vector<4x16x16xf32>
    %c44 = arith.constant 44 : index
    %107 = memref.load %arg3[%c44] : memref<72xf32, #tpu.memory_space<smem>>
    %108 = vector.broadcast %107 : f32 to vector<4x16x16xf32>
    %109 = arith.mulf %102, %108 : vector<4x16x16xf32>
    %110 = arith.addf %98, %109 : vector<4x16x16xf32>
    %c0_i32_35 = arith.constant 0 : i32
    %111 = arith.addi %4, %c0_i32_35 : i32
    %c0_36 = arith.constant 0 : index
    %c1_37 = arith.constant 1 : index
    %112 = arith.index_cast %111 : i32 to index
    %c0_38 = arith.constant 0 : index
    %113 = vector.load %arg5[%c0_36, %c1_37, %112, %c0_38] : memref<4x4x18x18xf32, #tpu.memory_space<vmem>>, vector<4x1x16x16xf32>
    %114 = vector.shape_cast %113 : vector<4x1x16x16xf32> to vector<4x16x16xf32>
    %c9 = arith.constant 9 : index
    %115 = memref.load %arg3[%c9] : memref<72xf32, #tpu.memory_space<smem>>
    %116 = vector.broadcast %115 : f32 to vector<4x16x16xf32>
    %117 = arith.mulf %114, %116 : vector<4x16x16xf32>
    %118 = arith.addf %106, %117 : vector<4x16x16xf32>
    %c45 = arith.constant 45 : index
    %119 = memref.load %arg3[%c45] : memref<72xf32, #tpu.memory_space<smem>>
    %120 = vector.broadcast %119 : f32 to vector<4x16x16xf32>
    %121 = arith.mulf %114, %120 : vector<4x16x16xf32>
    %122 = arith.addf %110, %121 : vector<4x16x16xf32>
    %c0_i32_39 = arith.constant 0 : i32
    %123 = arith.addi %4, %c0_i32_39 : i32
    %c0_40 = arith.constant 0 : index
    %c1_41 = arith.constant 1 : index
    %124 = arith.index_cast %123 : i32 to index
    %c1_42 = arith.constant 1 : index
    %125 = vector.load %arg5[%c0_40, %c1_41, %124, %c1_42] : memref<4x4x18x18xf32, #tpu.memory_space<vmem>>, vector<4x1x16x16xf32>
    %126 = vector.shape_cast %125 : vector<4x1x16x16xf32> to vector<4x16x16xf32>
    %c10 = arith.constant 10 : index
    %127 = memref.load %arg3[%c10] : memref<72xf32, #tpu.memory_space<smem>>
    %128 = vector.broadcast %127 : f32 to vector<4x16x16xf32>
    %129 = arith.mulf %126, %128 : vector<4x16x16xf32>
    %130 = arith.addf %118, %129 : vector<4x16x16xf32>
    %c46 = arith.constant 46 : index
    %131 = memref.load %arg3[%c46] : memref<72xf32, #tpu.memory_space<smem>>
    %132 = vector.broadcast %131 : f32 to vector<4x16x16xf32>
    %133 = arith.mulf %126, %132 : vector<4x16x16xf32>
    %134 = arith.addf %122, %133 : vector<4x16x16xf32>
    %c0_i32_43 = arith.constant 0 : i32
    %135 = arith.addi %4, %c0_i32_43 : i32
    %c0_44 = arith.constant 0 : index
    %c1_45 = arith.constant 1 : index
    %136 = arith.index_cast %135 : i32 to index
    %c2_46 = arith.constant 2 : index
    %137 = vector.load %arg5[%c0_44, %c1_45, %136, %c2_46] : memref<4x4x18x18xf32, #tpu.memory_space<vmem>>, vector<4x1x16x16xf32>
    %138 = vector.shape_cast %137 : vector<4x1x16x16xf32> to vector<4x16x16xf32>
    %c11 = arith.constant 11 : index
    %139 = memref.load %arg3[%c11] : memref<72xf32, #tpu.memory_space<smem>>
    %140 = vector.broadcast %139 : f32 to vector<4x16x16xf32>
    %141 = arith.mulf %138, %140 : vector<4x16x16xf32>
    %142 = arith.addf %130, %141 : vector<4x16x16xf32>
    %c47 = arith.constant 47 : index
    %143 = memref.load %arg3[%c47] : memref<72xf32, #tpu.memory_space<smem>>
    %144 = vector.broadcast %143 : f32 to vector<4x16x16xf32>
    %145 = arith.mulf %138, %144 : vector<4x16x16xf32>
    %146 = arith.addf %134, %145 : vector<4x16x16xf32>
    %c1_i32_47 = arith.constant 1 : i32
    %147 = arith.addi %4, %c1_i32_47 : i32
    %c0_48 = arith.constant 0 : index
    %c1_49 = arith.constant 1 : index
    %148 = arith.index_cast %147 : i32 to index
    %c0_50 = arith.constant 0 : index
    %149 = vector.load %arg5[%c0_48, %c1_49, %148, %c0_50] : memref<4x4x18x18xf32, #tpu.memory_space<vmem>>, vector<4x1x16x16xf32>
    %150 = vector.shape_cast %149 : vector<4x1x16x16xf32> to vector<4x16x16xf32>
    %c12 = arith.constant 12 : index
    %151 = memref.load %arg3[%c12] : memref<72xf32, #tpu.memory_space<smem>>
    %152 = vector.broadcast %151 : f32 to vector<4x16x16xf32>
    %153 = arith.mulf %150, %152 : vector<4x16x16xf32>
    %154 = arith.addf %142, %153 : vector<4x16x16xf32>
    %c48 = arith.constant 48 : index
    %155 = memref.load %arg3[%c48] : memref<72xf32, #tpu.memory_space<smem>>
    %156 = vector.broadcast %155 : f32 to vector<4x16x16xf32>
    %157 = arith.mulf %150, %156 : vector<4x16x16xf32>
    %158 = arith.addf %146, %157 : vector<4x16x16xf32>
    %c1_i32_51 = arith.constant 1 : i32
    %159 = arith.addi %4, %c1_i32_51 : i32
    %c0_52 = arith.constant 0 : index
    %c1_53 = arith.constant 1 : index
    %160 = arith.index_cast %159 : i32 to index
    %c1_54 = arith.constant 1 : index
    %161 = vector.load %arg5[%c0_52, %c1_53, %160, %c1_54] : memref<4x4x18x18xf32, #tpu.memory_space<vmem>>, vector<4x1x16x16xf32>
    %162 = vector.shape_cast %161 : vector<4x1x16x16xf32> to vector<4x16x16xf32>
    %c13 = arith.constant 13 : index
    %163 = memref.load %arg3[%c13] : memref<72xf32, #tpu.memory_space<smem>>
    %164 = vector.broadcast %163 : f32 to vector<4x16x16xf32>
    %165 = arith.mulf %162, %164 : vector<4x16x16xf32>
    %166 = arith.addf %154, %165 : vector<4x16x16xf32>
    %c49 = arith.constant 49 : index
    %167 = memref.load %arg3[%c49] : memref<72xf32, #tpu.memory_space<smem>>
    %168 = vector.broadcast %167 : f32 to vector<4x16x16xf32>
    %169 = arith.mulf %162, %168 : vector<4x16x16xf32>
    %170 = arith.addf %158, %169 : vector<4x16x16xf32>
    %c1_i32_55 = arith.constant 1 : i32
    %171 = arith.addi %4, %c1_i32_55 : i32
    %c0_56 = arith.constant 0 : index
    %c1_57 = arith.constant 1 : index
    %172 = arith.index_cast %171 : i32 to index
    %c2_58 = arith.constant 2 : index
    %173 = vector.load %arg5[%c0_56, %c1_57, %172, %c2_58] : memref<4x4x18x18xf32, #tpu.memory_space<vmem>>, vector<4x1x16x16xf32>
    %174 = vector.shape_cast %173 : vector<4x1x16x16xf32> to vector<4x16x16xf32>
    %c14 = arith.constant 14 : index
    %175 = memref.load %arg3[%c14] : memref<72xf32, #tpu.memory_space<smem>>
    %176 = vector.broadcast %175 : f32 to vector<4x16x16xf32>
    %177 = arith.mulf %174, %176 : vector<4x16x16xf32>
    %178 = arith.addf %166, %177 : vector<4x16x16xf32>
    %c50 = arith.constant 50 : index
    %179 = memref.load %arg3[%c50] : memref<72xf32, #tpu.memory_space<smem>>
    %180 = vector.broadcast %179 : f32 to vector<4x16x16xf32>
    %181 = arith.mulf %174, %180 : vector<4x16x16xf32>
    %182 = arith.addf %170, %181 : vector<4x16x16xf32>
    %c2_i32_59 = arith.constant 2 : i32
    %183 = arith.addi %4, %c2_i32_59 : i32
    %c0_60 = arith.constant 0 : index
    %c1_61 = arith.constant 1 : index
    %184 = arith.index_cast %183 : i32 to index
    %c0_62 = arith.constant 0 : index
    %185 = vector.load %arg5[%c0_60, %c1_61, %184, %c0_62] : memref<4x4x18x18xf32, #tpu.memory_space<vmem>>, vector<4x1x16x16xf32>
    %186 = vector.shape_cast %185 : vector<4x1x16x16xf32> to vector<4x16x16xf32>
    %c15 = arith.constant 15 : index
    %187 = memref.load %arg3[%c15] : memref<72xf32, #tpu.memory_space<smem>>
    %188 = vector.broadcast %187 : f32 to vector<4x16x16xf32>
    %189 = arith.mulf %186, %188 : vector<4x16x16xf32>
    %190 = arith.addf %178, %189 : vector<4x16x16xf32>
    %c51 = arith.constant 51 : index
    %191 = memref.load %arg3[%c51] : memref<72xf32, #tpu.memory_space<smem>>
    %192 = vector.broadcast %191 : f32 to vector<4x16x16xf32>
    %193 = arith.mulf %186, %192 : vector<4x16x16xf32>
    %194 = arith.addf %182, %193 : vector<4x16x16xf32>
    %c2_i32_63 = arith.constant 2 : i32
    %195 = arith.addi %4, %c2_i32_63 : i32
    %c0_64 = arith.constant 0 : index
    %c1_65 = arith.constant 1 : index
    %196 = arith.index_cast %195 : i32 to index
    %c1_66 = arith.constant 1 : index
    %197 = vector.load %arg5[%c0_64, %c1_65, %196, %c1_66] : memref<4x4x18x18xf32, #tpu.memory_space<vmem>>, vector<4x1x16x16xf32>
    %198 = vector.shape_cast %197 : vector<4x1x16x16xf32> to vector<4x16x16xf32>
    %c16 = arith.constant 16 : index
    %199 = memref.load %arg3[%c16] : memref<72xf32, #tpu.memory_space<smem>>
    %200 = vector.broadcast %199 : f32 to vector<4x16x16xf32>
    %201 = arith.mulf %198, %200 : vector<4x16x16xf32>
    %202 = arith.addf %190, %201 : vector<4x16x16xf32>
    %c52 = arith.constant 52 : index
    %203 = memref.load %arg3[%c52] : memref<72xf32, #tpu.memory_space<smem>>
    %204 = vector.broadcast %203 : f32 to vector<4x16x16xf32>
    %205 = arith.mulf %198, %204 : vector<4x16x16xf32>
    %206 = arith.addf %194, %205 : vector<4x16x16xf32>
    %c2_i32_67 = arith.constant 2 : i32
    %207 = arith.addi %4, %c2_i32_67 : i32
    %c0_68 = arith.constant 0 : index
    %c1_69 = arith.constant 1 : index
    %208 = arith.index_cast %207 : i32 to index
    %c2_70 = arith.constant 2 : index
    %209 = vector.load %arg5[%c0_68, %c1_69, %208, %c2_70] : memref<4x4x18x18xf32, #tpu.memory_space<vmem>>, vector<4x1x16x16xf32>
    %210 = vector.shape_cast %209 : vector<4x1x16x16xf32> to vector<4x16x16xf32>
    %c17 = arith.constant 17 : index
    %211 = memref.load %arg3[%c17] : memref<72xf32, #tpu.memory_space<smem>>
    %212 = vector.broadcast %211 : f32 to vector<4x16x16xf32>
    %213 = arith.mulf %210, %212 : vector<4x16x16xf32>
    %214 = arith.addf %202, %213 : vector<4x16x16xf32>
    %c53 = arith.constant 53 : index
    %215 = memref.load %arg3[%c53] : memref<72xf32, #tpu.memory_space<smem>>
    %216 = vector.broadcast %215 : f32 to vector<4x16x16xf32>
    %217 = arith.mulf %210, %216 : vector<4x16x16xf32>
    %218 = arith.addf %206, %217 : vector<4x16x16xf32>
    %c0_i32_71 = arith.constant 0 : i32
    %219 = arith.addi %4, %c0_i32_71 : i32
    %c0_72 = arith.constant 0 : index
    %c2_73 = arith.constant 2 : index
    %220 = arith.index_cast %219 : i32 to index
    %c0_74 = arith.constant 0 : index
    %221 = vector.load %arg5[%c0_72, %c2_73, %220, %c0_74] : memref<4x4x18x18xf32, #tpu.memory_space<vmem>>, vector<4x1x16x16xf32>
    %222 = vector.shape_cast %221 : vector<4x1x16x16xf32> to vector<4x16x16xf32>
    %c18 = arith.constant 18 : index
    %223 = memref.load %arg3[%c18] : memref<72xf32, #tpu.memory_space<smem>>
    %224 = vector.broadcast %223 : f32 to vector<4x16x16xf32>
    %225 = arith.mulf %222, %224 : vector<4x16x16xf32>
    %226 = arith.addf %214, %225 : vector<4x16x16xf32>
    %c54 = arith.constant 54 : index
    %227 = memref.load %arg3[%c54] : memref<72xf32, #tpu.memory_space<smem>>
    %228 = vector.broadcast %227 : f32 to vector<4x16x16xf32>
    %229 = arith.mulf %222, %228 : vector<4x16x16xf32>
    %230 = arith.addf %218, %229 : vector<4x16x16xf32>
    %c0_i32_75 = arith.constant 0 : i32
    %231 = arith.addi %4, %c0_i32_75 : i32
    %c0_76 = arith.constant 0 : index
    %c2_77 = arith.constant 2 : index
    %232 = arith.index_cast %231 : i32 to index
    %c1_78 = arith.constant 1 : index
    %233 = vector.load %arg5[%c0_76, %c2_77, %232, %c1_78] : memref<4x4x18x18xf32, #tpu.memory_space<vmem>>, vector<4x1x16x16xf32>
    %234 = vector.shape_cast %233 : vector<4x1x16x16xf32> to vector<4x16x16xf32>
    %c19 = arith.constant 19 : index
    %235 = memref.load %arg3[%c19] : memref<72xf32, #tpu.memory_space<smem>>
    %236 = vector.broadcast %235 : f32 to vector<4x16x16xf32>
    %237 = arith.mulf %234, %236 : vector<4x16x16xf32>
    %238 = arith.addf %226, %237 : vector<4x16x16xf32>
    %c55 = arith.constant 55 : index
    %239 = memref.load %arg3[%c55] : memref<72xf32, #tpu.memory_space<smem>>
    %240 = vector.broadcast %239 : f32 to vector<4x16x16xf32>
    %241 = arith.mulf %234, %240 : vector<4x16x16xf32>
    %242 = arith.addf %230, %241 : vector<4x16x16xf32>
    %c0_i32_79 = arith.constant 0 : i32
    %243 = arith.addi %4, %c0_i32_79 : i32
    %c0_80 = arith.constant 0 : index
    %c2_81 = arith.constant 2 : index
    %244 = arith.index_cast %243 : i32 to index
    %c2_82 = arith.constant 2 : index
    %245 = vector.load %arg5[%c0_80, %c2_81, %244, %c2_82] : memref<4x4x18x18xf32, #tpu.memory_space<vmem>>, vector<4x1x16x16xf32>
    %246 = vector.shape_cast %245 : vector<4x1x16x16xf32> to vector<4x16x16xf32>
    %c20 = arith.constant 20 : index
    %247 = memref.load %arg3[%c20] : memref<72xf32, #tpu.memory_space<smem>>
    %248 = vector.broadcast %247 : f32 to vector<4x16x16xf32>
    %249 = arith.mulf %246, %248 : vector<4x16x16xf32>
    %250 = arith.addf %238, %249 : vector<4x16x16xf32>
    %c56 = arith.constant 56 : index
    %251 = memref.load %arg3[%c56] : memref<72xf32, #tpu.memory_space<smem>>
    %252 = vector.broadcast %251 : f32 to vector<4x16x16xf32>
    %253 = arith.mulf %246, %252 : vector<4x16x16xf32>
    %254 = arith.addf %242, %253 : vector<4x16x16xf32>
    %c1_i32_83 = arith.constant 1 : i32
    %255 = arith.addi %4, %c1_i32_83 : i32
    %c0_84 = arith.constant 0 : index
    %c2_85 = arith.constant 2 : index
    %256 = arith.index_cast %255 : i32 to index
    %c0_86 = arith.constant 0 : index
    %257 = vector.load %arg5[%c0_84, %c2_85, %256, %c0_86] : memref<4x4x18x18xf32, #tpu.memory_space<vmem>>, vector<4x1x16x16xf32>
    %258 = vector.shape_cast %257 : vector<4x1x16x16xf32> to vector<4x16x16xf32>
    %c21 = arith.constant 21 : index
    %259 = memref.load %arg3[%c21] : memref<72xf32, #tpu.memory_space<smem>>
    %260 = vector.broadcast %259 : f32 to vector<4x16x16xf32>
    %261 = arith.mulf %258, %260 : vector<4x16x16xf32>
    %262 = arith.addf %250, %261 : vector<4x16x16xf32>
    %c57 = arith.constant 57 : index
    %263 = memref.load %arg3[%c57] : memref<72xf32, #tpu.memory_space<smem>>
    %264 = vector.broadcast %263 : f32 to vector<4x16x16xf32>
    %265 = arith.mulf %258, %264 : vector<4x16x16xf32>
    %266 = arith.addf %254, %265 : vector<4x16x16xf32>
    %c1_i32_87 = arith.constant 1 : i32
    %267 = arith.addi %4, %c1_i32_87 : i32
    %c0_88 = arith.constant 0 : index
    %c2_89 = arith.constant 2 : index
    %268 = arith.index_cast %267 : i32 to index
    %c1_90 = arith.constant 1 : index
    %269 = vector.load %arg5[%c0_88, %c2_89, %268, %c1_90] : memref<4x4x18x18xf32, #tpu.memory_space<vmem>>, vector<4x1x16x16xf32>
    %270 = vector.shape_cast %269 : vector<4x1x16x16xf32> to vector<4x16x16xf32>
    %c22 = arith.constant 22 : index
    %271 = memref.load %arg3[%c22] : memref<72xf32, #tpu.memory_space<smem>>
    %272 = vector.broadcast %271 : f32 to vector<4x16x16xf32>
    %273 = arith.mulf %270, %272 : vector<4x16x16xf32>
    %274 = arith.addf %262, %273 : vector<4x16x16xf32>
    %c58 = arith.constant 58 : index
    %275 = memref.load %arg3[%c58] : memref<72xf32, #tpu.memory_space<smem>>
    %276 = vector.broadcast %275 : f32 to vector<4x16x16xf32>
    %277 = arith.mulf %270, %276 : vector<4x16x16xf32>
    %278 = arith.addf %266, %277 : vector<4x16x16xf32>
    %c1_i32_91 = arith.constant 1 : i32
    %279 = arith.addi %4, %c1_i32_91 : i32
    %c0_92 = arith.constant 0 : index
    %c2_93 = arith.constant 2 : index
    %280 = arith.index_cast %279 : i32 to index
    %c2_94 = arith.constant 2 : index
    %281 = vector.load %arg5[%c0_92, %c2_93, %280, %c2_94] : memref<4x4x18x18xf32, #tpu.memory_space<vmem>>, vector<4x1x16x16xf32>
    %282 = vector.shape_cast %281 : vector<4x1x16x16xf32> to vector<4x16x16xf32>
    %c23 = arith.constant 23 : index
    %283 = memref.load %arg3[%c23] : memref<72xf32, #tpu.memory_space<smem>>
    %284 = vector.broadcast %283 : f32 to vector<4x16x16xf32>
    %285 = arith.mulf %282, %284 : vector<4x16x16xf32>
    %286 = arith.addf %274, %285 : vector<4x16x16xf32>
    %c59 = arith.constant 59 : index
    %287 = memref.load %arg3[%c59] : memref<72xf32, #tpu.memory_space<smem>>
    %288 = vector.broadcast %287 : f32 to vector<4x16x16xf32>
    %289 = arith.mulf %282, %288 : vector<4x16x16xf32>
    %290 = arith.addf %278, %289 : vector<4x16x16xf32>
    %c2_i32_95 = arith.constant 2 : i32
    %291 = arith.addi %4, %c2_i32_95 : i32
    %c0_96 = arith.constant 0 : index
    %c2_97 = arith.constant 2 : index
    %292 = arith.index_cast %291 : i32 to index
    %c0_98 = arith.constant 0 : index
    %293 = vector.load %arg5[%c0_96, %c2_97, %292, %c0_98] : memref<4x4x18x18xf32, #tpu.memory_space<vmem>>, vector<4x1x16x16xf32>
    %294 = vector.shape_cast %293 : vector<4x1x16x16xf32> to vector<4x16x16xf32>
    %c24 = arith.constant 24 : index
    %295 = memref.load %arg3[%c24] : memref<72xf32, #tpu.memory_space<smem>>
    %296 = vector.broadcast %295 : f32 to vector<4x16x16xf32>
    %297 = arith.mulf %294, %296 : vector<4x16x16xf32>
    %298 = arith.addf %286, %297 : vector<4x16x16xf32>
    %c60 = arith.constant 60 : index
    %299 = memref.load %arg3[%c60] : memref<72xf32, #tpu.memory_space<smem>>
    %300 = vector.broadcast %299 : f32 to vector<4x16x16xf32>
    %301 = arith.mulf %294, %300 : vector<4x16x16xf32>
    %302 = arith.addf %290, %301 : vector<4x16x16xf32>
    %c2_i32_99 = arith.constant 2 : i32
    %303 = arith.addi %4, %c2_i32_99 : i32
    %c0_100 = arith.constant 0 : index
    %c2_101 = arith.constant 2 : index
    %304 = arith.index_cast %303 : i32 to index
    %c1_102 = arith.constant 1 : index
    %305 = vector.load %arg5[%c0_100, %c2_101, %304, %c1_102] : memref<4x4x18x18xf32, #tpu.memory_space<vmem>>, vector<4x1x16x16xf32>
    %306 = vector.shape_cast %305 : vector<4x1x16x16xf32> to vector<4x16x16xf32>
    %c25 = arith.constant 25 : index
    %307 = memref.load %arg3[%c25] : memref<72xf32, #tpu.memory_space<smem>>
    %308 = vector.broadcast %307 : f32 to vector<4x16x16xf32>
    %309 = arith.mulf %306, %308 : vector<4x16x16xf32>
    %310 = arith.addf %298, %309 : vector<4x16x16xf32>
    %c61 = arith.constant 61 : index
    %311 = memref.load %arg3[%c61] : memref<72xf32, #tpu.memory_space<smem>>
    %312 = vector.broadcast %311 : f32 to vector<4x16x16xf32>
    %313 = arith.mulf %306, %312 : vector<4x16x16xf32>
    %314 = arith.addf %302, %313 : vector<4x16x16xf32>
    %c2_i32_103 = arith.constant 2 : i32
    %315 = arith.addi %4, %c2_i32_103 : i32
    %c0_104 = arith.constant 0 : index
    %c2_105 = arith.constant 2 : index
    %316 = arith.index_cast %315 : i32 to index
    %c2_106 = arith.constant 2 : index
    %317 = vector.load %arg5[%c0_104, %c2_105, %316, %c2_106] : memref<4x4x18x18xf32, #tpu.memory_space<vmem>>, vector<4x1x16x16xf32>
    %318 = vector.shape_cast %317 : vector<4x1x16x16xf32> to vector<4x16x16xf32>
    %c26 = arith.constant 26 : index
    %319 = memref.load %arg3[%c26] : memref<72xf32, #tpu.memory_space<smem>>
    %320 = vector.broadcast %319 : f32 to vector<4x16x16xf32>
    %321 = arith.mulf %318, %320 : vector<4x16x16xf32>
    %322 = arith.addf %310, %321 : vector<4x16x16xf32>
    %c62 = arith.constant 62 : index
    %323 = memref.load %arg3[%c62] : memref<72xf32, #tpu.memory_space<smem>>
    %324 = vector.broadcast %323 : f32 to vector<4x16x16xf32>
    %325 = arith.mulf %318, %324 : vector<4x16x16xf32>
    %326 = arith.addf %314, %325 : vector<4x16x16xf32>
    %c0_i32_107 = arith.constant 0 : i32
    %327 = arith.addi %4, %c0_i32_107 : i32
    %c0_108 = arith.constant 0 : index
    %c3_109 = arith.constant 3 : index
    %328 = arith.index_cast %327 : i32 to index
    %c0_110 = arith.constant 0 : index
    %329 = vector.load %arg5[%c0_108, %c3_109, %328, %c0_110] : memref<4x4x18x18xf32, #tpu.memory_space<vmem>>, vector<4x1x16x16xf32>
    %330 = vector.shape_cast %329 : vector<4x1x16x16xf32> to vector<4x16x16xf32>
    %c27 = arith.constant 27 : index
    %331 = memref.load %arg3[%c27] : memref<72xf32, #tpu.memory_space<smem>>
    %332 = vector.broadcast %331 : f32 to vector<4x16x16xf32>
    %333 = arith.mulf %330, %332 : vector<4x16x16xf32>
    %334 = arith.addf %322, %333 : vector<4x16x16xf32>
    %c63 = arith.constant 63 : index
    %335 = memref.load %arg3[%c63] : memref<72xf32, #tpu.memory_space<smem>>
    %336 = vector.broadcast %335 : f32 to vector<4x16x16xf32>
    %337 = arith.mulf %330, %336 : vector<4x16x16xf32>
    %338 = arith.addf %326, %337 : vector<4x16x16xf32>
    %c0_i32_111 = arith.constant 0 : i32
    %339 = arith.addi %4, %c0_i32_111 : i32
    %c0_112 = arith.constant 0 : index
    %c3_113 = arith.constant 3 : index
    %340 = arith.index_cast %339 : i32 to index
    %c1_114 = arith.constant 1 : index
    %341 = vector.load %arg5[%c0_112, %c3_113, %340, %c1_114] : memref<4x4x18x18xf32, #tpu.memory_space<vmem>>, vector<4x1x16x16xf32>
    %342 = vector.shape_cast %341 : vector<4x1x16x16xf32> to vector<4x16x16xf32>
    %c28 = arith.constant 28 : index
    %343 = memref.load %arg3[%c28] : memref<72xf32, #tpu.memory_space<smem>>
    %344 = vector.broadcast %343 : f32 to vector<4x16x16xf32>
    %345 = arith.mulf %342, %344 : vector<4x16x16xf32>
    %346 = arith.addf %334, %345 : vector<4x16x16xf32>
    %c64 = arith.constant 64 : index
    %347 = memref.load %arg3[%c64] : memref<72xf32, #tpu.memory_space<smem>>
    %348 = vector.broadcast %347 : f32 to vector<4x16x16xf32>
    %349 = arith.mulf %342, %348 : vector<4x16x16xf32>
    %350 = arith.addf %338, %349 : vector<4x16x16xf32>
    %c0_i32_115 = arith.constant 0 : i32
    %351 = arith.addi %4, %c0_i32_115 : i32
    %c0_116 = arith.constant 0 : index
    %c3_117 = arith.constant 3 : index
    %352 = arith.index_cast %351 : i32 to index
    %c2_118 = arith.constant 2 : index
    %353 = vector.load %arg5[%c0_116, %c3_117, %352, %c2_118] : memref<4x4x18x18xf32, #tpu.memory_space<vmem>>, vector<4x1x16x16xf32>
    %354 = vector.shape_cast %353 : vector<4x1x16x16xf32> to vector<4x16x16xf32>
    %c29 = arith.constant 29 : index
    %355 = memref.load %arg3[%c29] : memref<72xf32, #tpu.memory_space<smem>>
    %356 = vector.broadcast %355 : f32 to vector<4x16x16xf32>
    %357 = arith.mulf %354, %356 : vector<4x16x16xf32>
    %358 = arith.addf %346, %357 : vector<4x16x16xf32>
    %c65 = arith.constant 65 : index
    %359 = memref.load %arg3[%c65] : memref<72xf32, #tpu.memory_space<smem>>
    %360 = vector.broadcast %359 : f32 to vector<4x16x16xf32>
    %361 = arith.mulf %354, %360 : vector<4x16x16xf32>
    %362 = arith.addf %350, %361 : vector<4x16x16xf32>
    %c1_i32_119 = arith.constant 1 : i32
    %363 = arith.addi %4, %c1_i32_119 : i32
    %c0_120 = arith.constant 0 : index
    %c3_121 = arith.constant 3 : index
    %364 = arith.index_cast %363 : i32 to index
    %c0_122 = arith.constant 0 : index
    %365 = vector.load %arg5[%c0_120, %c3_121, %364, %c0_122] : memref<4x4x18x18xf32, #tpu.memory_space<vmem>>, vector<4x1x16x16xf32>
    %366 = vector.shape_cast %365 : vector<4x1x16x16xf32> to vector<4x16x16xf32>
    %c30 = arith.constant 30 : index
    %367 = memref.load %arg3[%c30] : memref<72xf32, #tpu.memory_space<smem>>
    %368 = vector.broadcast %367 : f32 to vector<4x16x16xf32>
    %369 = arith.mulf %366, %368 : vector<4x16x16xf32>
    %370 = arith.addf %358, %369 : vector<4x16x16xf32>
    %c66 = arith.constant 66 : index
    %371 = memref.load %arg3[%c66] : memref<72xf32, #tpu.memory_space<smem>>
    %372 = vector.broadcast %371 : f32 to vector<4x16x16xf32>
    %373 = arith.mulf %366, %372 : vector<4x16x16xf32>
    %374 = arith.addf %362, %373 : vector<4x16x16xf32>
    %c1_i32_123 = arith.constant 1 : i32
    %375 = arith.addi %4, %c1_i32_123 : i32
    %c0_124 = arith.constant 0 : index
    %c3_125 = arith.constant 3 : index
    %376 = arith.index_cast %375 : i32 to index
    %c1_126 = arith.constant 1 : index
    %377 = vector.load %arg5[%c0_124, %c3_125, %376, %c1_126] : memref<4x4x18x18xf32, #tpu.memory_space<vmem>>, vector<4x1x16x16xf32>
    %378 = vector.shape_cast %377 : vector<4x1x16x16xf32> to vector<4x16x16xf32>
    %c31 = arith.constant 31 : index
    %379 = memref.load %arg3[%c31] : memref<72xf32, #tpu.memory_space<smem>>
    %380 = vector.broadcast %379 : f32 to vector<4x16x16xf32>
    %381 = arith.mulf %378, %380 : vector<4x16x16xf32>
    %382 = arith.addf %370, %381 : vector<4x16x16xf32>
    %c67 = arith.constant 67 : index
    %383 = memref.load %arg3[%c67] : memref<72xf32, #tpu.memory_space<smem>>
    %384 = vector.broadcast %383 : f32 to vector<4x16x16xf32>
    %385 = arith.mulf %378, %384 : vector<4x16x16xf32>
    %386 = arith.addf %374, %385 : vector<4x16x16xf32>
    %c1_i32_127 = arith.constant 1 : i32
    %387 = arith.addi %4, %c1_i32_127 : i32
    %c0_128 = arith.constant 0 : index
    %c3_129 = arith.constant 3 : index
    %388 = arith.index_cast %387 : i32 to index
    %c2_130 = arith.constant 2 : index
    %389 = vector.load %arg5[%c0_128, %c3_129, %388, %c2_130] : memref<4x4x18x18xf32, #tpu.memory_space<vmem>>, vector<4x1x16x16xf32>
    %390 = vector.shape_cast %389 : vector<4x1x16x16xf32> to vector<4x16x16xf32>
    %c32 = arith.constant 32 : index
    %391 = memref.load %arg3[%c32] : memref<72xf32, #tpu.memory_space<smem>>
    %392 = vector.broadcast %391 : f32 to vector<4x16x16xf32>
    %393 = arith.mulf %390, %392 : vector<4x16x16xf32>
    %394 = arith.addf %382, %393 : vector<4x16x16xf32>
    %c68 = arith.constant 68 : index
    %395 = memref.load %arg3[%c68] : memref<72xf32, #tpu.memory_space<smem>>
    %396 = vector.broadcast %395 : f32 to vector<4x16x16xf32>
    %397 = arith.mulf %390, %396 : vector<4x16x16xf32>
    %398 = arith.addf %386, %397 : vector<4x16x16xf32>
    %c2_i32_131 = arith.constant 2 : i32
    %399 = arith.addi %4, %c2_i32_131 : i32
    %c0_132 = arith.constant 0 : index
    %c3_133 = arith.constant 3 : index
    %400 = arith.index_cast %399 : i32 to index
    %c0_134 = arith.constant 0 : index
    %401 = vector.load %arg5[%c0_132, %c3_133, %400, %c0_134] : memref<4x4x18x18xf32, #tpu.memory_space<vmem>>, vector<4x1x16x16xf32>
    %402 = vector.shape_cast %401 : vector<4x1x16x16xf32> to vector<4x16x16xf32>
    %c33 = arith.constant 33 : index
    %403 = memref.load %arg3[%c33] : memref<72xf32, #tpu.memory_space<smem>>
    %404 = vector.broadcast %403 : f32 to vector<4x16x16xf32>
    %405 = arith.mulf %402, %404 : vector<4x16x16xf32>
    %406 = arith.addf %394, %405 : vector<4x16x16xf32>
    %c69 = arith.constant 69 : index
    %407 = memref.load %arg3[%c69] : memref<72xf32, #tpu.memory_space<smem>>
    %408 = vector.broadcast %407 : f32 to vector<4x16x16xf32>
    %409 = arith.mulf %402, %408 : vector<4x16x16xf32>
    %410 = arith.addf %398, %409 : vector<4x16x16xf32>
    %c2_i32_135 = arith.constant 2 : i32
    %411 = arith.addi %4, %c2_i32_135 : i32
    %c0_136 = arith.constant 0 : index
    %c3_137 = arith.constant 3 : index
    %412 = arith.index_cast %411 : i32 to index
    %c1_138 = arith.constant 1 : index
    %413 = vector.load %arg5[%c0_136, %c3_137, %412, %c1_138] : memref<4x4x18x18xf32, #tpu.memory_space<vmem>>, vector<4x1x16x16xf32>
    %414 = vector.shape_cast %413 : vector<4x1x16x16xf32> to vector<4x16x16xf32>
    %c34 = arith.constant 34 : index
    %415 = memref.load %arg3[%c34] : memref<72xf32, #tpu.memory_space<smem>>
    %416 = vector.broadcast %415 : f32 to vector<4x16x16xf32>
    %417 = arith.mulf %414, %416 : vector<4x16x16xf32>
    %418 = arith.addf %406, %417 : vector<4x16x16xf32>
    %c70 = arith.constant 70 : index
    %419 = memref.load %arg3[%c70] : memref<72xf32, #tpu.memory_space<smem>>
    %420 = vector.broadcast %419 : f32 to vector<4x16x16xf32>
    %421 = arith.mulf %414, %420 : vector<4x16x16xf32>
    %422 = arith.addf %410, %421 : vector<4x16x16xf32>
    %c2_i32_139 = arith.constant 2 : i32
    %423 = arith.addi %4, %c2_i32_139 : i32
    %c0_140 = arith.constant 0 : index
    %c3_141 = arith.constant 3 : index
    %424 = arith.index_cast %423 : i32 to index
    %c2_142 = arith.constant 2 : index
    %425 = vector.load %arg5[%c0_140, %c3_141, %424, %c2_142] : memref<4x4x18x18xf32, #tpu.memory_space<vmem>>, vector<4x1x16x16xf32>
    %426 = vector.shape_cast %425 : vector<4x1x16x16xf32> to vector<4x16x16xf32>
    %c35 = arith.constant 35 : index
    %427 = memref.load %arg3[%c35] : memref<72xf32, #tpu.memory_space<smem>>
    %428 = vector.broadcast %427 : f32 to vector<4x16x16xf32>
    %429 = arith.mulf %426, %428 : vector<4x16x16xf32>
    %430 = arith.addf %418, %429 : vector<4x16x16xf32>
    %c71 = arith.constant 71 : index
    %431 = memref.load %arg3[%c71] : memref<72xf32, #tpu.memory_space<smem>>
    %432 = vector.broadcast %431 : f32 to vector<4x16x16xf32>
    %433 = arith.mulf %426, %432 : vector<4x16x16xf32>
    %434 = arith.addf %422, %433 : vector<4x16x16xf32>
    %c0_143 = arith.constant 0 : index
    %c0_144 = arith.constant 0 : index
    %c0_145 = arith.constant 0 : index
    %c0_146 = arith.constant 0 : index
    %435 = vector.load %arg4[%c0_143, %c0_144, %c0_145, %c0_146] : memref<4x2x16x16xf32, #tpu.memory_space<vmem>>, vector<4x1x16x16xf32>
    %436 = vector.shape_cast %435 : vector<4x1x16x16xf32> to vector<4x16x16xf32>
    %437 = vector.shape_cast %430 : vector<4x16x16xf32> to vector<4x1x16x16xf32>
    tpu.vector_store %arg4[%c0_143, %c0_144, %c0_145, %c0_146], %437 {strides = array<i32>} : memref<4x2x16x16xf32, #tpu.memory_space<vmem>>, vector<4x1x16x16xf32>,
    %c0_147 = arith.constant 0 : index
    %c1_148 = arith.constant 1 : index
    %c0_149 = arith.constant 0 : index
    %c0_150 = arith.constant 0 : index
    %438 = vector.load %arg4[%c0_147, %c1_148, %c0_149, %c0_150] : memref<4x2x16x16xf32, #tpu.memory_space<vmem>>, vector<4x1x16x16xf32>
    %439 = vector.shape_cast %438 : vector<4x1x16x16xf32> to vector<4x16x16xf32>
    %440 = vector.shape_cast %434 : vector<4x16x16xf32> to vector<4x1x16x16xf32>
    tpu.vector_store %arg4[%c0_147, %c1_148, %c0_149, %c0_150], %440 {strides = array<i32>} : memref<4x2x16x16xf32, #tpu.memory_space<vmem>>, vector<4x1x16x16xf32>,
    return
  }
  func.func @transform_0(%arg0: i32, %arg1: i32) -> (i32, i32, i32, i32) {
    %c0_i32 = arith.constant 0 : i32
    %c0_i32_0 = arith.constant 0 : i32
    %c0_i32_1 = arith.constant 0 : i32
    %c0_i32_2 = arith.constant 0 : i32
    return %arg0, %c0_i32, %c0_i32_0, %c0_i32_1 : i32, i32, i32, i32
  }
  func.func @transform_1(%arg0: i32, %arg1: i32) -> i32 {
    %c0_i32 = arith.constant 0 : i32
    %c0_i32_0 = arith.constant 0 : i32
    return %c0_i32 : i32
  }
  func.func @transform_2(%arg0: i32, %arg1: i32) -> (i32, i32, i32, i32) {
    %c0_i32 = arith.constant 0 : i32
    %c0_i32_0 = arith.constant 0 : i32
    %c0_i32_1 = arith.constant 0 : i32
    return %arg0, %c0_i32, %arg1, %c0_i32_0 : i32, i32, i32, i32
  }
}

</mosaic_0001>

<bundles_post_ra>
// kernel: downsample_forward.1
= control target key start
LH: loop header
LB: loop body
LE: loop exit
PB: predicated region body
PF: predicated region fallthrough
CT: control target
= control target key end

     0   :  { %7 = vsyncpa [#allocation4], 0  ;;  %s5802_s0 = inlined_call_operand.hbm [shape: f32[4,4,16,16], index: 0, kind: input, shape index: {}]   ;;  %s5803_s1 = inlined_call_operand.vmem [shape: f32[72], index: 1, kind: input, shape index: {}]   ;;  %s5804_s2 = inlined_call_operand.vmem [shape: f32[4,2,16,16], index: 2, kind: output, shape index: {}]  }
   0x1   :  { %8 = vsyncpa [#allocation5], 0  ;;  %s3379_s9 = smov [#allocation3]   ;;  %s27_s13 = sshll.u32 %s5803_s1, 4  ;;  %s28_s13 = int_to_ptr.vmem [resolvable:$true] %s27_s13 }
   0x2   :  { %s14_s10 = sshll.u32 %s3379_s9, 4  ;;  %s15_s10 = int_to_ptr.vmem [resolvable:$true] %s14_s10 }
   0x3   :  { %s3351_s14 = scalar_lea.vmem %s15_s10, 4096  ;;  %p3356_p1 = scmp.lt.s32.totalorder %s15_s10, %s15_s10 }
   0x4   :  { %p3352_p0 = scmp.ne.s32.totalorder %s15_s10, %s3351_s14  ;;  %p3357_p2 = scmp.lt.s32.totalorder %s3351_s14, %s3351_s14 }
   0x6   :  { %p3358_p3 = por %p3357_p2, %p3356_p1 }
   0x8   :  { %p3359_p4 = pnand %p3358_p3, %p3352_p0 }
   0xa   :  { %3362 = shalt.err (!%p3359_p4)
}
   0xb   :  { %s3380_s15 = smov 128   ;;  %s3381_s16 = smov 8  }
   0xc   :  { %20 = dma.hbm_to_vmem [thread:$0]  %s5802_s0, 4096, %s15_s10, [#allocation4], %s3380_s15, %s3380_s15, %s3381_s16  }
   0xd   :  { %s3363_s19 = scalar_lea.vmem %s28_s13, 16  ;;  %p3368_p6 = scmp.lt.s32.totalorder %s28_s13, %s28_s13 }
   0xe   :  { %p3364_p5 = scmp.ne.s32.totalorder %s28_s13, %s3363_s19  ;;  %p3369_p7 = scmp.lt.s32.totalorder %s3363_s19, %s3363_s19 }
  0x10   :  { %p3370_p8 = por %p3369_p7, %p3368_p6 }
  0x12   :  { %p3371_p9 = pnand %p3370_p8, %p3364_p5 }
  0x14   :  { %3374 = shalt.err (!%p3371_p9)
}
  0x15   :  { %s3382_s1 = smov [#allocation6]  }
  0x16   :  { %30 = dma.vmem_to_smem %s28_s13, 16, %s3382_s1, [#allocation5]  }
  0x17   :  { %3375 = dma.done.wait [#allocation4], 4096  }
  0x18   :  { %3376 = vsyncadd [#allocation4], 4294963200 }
  0x19   :  { %3377 = dma.done.wait [#allocation5], 16  }
  0x1a   :  { %3378 = vsyncadd [#allocation5], 4294967280 }
  0x1b   :  { %37 = sfence }
  0x1c   :  { %v94_v0 = vld [vmem:[#allocation3 + $0x10] sm:$0xff]  ;;  %v92_v1 = vld [vmem:[#allocation3] sm:$0xff]  ;;  %vm42_vm0 = vcmask 146432   ;;  %s3383_s20 = smov 1   ;;  %vm45_vm1 = vcmask 140288   ;;  %v95_v2 = vld [vmem:[#allocation3 + $0x18] sm:$0xff] }
  0x1d   :  { %160 = vrot.lane.b32.xlu1 %v94_v0, %s3383_s20  ;;  %156 = vrot.lane.b32.xlu0 %v92_v1, %s3383_s20  ;;  %v93_v3 = vld [vmem:[#allocation3 + $0x8] sm:$0xff]  ;;  %v3384_v4 = vmov 0.0   ;;  %v96_v6 = vld [vmem:[#allocation3 + $0x20] sm:$0xff]  ;;  %v99_v7 = vld [vmem:[#allocation3 + $0x38] sm:$0xff]  ;;  %vm252_vm2 = vcmask 138248   ;;  %s3257_s0 = sld [smem:[#allocation6 + $0x1]] }
  0x1e   :  { %47 = vst.msk [vmem:[#allocation2 + $0x18] sm:$0xff] %vm42_vm0, %v3384_v4  ;;  %48 = vst.msk [vmem:[#allocation2 + $0x20] sm:$0xff] %vm42_vm0, %v3384_v4  ;;  %v97_v5 = vld [vmem:[#allocation3 + $0x28] sm:$0xff]  ;;  %v98_v8 = vld [vmem:[#allocation3 + $0x30] sm:$0xff]  ;;  %s3385_s21 = smov 127   ;;  %s3258_s22 = sld [smem:[#allocation6 + $0x25]] }
  0x1f   :  { %43 = vst.msk [vmem:[#allocation2] sm:$0xff] %vm42_vm0, %v3384_v4  ;;  %44 = vst.msk [vmem:[#allocation2 + $0x8] sm:$0xff] %vm42_vm0, %v3384_v4  ;;  %v101_v9 = vld [vmem:[#allocation3 + $0x48] sm:$0xff]  ;;  %v100_v10 = vld [vmem:[#allocation3 + $0x40] sm:$0xff]  ;;  %s3259_s23 = sld [smem:[#allocation6 + $0x2]]  ;;  %s3386_s24 = smov 126  }
  0x20   :  { %50 = vst.msk [vmem:[#allocation2 + $0x30] sm:$0xff] %vm42_vm0, %v3384_v4  ;;  %51 = vst.msk [vmem:[#allocation2 + $0x38] sm:$0xff] %vm42_vm0, %v3384_v4  ;;  %v103_v11 = vld [vmem:[#allocation3 + $0x58] sm:$0xff]  ;;  %v102_v12 = vld [vmem:[#allocation3 + $0x50] sm:$0xff]  ;;  %s3260_s25 = sld [smem:[#allocation6 + $0x26]]  ;;  %vm3221_vm3 = vcmask 130048  }
  0x21   :  { %53 = vst.msk [vmem:[#allocation2 + $0x48] sm:$0xff] %vm42_vm0, %v3384_v4  ;;  %54 = vst.msk [vmem:[#allocation2 + $0x50] sm:$0xff] %vm42_vm0, %v3384_v4  ;;  %162 = vrot.lane.b32.xlu1 %v95_v2, %s3383_s20  ;;  %158 = vrot.lane.b32.xlu0 %v93_v3, %s3383_s20  ;;  %v105_v13 = vld [vmem:[#allocation3 + $0x68] sm:$0xff]  ;;  %v104_v14 = vld [vmem:[#allocation3 + $0x60] sm:$0xff]  ;;  %s3263_s26 = sld [smem:[#allocation6 + $0x4]] }
  0x22   :  { %56 = vst.msk [vmem:[#allocation2 + $0x60] sm:$0xff] %vm42_vm0, %v3384_v4  ;;  %57 = vst.msk [vmem:[#allocation2 + $0x68] sm:$0xff] %vm42_vm0, %v3384_v4  ;;  %v107_v15 = vld [vmem:[#allocation3 + $0x78] sm:$0xff]  ;;  %v106_v16 = vld [vmem:[#allocation3 + $0x70] sm:$0xff]  ;;  %s3264_s27 = sld [smem:[#allocation6 + $0x28]] }
  0x23   :  { %59 = vst.msk [vmem:[#allocation2 + $0x78] sm:$0xff] %vm42_vm0, %v3384_v4  ;;  %60 = vst.msk [vmem:[#allocation2 + $0x80] sm:$0xff] %vm42_vm0, %v3384_v4  ;;  %v109_v17 = vld [vmem:[#allocation3 + $0x88] sm:$0xff]  ;;  %v108_v18 = vld [vmem:[#allocation3 + $0x80] sm:$0xff]  ;;  %v3492_v37 = vstv %s3257_s0  ;;  %s3265_s28 = sld [smem:[#allocation6 + $0x5]] }
  0x24   :  { %62 = vst.msk [vmem:[#allocation2 + $0x90] sm:$0xff] %vm42_vm0, %v3384_v4  ;;  %63 = vst.msk [vmem:[#allocation2 + $0x98] sm:$0xff] %vm42_vm0, %v3384_v4  ;;  %v111_v19 = vld [vmem:[#allocation3 + $0x98] sm:$0xff]  ;;  %v110_v20 = vld [vmem:[#allocation3 + $0x90] sm:$0xff]  ;;  %s3266_s29 = sld [smem:[#allocation6 + $0x29]] }
  0x25   :  { %65 = vst.msk [vmem:[#allocation2 + $0xa8] sm:$0xff] %vm42_vm0, %v3384_v4  ;;  %66 = vst.msk [vmem:[#allocation2 + $0xb0] sm:$0xff] %vm42_vm0, %v3384_v4  ;;  %166 = vrot.lane.b32.xlu1 %v97_v5, %s3383_s20  ;;  %164 = vrot.lane.b32.xlu0 %v96_v6, %s3383_s20  ;;  %v113_v21 = vld [vmem:[#allocation3 + $0xa8] sm:$0xff]  ;;  %v112_v22 = vld [vmem:[#allocation3 + $0xa0] sm:$0xff]  ;;  %s3269_s30 = sld [smem:[#allocation6 + $0x7]] }
  0x26   :  { %68 = vst.msk [vmem:[#allocation2 + $0xc0] sm:$0xff] %vm42_vm0, %v3384_v4  ;;  %69 = vst.msk [vmem:[#allocation2 + $0xc8] sm:$0xff] %vm42_vm0, %v3384_v4  ;;  %v115_v23 = vld [vmem:[#allocation3 + $0xb8] sm:$0xff]  ;;  %v114_v24 = vld [vmem:[#allocation3 + $0xb0] sm:$0xff]  ;;  %s3270_s3 = sld [smem:[#allocation6 + $0x2b]] }
  0x27   :  { %71 = vst.msk [vmem:[#allocation2 + $0xd8] sm:$0xff] %vm42_vm0, %v3384_v4  ;;  %72 = vst.msk [vmem:[#allocation2 + $0xe0] sm:$0xff] %vm42_vm0, %v3384_v4  ;;  %v117_v25 = vld [vmem:[#allocation3 + $0xc8] sm:$0xff]  ;;  %v116_v26 = vld [vmem:[#allocation3 + $0xc0] sm:$0xff]  ;;  %s295_s4 = sld [smem:[#allocation6]] }
  0x28   :  { %74 = vst.msk [vmem:[#allocation2 + $0xf0] sm:$0xff] %vm42_vm0, %v3384_v4  ;;  %75 = vst.msk [vmem:[#allocation2 + $0xf8] sm:$0xff] %vm42_vm0, %v3384_v4  ;;  %v118_v27 = vld [vmem:[#allocation3 + $0xd0] sm:$0xff]  ;;  %v119_v28 = vld [vmem:[#allocation3 + $0xd8] sm:$0xff]  ;;  %s3261_s5 = sld [smem:[#allocation6 + $0x3]] }
  0x29   :  { %77 = vst.msk [vmem:[#allocation2 + $0x108] sm:$0xff] %vm42_vm0, %v3384_v4  ;;  %78 = vst.msk [vmem:[#allocation2 + $0x110] sm:$0xff] %vm42_vm0, %v3384_v4  ;;  %170 = vrot.lane.b32.xlu1 %v99_v7, %s3383_s20  ;;  %168 = vrot.lane.b32.xlu0 %v98_v8, %s3383_s20  ;;  %v120_v29 = vld [vmem:[#allocation3 + $0xe0] sm:$0xff]  ;;  %v121_v30 = vld [vmem:[#allocation3 + $0xe8] sm:$0xff]  ;;  %s3758_s6 = sld [smem:[#allocation6 + $0x24]] }
  0x2a   :  { %80 = vst.msk [vmem:[#allocation2 + $0x120] sm:$0xff] %vm42_vm0, %v3384_v4  ;;  %81 = vst.msk [vmem:[#allocation2 + $0x128] sm:$0xff] %vm42_vm0, %v3384_v4  ;;  %v122_v31 = vld [vmem:[#allocation3 + $0xf0] sm:$0xff]  ;;  %v123_v32 = vld [vmem:[#allocation3 + $0xf8] sm:$0xff]  ;;  %s3764_s7 = sld [smem:[#allocation6 + $0x8]] }
  0x2b   :  { %83 = vst.msk [vmem:[#allocation2 + $0x138] sm:$0xff] %vm42_vm0, %v3384_v4  ;;  %84 = vst.msk [vmem:[#allocation2 + $0x140] sm:$0xff] %vm42_vm0, %v3384_v4  ;;  %s3778_s8 = sld [smem:[#allocation6 + $0x27]] }
  0x2c   :  { %86 = vst.msk [vmem:[#allocation2 + $0x150] sm:$0xff] %vm42_vm0, %v3384_v4  ;;  %87 = vst.msk [vmem:[#allocation2 + $0x158] sm:$0xff] %vm42_vm0, %v3384_v4  ;;  %s3841_s9 = sld [smem:[#allocation6 + $0x2c]] }
  0x2d   :  { %89 = vst.msk [vmem:[#allocation2 + $0x168] sm:$0xff] %vm42_vm0, %v3384_v4  ;;  %90 = vst.msk [vmem:[#allocation2 + $0x170] sm:$0xff] %vm42_vm0, %v3384_v4  ;;  %174 = vrot.lane.b32.xlu1 %v101_v9, %s3383_s20  ;;  %172 = vrot.lane.b32.xlu0 %v100_v10, %s3383_s20  ;;  %s3275_s10 = sld [smem:[#allocation6 + $0xa]] }
  0x2e   :  { %49 = vst.msk [vmem:[#allocation2 + $0x28] sm:$0x3] %vm45_vm1, %v3384_v4  ;;  %46 = vst.msk [vmem:[#allocation2 + $0x10] sm:$0x3] %vm45_vm1, %v3384_v4  ;;  %s3276_s11 = sld [smem:[#allocation6 + $0x2e]] }
  0x2f   :  { %52 = vst.msk [vmem:[#allocation2 + $0x40] sm:$0x3] %vm45_vm1, %v3384_v4  ;;  %55 = vst.msk [vmem:[#allocation2 + $0x58] sm:$0x3] %vm45_vm1, %v3384_v4  ;;  %s3267_s12 = sld [smem:[#allocation6 + $0x6]] }
  0x30   :  { %58 = vst.msk [vmem:[#allocation2 + $0x70] sm:$0x3] %vm45_vm1, %v3384_v4  ;;  %61 = vst.msk [vmem:[#allocation2 + $0x88] sm:$0x3] %vm45_vm1, %v3384_v4  ;;  %s3277_s13 = sld [smem:[#allocation6 + $0xb]] }
  0x31   :  { %64 = vst.msk [vmem:[#allocation2 + $0xa0] sm:$0x3] %vm45_vm1, %v3384_v4  ;;  %67 = vst.msk [vmem:[#allocation2 + $0xb8] sm:$0x3] %vm45_vm1, %v3384_v4  ;;  %178 = vrot.lane.b32.xlu1 %v103_v11, %s3383_s20  ;;  %176 = vrot.lane.b32.xlu0 %v102_v12, %s3383_s20  ;;  %s4020_s14 = sld [smem:[#allocation6 + $0x2a]] }
  0x32   :  { %70 = vst.msk [vmem:[#allocation2 + $0xd0] sm:$0x3] %vm45_vm1, %v3384_v4  ;;  %73 = vst.msk [vmem:[#allocation2 + $0xe8] sm:$0x3] %vm45_vm1, %v3384_v4  ;;  %s3278_s15 = sld [smem:[#allocation6 + $0x2f]] }
  0x33   :  { %76 = vst.msk [vmem:[#allocation2 + $0x100] sm:$0x3] %vm45_vm1, %v3384_v4  ;;  %79 = vst.msk [vmem:[#allocation2 + $0x118] sm:$0x3] %vm45_vm1, %v3384_v4  ;;  %s3281_s16 = sld [smem:[#allocation6 + $0xd]] }
  0x34   :  { %82 = vst.msk [vmem:[#allocation2 + $0x130] sm:$0x3] %vm45_vm1, %v3384_v4  ;;  %85 = vst.msk [vmem:[#allocation2 + $0x148] sm:$0x3] %vm45_vm1, %v3384_v4  ;;  %s3282_s17 = sld [smem:[#allocation6 + $0x31]] }
  0x35   :  { %88 = vst.msk [vmem:[#allocation2 + $0x160] sm:$0x3] %vm45_vm1, %v3384_v4  ;;  %91 = vst.msk [vmem:[#allocation2 + $0x178] sm:$0x3] %vm45_vm1, %v3384_v4  ;;  %182 = vrot.lane.b32.xlu1 %v105_v13, %s3383_s20  ;;  %180 = vrot.lane.b32.xlu0 %v104_v14, %s3383_s20  ;;  %s3273_s18 = sld [smem:[#allocation6 + $0x9]] }
  0x36   :  { %s3283_s19 = sld [smem:[#allocation6 + $0xe]] }
  0x37   :  { %s4209_s1 = sld [smem:[#allocation6 + $0x2d]] }
  0x38   :  { %s3287_s0 = sld [smem:[#allocation6 + $0x10]] }
  0x39   :  { %186 = vrot.lane.b32.xlu1 %v107_v15, %s3383_s20  ;;  %184 = vrot.lane.b32.xlu0 %v106_v16, %s3383_s20  ;;  %v366_v16 = vstv %s3258_s22  ;;  %s3288_s22 = sld [smem:[#allocation6 + $0x34]] }
  0x3d   :  { %190 = vrot.lane.b32.xlu1 %v109_v17, %s3383_s20  ;;  %188 = vrot.lane.b32.xlu0 %v108_v18, %s3383_s20 }
  0x41   :  { %194 = vrot.lane.b32.xlu1 %v111_v19, %s3383_s20  ;;  %192 = vrot.lane.b32.xlu0 %v110_v20, %s3383_s20 }
  0x45   :  { %198 = vrot.lane.b32.xlu1 %v113_v21, %s3383_s20  ;;  %196 = vrot.lane.b32.xlu0 %v112_v22, %s3383_s20 }
  0x49   :  { %202 = vrot.lane.b32.xlu1 %v115_v23, %s3383_s20  ;;  %200 = vrot.lane.b32.xlu0 %v114_v24, %s3383_s20 }
  0x4d   :  { %206 = vrot.lane.b32.xlu1 %v117_v25, %s3383_s20  ;;  %204 = vrot.lane.b32.xlu0 %v116_v26, %s3383_s20 }
  0x51   :  { %208 = vrot.lane.b32.xlu0 %v118_v27, %s3383_s20  ;;  %210 = vrot.lane.b32.xlu1 %v119_v28, %s3383_s20  ;;  %v416_v27 = vstv %s3259_s23  ;;  %s3279_s23 = sld [smem:[#allocation6 + $0xc]] }
  0x55   :  { %212 = vrot.lane.b32.xlu0 %v120_v29, %s3383_s20  ;;  %214 = vrot.lane.b32.xlu1 %v121_v30, %s3383_s20 }
  0x59   :  { %216 = vrot.lane.b32.xlu0 %v122_v31, %s3383_s20  ;;  %218 = vrot.lane.b32.xlu1 %v123_v32, %s3383_s20  ;;  %s3284_s20 = sld [smem:[#allocation6 + $0x32]] }
  0x8f   :  { %v161_v33 = vpop.permute.xlu1 %160  ;;  %v157_v34 = vpop.permute.xlu0 %156 }
  0x90   :  { %255 = vst.msk [vmem:[#allocation2 + $0x19] sm:$0xff] %vm252_vm2, %v161_v33  ;;  %253 = vst.msk [vmem:[#allocation2 + $0x1] sm:$0xff] %vm252_vm2, %v157_v34 }
  0x93   :  { %v163_v35 = vpop.permute.xlu1 %162  ;;  %v159_v36 = vpop.permute.xlu0 %158 }
  0x94   :  { %256 = vst.msk [vmem:[#allocation2 + $0x21] sm:$0xff] %vm252_vm2, %v163_v35  ;;  %254 = vst.msk [vmem:[#allocation2 + $0x9] sm:$0xff] %vm252_vm2, %v159_v36  ;;  %v466_v36 = vstv %s3260_s25  ;;  %s3289_s25 = sld [smem:[#allocation6 + $0x11]] }
  0x97   :  { %v167_v38 = vpop.permute.xlu1 %166  ;;  %v165_v39 = vpop.permute.xlu0 %164  ;;  %v3494_v40 = vld [vmem:[#allocation2] sm:$0xff] }
  0x98   :  { %258 = vst.msk [vmem:[#allocation2 + $0x39] sm:$0xff] %vm252_vm2, %v167_v38  ;;  %257 = vst.msk [vmem:[#allocation2 + $0x31] sm:$0xff] %vm252_vm2, %v165_v39  ;;  %v317_v41 = vmul.f32 %v3492_v37, %v3494_v40  ;;  %v367_v20 = vmul.f32 %v366_v16, %v3494_v40  ;;  %v417_v29 = vmul.f32 %v416_v27, %v3494_v40 }
  0x99   :  { %v467_v38 = vmul.f32 %v466_v36, %v3494_v40 }
  0x9a   :  { %333 = vrot.lane.b32.xlu0 %v317_v41, %s3385_s21 }
  0x9b   :  { %v171_v42 = vpop.permute.xlu1 %170  ;;  %v169_v43 = vpop.permute.xlu0 %168  ;;  %v3501_v44 = vld [vmem:[#allocation2 + $0x8] sm:$0xff] }
  0x9c   :  { %260 = vst.msk [vmem:[#allocation2 + $0x51] sm:$0xff] %vm252_vm2, %v171_v42  ;;  %259 = vst.msk [vmem:[#allocation2 + $0x49] sm:$0xff] %vm252_vm2, %v169_v43  ;;  %v318_v45 = vmul.f32 %v3492_v37, %v3501_v44  ;;  %v368_v19 = vmul.f32 %v366_v16, %v3501_v44  ;;  %v418_v28 = vmul.f32 %v416_v27, %v3501_v44 }
  0x9e   :  { %335 = vrot.lane.b32.xlu1 %v318_v45, %s3385_s21 }
  0x9f   :  { %v175_v46 = vpop.permute.xlu1 %174  ;;  %v173_v47 = vpop.permute.xlu0 %172 }
  0xa0   :  { %262 = vst.msk [vmem:[#allocation2 + $0x69] sm:$0xff] %vm252_vm2, %v175_v46  ;;  %261 = vst.msk [vmem:[#allocation2 + $0x61] sm:$0xff] %vm252_vm2, %v173_v47  ;;  %v3608_v47 = vld [vmem:[#allocation2 + $0x9] sm:$0xff] }
  0xa3   :  { %v179_v48 = vpop.permute.xlu1 %178  ;;  %v177_v49 = vpop.permute.xlu0 %176 }
  0xa4   :  { %264 = vst.msk [vmem:[#allocation2 + $0x81] sm:$0xff] %vm252_vm2, %v179_v48  ;;  %263 = vst.msk [vmem:[#allocation2 + $0x79] sm:$0xff] %vm252_vm2, %v177_v49  ;;  %v562_v48 = vstv %s3263_s26  ;;  %v3610_v49 = vld [vmem:[#allocation2 + $0x1] sm:$0xff]  ;;  %s4398_s26 = sld [smem:[#allocation6 + $0x30]] }
  0xa7   :  { %v183_v50 = vpop.permute.xlu1 %182  ;;  %v181_v51 = vpop.permute.xlu0 %180  ;;  %v3512_v52 = vld [vmem:[#allocation2 + $0x68] sm:$0xff]  ;;  %v3514_v53 = vld [vmem:[#allocation2 + $0x60] sm:$0xff] }
  0xa8   :  { %266 = vst.msk [vmem:[#allocation2 + $0x99] sm:$0xff] %vm252_vm2, %v183_v50  ;;  %265 = vst.msk [vmem:[#allocation2 + $0x91] sm:$0xff] %vm252_vm2, %v181_v51  ;;  %v320_v54 = vmul.f32 %v3492_v37, %v3512_v52  ;;  %v319_v55 = vmul.f32 %v3492_v37, %v3514_v53  ;;  %v370_v21 = vmul.f32 %v366_v16, %v3512_v52 }
  0xa9   :  { %v369_v22 = vmul.f32 %v366_v16, %v3514_v53  ;;  %v420_v30 = vmul.f32 %v416_v27, %v3512_v52  ;;  %v419_v31 = vmul.f32 %v416_v27, %v3514_v53  ;;  %v470_v39 = vmul.f32 %v466_v36, %v3512_v52 }
  0xaa   :  { %339 = vrot.lane.b32.xlu1 %v320_v54, %s3385_s21  ;;  %337 = vrot.lane.b32.xlu0 %v319_v55, %s3385_s21  ;;  %v469_v41 = vmul.f32 %v466_v36, %v3514_v53  ;;  %v564_v50 = vmul.f32 %v562_v48, %v3608_v47  ;;  %v563_v51 = vmul.f32 %v562_v48, %v3610_v49  ;;  %v3616_v54 = vld [vmem:[#allocation2 + $0x69] sm:$0xff]  ;;  %v3618_v55 = vld [vmem:[#allocation2 + $0x61] sm:$0xff] }
  0xab   :  { %v187_v56 = vpop.permute.xlu1 %186  ;;  %v185_v57 = vpop.permute.xlu0 %184 }
  0xac   :  { %268 = vst.msk [vmem:[#allocation2 + $0xb1] sm:$0xff] %vm252_vm2, %v187_v56  ;;  %267 = vst.msk [vmem:[#allocation2 + $0xa9] sm:$0xff] %vm252_vm2, %v185_v57  ;;  %v566_v56 = vmul.f32 %v562_v48, %v3616_v54  ;;  %v565_v57 = vmul.f32 %v562_v48, %v3618_v55 }
  0xaf   :  { %v191_v58 = vpop.permute.xlu1 %190  ;;  %v189_v59 = vpop.permute.xlu0 %188 }
  0xb0   :  { %270 = vst.msk [vmem:[#allocation2 + $0xc9] sm:$0xff] %vm252_vm2, %v191_v58  ;;  %269 = vst.msk [vmem:[#allocation2 + $0xc1] sm:$0xff] %vm252_vm2, %v189_v59 }
  0xb3   :  { %v195_v60 = vpop.permute.xlu1 %194  ;;  %v193_v61 = vpop.permute.xlu0 %192 }
  0xb4   :  { %272 = vst.msk [vmem:[#allocation2 + $0xe1] sm:$0xff] %vm252_vm2, %v195_v60  ;;  %271 = vst.msk [vmem:[#allocation2 + $0xd9] sm:$0xff] %vm252_vm2, %v193_v61 }
  0xb7   :  { %v199_v62 = vpop.permute.xlu1 %198  ;;  %v197_v63 = vpop.permute.xlu0 %196  ;;  %v3530_v0 = vld [vmem:[#allocation2 + $0xc8] sm:$0xff]  ;;  %v3532_v1 = vld [vmem:[#allocation2 + $0xc0] sm:$0xff] }
  0xb8   :  { %274 = vst.msk [vmem:[#allocation2 + $0xf9] sm:$0xff] %vm252_vm2, %v199_v62  ;;  %273 = vst.msk [vmem:[#allocation2 + $0xf1] sm:$0xff] %vm252_vm2, %v197_v63  ;;  %v322_v2 = vmul.f32 %v3492_v37, %v3530_v0  ;;  %v321_v3 = vmul.f32 %v3492_v37, %v3532_v1  ;;  %v372_v23 = vmul.f32 %v366_v16, %v3530_v0  ;;  %v3624_v58 = vld [vmem:[#allocation2 + $0xc9] sm:$0xff]  ;;  %v3626_v59 = vld [vmem:[#allocation2 + $0xc1] sm:$0xff] }
  0xb9   :  { %v371_v24 = vmul.f32 %v366_v16, %v3532_v1  ;;  %v422_v32 = vmul.f32 %v416_v27, %v3530_v0  ;;  %v421_v33 = vmul.f32 %v416_v27, %v3532_v1  ;;  %v472_v42 = vmul.f32 %v466_v36, %v3530_v0 }
  0xba   :  { %343 = vrot.lane.b32.xlu1 %v322_v2, %s3385_s21  ;;  %341 = vrot.lane.b32.xlu0 %v321_v3, %s3385_s21  ;;  %v471_v43 = vmul.f32 %v466_v36, %v3532_v1  ;;  %v568_v60 = vmul.f32 %v562_v48, %v3624_v58  ;;  %v567_v61 = vmul.f32 %v562_v48, %v3626_v59 }
  0xbb   :  { %v203_v4 = vpop.permute.xlu1 %202  ;;  %v201_v5 = vpop.permute.xlu0 %200 }
  0xbc   :  { %276 = vst.msk [vmem:[#allocation2 + $0x111] sm:$0xff] %vm252_vm2, %v203_v4  ;;  %275 = vst.msk [vmem:[#allocation2 + $0x109] sm:$0xff] %vm252_vm2, %v201_v5  ;;  %v612_v4 = vstv %s3264_s27  ;;  %s3290_s27 = sld [smem:[#allocation6 + $0x35]] }
  0xbd   :  { %v614_v5 = vmul.f32 %v612_v4, %v3608_v47 }
  0xbf   :  { %v207_v6 = vpop.permute.xlu1 %206  ;;  %v205_v7 = vpop.permute.xlu0 %204 }
  0xc0   :  { %278 = vst.msk [vmem:[#allocation2 + $0x129] sm:$0xff] %vm252_vm2, %v207_v6  ;;  %277 = vst.msk [vmem:[#allocation2 + $0x121] sm:$0xff] %vm252_vm2, %v205_v7  ;;  %v613_v6 = vmul.f32 %v612_v4, %v3610_v49  ;;  %v616_v7 = vmul.f32 %v612_v4, %v3616_v54 }
  0xc3   :  { %v209_v8 = vpop.permute.xlu0 %208  ;;  %v211_v9 = vpop.permute.xlu1 %210 }
  0xc4   :  { %279 = vst.msk [vmem:[#allocation2 + $0x139] sm:$0xff] %vm252_vm2, %v209_v8  ;;  %280 = vst.msk [vmem:[#allocation2 + $0x141] sm:$0xff] %vm252_vm2, %v211_v9  ;;  %v615_v8 = vmul.f32 %v612_v4, %v3618_v55  ;;  %v618_v9 = vmul.f32 %v612_v4, %v3624_v58 }
  0xc7   :  { %v3548_v10 = vld [vmem:[#allocation2 + $0x128] sm:$0xff]  ;;  %v3550_v11 = vld [vmem:[#allocation2 + $0x120] sm:$0xff]  ;;  %v213_v12 = vpop.permute.xlu0 %212  ;;  %v215_v13 = vpop.permute.xlu1 %214 }
  0xc8   :  { %v324_v14 = vmul.f32 %v3492_v37, %v3548_v10  ;;  %v323_v15 = vmul.f32 %v3492_v37, %v3550_v11  ;;  %281 = vst.msk [vmem:[#allocation2 + $0x151] sm:$0xff] %vm252_vm2, %v213_v12  ;;  %282 = vst.msk [vmem:[#allocation2 + $0x159] sm:$0xff] %vm252_vm2, %v215_v13  ;;  %v374_v25 = vmul.f32 %v366_v16, %v3548_v10  ;;  %v3632_v62 = vld [vmem:[#allocation2 + $0x129] sm:$0xff]  ;;  %v3634_v63 = vld [vmem:[#allocation2 + $0x121] sm:$0xff] }
  0xc9   :  { %v373_v26 = vmul.f32 %v366_v16, %v3550_v11  ;;  %v424_v34 = vmul.f32 %v416_v27, %v3548_v10  ;;  %v423_v35 = vmul.f32 %v416_v27, %v3550_v11  ;;  %v468_v37 = vmul.f32 %v466_v36, %v3501_v44 }
  0xca   :  { %347 = vrot.lane.b32.xlu1 %v324_v14, %s3385_s21  ;;  %345 = vrot.lane.b32.xlu0 %v323_v15, %s3385_s21  ;;  %v474_v45 = vmul.f32 %v466_v36, %v3548_v10  ;;  %v473_v46 = vmul.f32 %v466_v36, %v3550_v11  ;;  %v570_v2 = vmul.f32 %v562_v48, %v3632_v62  ;;  %v662_v15 = vstv %s3265_s28  ;;  %s3293_s28 = sld [smem:[#allocation6 + $0x13]] }
  0xcb   :  { %v217_v17 = vpop.permute.xlu0 %216  ;;  %v219_v18 = vpop.permute.xlu1 %218  ;;  %v569_v3 = vmul.f32 %v562_v48, %v3634_v63  ;;  %v617_v12 = vmul.f32 %v612_v4, %v3626_v59  ;;  %v620_v13 = vmul.f32 %v612_v4, %v3632_v62  ;;  %v619_v14 = vmul.f32 %v612_v4, %v3634_v63 }
  0xcc   :  { %283 = vst.msk [vmem:[#allocation2 + $0x169] sm:$0xff] %vm252_vm2, %v217_v17  ;;  %284 = vst.msk [vmem:[#allocation2 + $0x171] sm:$0xff] %vm252_vm2, %v219_v18  ;;  %v664_v16 = vmul.f32 %v662_v15, %v3608_v47  ;;  %v663_v17 = vmul.f32 %v662_v15, %v3610_v49  ;;  %v666_v18 = vmul.f32 %v662_v15, %v3616_v54 }
  0xce   :  { %385 = vrot.lane.b32.xlu1 %v368_v19, %s3385_s21  ;;  %383 = vrot.lane.b32.xlu0 %v367_v20, %s3385_s21  ;;  %v665_v19 = vmul.f32 %v662_v15, %v3618_v55  ;;  %v668_v20 = vmul.f32 %v662_v15, %v3624_v58 }
  0xd2   :  { %389 = vrot.lane.b32.xlu1 %v370_v21, %s3385_s21  ;;  %387 = vrot.lane.b32.xlu0 %v369_v22, %s3385_s21  ;;  %v667_v21 = vmul.f32 %v662_v15, %v3626_v59  ;;  %v670_v22 = vmul.f32 %v662_v15, %v3632_v62 }
  0xd6   :  { %393 = vrot.lane.b32.xlu1 %v372_v23, %s3385_s21  ;;  %391 = vrot.lane.b32.xlu0 %v371_v24, %s3385_s21  ;;  %v669_v23 = vmul.f32 %v662_v15, %v3634_v63  ;;  %v712_v24 = vstv %s3266_s29  ;;  %s3294_s29 = sld [smem:[#allocation6 + $0x37]] }
  0xda   :  { %397 = vrot.lane.b32.xlu1 %v374_v25, %s3385_s21  ;;  %395 = vrot.lane.b32.xlu0 %v373_v26, %s3385_s21  ;;  %v714_v25 = vmul.f32 %v712_v24, %v3608_v47  ;;  %v713_v26 = vmul.f32 %v712_v24, %v3610_v49 }
  0xde   :  { %435 = vrot.lane.b32.xlu1 %v418_v28, %s3386_s24  ;;  %433 = vrot.lane.b32.xlu0 %v417_v29, %s3386_s24  ;;  %v716_v29 = vmul.f32 %v712_v24, %v3616_v54 }
  0xe2   :  { %439 = vrot.lane.b32.xlu1 %v420_v30, %s3386_s24  ;;  %437 = vrot.lane.b32.xlu0 %v419_v31, %s3386_s24  ;;  %v715_v30 = vmul.f32 %v712_v24, %v3618_v55 }
  0xe6   :  { %443 = vrot.lane.b32.xlu1 %v422_v32, %s3386_s24  ;;  %441 = vrot.lane.b32.xlu0 %v421_v33, %s3386_s24  ;;  %v718_v33 = vmul.f32 %v712_v24, %v3624_v58 }
  0xea   :  { %447 = vrot.lane.b32.xlu1 %v424_v34, %s3386_s24  ;;  %445 = vrot.lane.b32.xlu0 %v423_v35, %s3386_s24  ;;  %v717_v34 = vmul.f32 %v712_v24, %v3626_v59 }
  0xee   :  { %485 = vrot.lane.b32.xlu1 %v468_v37, %s3386_s24  ;;  %483 = vrot.lane.b32.xlu0 %v467_v38, %s3386_s24  ;;  %v720_v37 = vmul.f32 %v712_v24, %v3632_v62  ;;  %v719_v38 = vmul.f32 %v712_v24, %v3634_v63  ;;  %v3760_v24 = vstv %s3261_s5  ;;  %s3296_s5 = sld [smem:[#allocation6 + $0x38]] }
  0xf2   :  { %489 = vrot.lane.b32.xlu1 %v470_v39, %s3386_s24  ;;  %487 = vrot.lane.b32.xlu0 %v469_v41, %s3386_s24  ;;  %v3700_v39 = vld [vmem:[#allocation2 + $0xa] sm:$0xff]  ;;  %v808_v41 = vstv %s3269_s30  ;;  %s3285_s30 = sld [smem:[#allocation6 + $0xf]] }
  0xf6   :  { %493 = vrot.lane.b32.xlu1 %v472_v42, %s3386_s24  ;;  %491 = vrot.lane.b32.xlu0 %v471_v43, %s3386_s24  ;;  %v3702_v42 = vld [vmem:[#allocation2 + $0x2] sm:$0xff] }
  0xf7   :  { %v809_v48 = vmul.f32 %v808_v41, %v3702_v42 }
  0xfa   :  { %497 = vrot.lane.b32.xlu1 %v474_v45, %s3386_s24  ;;  %495 = vrot.lane.b32.xlu0 %v473_v46, %s3386_s24  ;;  %v810_v46 = vmul.f32 %v808_v41, %v3700_v39 }
  0xfe   :  { %581 = vrot.lane.b32.xlu1 %v564_v50, %s3385_s21  ;;  %579 = vrot.lane.b32.xlu0 %v563_v51, %s3385_s21  ;;  %v3712_v50 = vld [vmem:[#allocation2 + $0x6a] sm:$0xff]  ;;  %v3714_v51 = vld [vmem:[#allocation2 + $0x62] sm:$0xff] }
 0x102   :  { %585 = vrot.lane.b32.xlu1 %v566_v56, %s3385_s21  ;;  %583 = vrot.lane.b32.xlu0 %v565_v57, %s3385_s21 }
 0x106   :  { %589 = vrot.lane.b32.xlu1 %v568_v60, %s3385_s21  ;;  %587 = vrot.lane.b32.xlu0 %v567_v61, %s3385_s21  ;;  %v812_v60 = vmul.f32 %v808_v41, %v3712_v50  ;;  %v811_v61 = vmul.f32 %v808_v41, %v3714_v51 }
 0x10a   :  { %593 = vrot.lane.b32.xlu1 %v570_v2, %s3385_s21  ;;  %591 = vrot.lane.b32.xlu0 %v569_v3, %s3385_s21  ;;  %v3724_v2 = vld [vmem:[#allocation2 + $0xca] sm:$0xff]  ;;  %v3726_v3 = vld [vmem:[#allocation2 + $0xc2] sm:$0xff] }
 0x10c   :  { %v3678_v27 = vpop.permute.xlu0 %333 }
 0x10e   :  { %631 = vrot.lane.b32.xlu1 %v614_v5, %s3385_s21  ;;  %629 = vrot.lane.b32.xlu0 %v613_v6, %s3385_s21  ;;  %v814_v6 = vmul.f32 %v808_v41, %v3724_v2 }
 0x110   :  { %v3680_v28 = vpop.permute.xlu1 %335 }
 0x112   :  { %635 = vrot.lane.b32.xlu1 %v616_v7, %s3385_s21  ;;  %633 = vrot.lane.b32.xlu0 %v615_v8, %s3385_s21  ;;  %v813_v7 = vmul.f32 %v808_v41, %v3726_v3  ;;  %v3736_v8 = vld [vmem:[#allocation2 + $0x12a] sm:$0xff] }
 0x116   :  { %639 = vrot.lane.b32.xlu1 %v618_v9, %s3385_s21  ;;  %637 = vrot.lane.b32.xlu0 %v617_v12, %s3385_s21  ;;  %v3738_v9 = vld [vmem:[#allocation2 + $0x122] sm:$0xff] }
 0x117   :  { %v815_v15 = vmul.f32 %v808_v41, %v3738_v9 }
 0x11a   :  { %643 = vrot.lane.b32.xlu1 %v620_v13, %s3385_s21  ;;  %641 = vrot.lane.b32.xlu0 %v619_v14, %s3385_s21  ;;  %v816_v14 = vmul.f32 %v808_v41, %v3736_v8 }
 0x11c   :  { %v3686_v31 = vpop.permute.xlu1 %339  ;;  %v3688_v32 = vpop.permute.xlu0 %337 }
 0x11e   :  { %681 = vrot.lane.b32.xlu1 %v664_v16, %s3386_s24  ;;  %679 = vrot.lane.b32.xlu0 %v663_v17, %s3386_s24  ;;  %v858_v16 = vstv %s3270_s3  ;;  %v296_v17 = vstv %s295_s4  ;;  %s3295_s3 = sld [smem:[#allocation6 + $0x14]] }
 0x11f   :  { %v300_v41 = vmul.f32 %v296_v17, %v3512_v52  ;;  %s4592_s4 = sld [smem:[#allocation6 + $0x33]] }
 0x122   :  { %685 = vrot.lane.b32.xlu1 %v666_v18, %s3386_s24  ;;  %683 = vrot.lane.b32.xlu0 %v665_v19, %s3386_s24 }
 0x126   :  { %689 = vrot.lane.b32.xlu1 %v668_v20, %s3386_s24  ;;  %687 = vrot.lane.b32.xlu0 %v667_v21, %s3386_s24  ;;  %v860_v20 = vmul.f32 %v858_v16, %v3700_v39  ;;  %v859_v21 = vmul.f32 %v858_v16, %v3702_v42 }
 0x12a   :  { %693 = vrot.lane.b32.xlu1 %v670_v22, %s3386_s24  ;;  %691 = vrot.lane.b32.xlu0 %v669_v23, %s3386_s24  ;;  %v297_v22 = vmul.f32 %v296_v17, %v3494_v40  ;;  %v298_v23 = vmul.f32 %v296_v17, %v3501_v44 }
 0x12c   :  { %v3694_v35 = vpop.permute.xlu1 %343  ;;  %v3696_v36 = vpop.permute.xlu0 %341 }
 0x12e   :  { %731 = vrot.lane.b32.xlu1 %v714_v25, %s3386_s24  ;;  %729 = vrot.lane.b32.xlu0 %v713_v26, %s3386_s24  ;;  %v357_v25 = vadd.f32 %v3678_v27, %v297_v22  ;;  %v358_v26 = vadd.f32 %v3680_v28, %v298_v23  ;;  %v360_v28 = vadd.f32 %v3686_v31, %v300_v41 }
 0x12f   :  { %v529_v22 = vmul.f32 %v3760_v24, %v3618_v55  ;;  %v302_v31 = vmul.f32 %v296_v17, %v3530_v0 }
 0x132   :  { %735 = vrot.lane.b32.xlu1 %v716_v29, %s3386_s24  ;;  %733 = vrot.lane.b32.xlu0 %v715_v30, %s3386_s24 }
 0x136   :  { %739 = vrot.lane.b32.xlu1 %v718_v33, %s3386_s24  ;;  %737 = vrot.lane.b32.xlu0 %v717_v34, %s3386_s24  ;;  %v862_v33 = vmul.f32 %v858_v16, %v3712_v50  ;;  %v861_v34 = vmul.f32 %v858_v16, %v3714_v51 }
 0x13a   :  { %743 = vrot.lane.b32.xlu1 %v720_v37, %s3386_s24  ;;  %741 = vrot.lane.b32.xlu0 %v719_v38, %s3386_s24  ;;  %v528_v37 = vmul.f32 %v3760_v24, %v3608_v47  ;;  %v527_v38 = vmul.f32 %v3760_v24, %v3610_v49 }
 0x13c   :  { %v3706_v43 = vpop.permute.xlu1 %347  ;;  %v3708_v45 = vpop.permute.xlu0 %345 }
 0x13e   :  { %827 = vrot.lane.b32.xlu1 %v810_v46, %s3385_s21  ;;  %825 = vrot.lane.b32.xlu0 %v809_v48, %s3385_s21  ;;  %v299_v46 = vmul.f32 %v296_v17, %v3514_v53 }
 0x140   :  { %v3718_v56 = vpop.permute.xlu1 %385  ;;  %v3720_v57 = vpop.permute.xlu0 %383 }
 0x142   :  { %831 = vrot.lane.b32.xlu1 %v812_v60, %s3385_s21  ;;  %829 = vrot.lane.b32.xlu0 %v811_v61, %s3385_s21  ;;  %v359_v60 = vadd.f32 %v3688_v32, %v299_v46  ;;  %v301_v32 = vmul.f32 %v296_v17, %v3532_v1  ;;  %v866_v46 = vmul.f32 %v858_v16, %v3736_v8 }
 0x144   :  { %v3730_v4 = vpop.permute.xlu1 %389  ;;  %v3732_v5 = vpop.permute.xlu0 %387 }
 0x146   :  { %835 = vrot.lane.b32.xlu1 %v814_v6, %s3385_s21  ;;  %833 = vrot.lane.b32.xlu0 %v813_v7, %s3385_s21 }
 0x148   :  { %v3742_v12 = vpop.permute.xlu1 %393  ;;  %v3744_v13 = vpop.permute.xlu0 %391 }
 0x14a   :  { %839 = vrot.lane.b32.xlu1 %v816_v14, %s3385_s21  ;;  %837 = vrot.lane.b32.xlu0 %v815_v15, %s3385_s21  ;;  %v864_v15 = vmul.f32 %v858_v16, %v3724_v2 }
 0x14c   :  { %v3750_v18 = vpop.permute.xlu1 %397  ;;  %v3752_v19 = vpop.permute.xlu0 %395 }
 0x14e   :  { %877 = vrot.lane.b32.xlu1 %v860_v20, %s3385_s21  ;;  %875 = vrot.lane.b32.xlu0 %v859_v21, %s3385_s21  ;;  %v863_v20 = vmul.f32 %v858_v16, %v3726_v3  ;;  %v530_v21 = vmul.f32 %v3760_v24, %v3616_v54 }
 0x150   :  { %v436_v29 = vpop.permute.xlu1 %435  ;;  %v434_v30 = vpop.permute.xlu0 %433 }
 0x151   :  { %v458_v48 = vadd.f32 %v436_v29, %v358_v26  ;;  %v457_v27 = vadd.f32 %v434_v30, %v357_v25  ;;  %v3795_v26 = vstv %s3758_s6  ;;  %v3800_v29 = vstv %s3764_s7  ;;  %s3299_s6 = sld [smem:[#allocation6 + $0x16]] }
 0x152   :  { %881 = vrot.lane.b32.xlu1 %v862_v33, %s3385_s21  ;;  %879 = vrot.lane.b32.xlu0 %v861_v34, %s3385_s21  ;;  %v362_v30 = vadd.f32 %v3694_v35, %v302_v31  ;;  %v361_v33 = vadd.f32 %v3696_v36, %v301_v32  ;;  %v304_v35 = vmul.f32 %v296_v17, %v3548_v10  ;;  %s3300_s7 = sld [smem:[#allocation6 + $0x3a]] }
 0x153   :  { %v3782_v61 = vadd.f32 %v528_v37, %v458_v48  ;;  %v3784_v6 = vadd.f32 %v527_v38, %v457_v27  ;;  %v865_v48 = vmul.f32 %v858_v16, %v3738_v9  ;;  %v532_v27 = vmul.f32 %v3760_v24, %v3624_v58 }
 0x154   :  { %v440_v7 = vpop.permute.xlu1 %439  ;;  %v438_v14 = vpop.permute.xlu0 %437  ;;  %v303_v36 = vmul.f32 %v296_v17, %v3550_v11  ;;  %v364_v16 = vadd.f32 %v3706_v43, %v304_v35  ;;  %v307_v17 = vmul.f32 %v3795_v26, %v3494_v40  ;;  %v909_v43 = vmul.f32 %v3800_v29, %v3702_v42 }
 0x155   :  { %v460_v23 = vadd.f32 %v440_v7, %v360_v28  ;;  %v459_v25 = vadd.f32 %v438_v14, %v359_v60  ;;  %v531_v28 = vmul.f32 %v3760_v24, %v3626_v59  ;;  %v3819_v14 = vstv %s3778_s8  ;;  %s3291_s8 = sld [smem:[#allocation6 + $0x12]] }
 0x156   :  { %885 = vrot.lane.b32.xlu1 %v864_v15, %s3385_s21  ;;  %883 = vrot.lane.b32.xlu0 %v863_v20, %s3385_s21  ;;  %v363_v15 = vadd.f32 %v3708_v45, %v303_v36  ;;  %v309_v35 = vmul.f32 %v3795_v26, %v3514_v53  ;;  %v914_v53 = vmul.f32 %v3800_v29, %v3724_v2 }
 0x157   :  { %v3804_v34 = vadd.f32 %v530_v21, %v460_v23  ;;  %v3806_v37 = vadd.f32 %v529_v22, %v459_v25  ;;  %v308_v22 = vmul.f32 %v3795_v26, %v3501_v44  ;;  %v910_v23 = vmul.f32 %v3800_v29, %v3700_v39 }
 0x158   :  { %v444_v38 = vpop.permute.xlu1 %443  ;;  %v442_v41 = vpop.permute.xlu0 %441  ;;  %v407_v44 = vadd.f32 %v3720_v57, %v307_v17  ;;  %v310_v57 = vmul.f32 %v3795_v26, %v3512_v52  ;;  %v548_v17 = vmul.f32 %v3819_v14, %v3616_v54 }
 0x159   :  { %v462_v60 = vadd.f32 %v444_v38, %v362_v30  ;;  %v461_v7 = vadd.f32 %v442_v41, %v361_v33  ;;  %v534_v30 = vmul.f32 %v3760_v24, %v3632_v62  ;;  %v533_v33 = vmul.f32 %v3760_v24, %v3634_v63 }
 0x15a   :  { %889 = vrot.lane.b32.xlu1 %v866_v46, %s3385_s21  ;;  %887 = vrot.lane.b32.xlu0 %v865_v48, %s3385_s21  ;;  %v408_v40 = vadd.f32 %v3718_v56, %v308_v22  ;;  %v911_v24 = vmul.f32 %v3800_v29, %v3714_v51  ;;  %v545_v56 = vmul.f32 %v3819_v14, %v3610_v49 }
 0x15b   :  { %v3823_v20 = vadd.f32 %v532_v27, %v462_v60  ;;  %v3825_v21 = vadd.f32 %v531_v28, %v461_v7  ;;  %v912_v27 = vmul.f32 %v3800_v29, %v3712_v50  ;;  %v546_v28 = vmul.f32 %v3819_v14, %v3608_v47 }
 0x15c   :  { %v448_v31 = vpop.permute.xlu1 %447  ;;  %v446_v32 = vpop.permute.xlu0 %445  ;;  %v410_v7 = vadd.f32 %v3730_v4, %v310_v57  ;;  %v409_v47 = vadd.f32 %v3732_v5, %v309_v35  ;;  %v913_v22 = vmul.f32 %v3800_v29, %v3726_v3  ;;  %v547_v4 = vmul.f32 %v3819_v14, %v3618_v55 }
 0x15d   :  { %v464_v25 = vadd.f32 %v448_v31, %v364_v16  ;;  %v463_v45 = vadd.f32 %v446_v32, %v363_v15  ;;  %v312_v5 = vmul.f32 %v3795_v26, %v3530_v0  ;;  %v311_v31 = vmul.f32 %v3795_v26, %v3532_v1 }
 0x15e   :  { %927 = vrot.lane.b32.xlu1 %v910_v23, %s3386_s24  ;;  %925 = vrot.lane.b32.xlu0 %v909_v43, %s3386_s24  ;;  %v958_v43 = vstv %s3841_s9  ;;  %v916_v1 = vmul.f32 %v3800_v29, %v3736_v8  ;;  %v552_v57 = vmul.f32 %v3819_v14, %v3632_v62  ;;  %s4783_s9 = sld [smem:[#allocation6 + $0x17]] }
 0x15f   :  { %v3845_v38 = vadd.f32 %v534_v30, %v464_v25  ;;  %v3847_v41 = vadd.f32 %v533_v33, %v463_v45  ;;  %v412_v25 = vadd.f32 %v3742_v12, %v312_v5  ;;  %v411_v54 = vadd.f32 %v3744_v13, %v311_v31  ;;  %v3942_v31 = vld [vmem:[#allocation2 + $0x18] sm:$0xff] }
 0x160   :  { %v486_v46 = vpop.permute.xlu1 %485  ;;  %v484_v48 = vpop.permute.xlu0 %483  ;;  %v915_v33 = vmul.f32 %v3800_v29, %v3738_v9  ;;  %v549_v12 = vmul.f32 %v3819_v14, %v3626_v59  ;;  %v314_v13 = vmul.f32 %v3795_v26, %v3548_v10  ;;  %v960_v10 = vmul.f32 %v958_v43, %v3700_v39 }
 0x161   :  { %v508_v36 = vadd.f32 %v486_v46, %v408_v40  ;;  %v507_v60 = vadd.f32 %v484_v48, %v407_v44  ;;  %v550_v40 = vmul.f32 %v3819_v14, %v3624_v58  ;;  %v313_v44 = vmul.f32 %v3795_v26, %v3550_v11 }
 0x162   :  { %931 = vrot.lane.b32.xlu1 %v912_v27, %s3386_s24  ;;  %929 = vrot.lane.b32.xlu0 %v911_v24, %s3386_s24  ;;  %v414_v29 = vadd.f32 %v3750_v18, %v314_v13  ;;  %v959_v11 = vmul.f32 %v958_v43, %v3702_v42  ;;  %v551_v18 = vmul.f32 %v3819_v14, %v3634_v63  ;;  %v1054_v5 = vstv %s3275_s10  ;;  %v3966_v13 = vld [vmem:[#allocation2 + $0xd8] sm:$0xff]  ;;  %s4805_s10 = sld [smem:[#allocation6 + $0x36]] }
 0x163   :  { %v3865_v16 = vadd.f32 %v546_v28, %v508_v36  ;;  %v3867_v49 = vadd.f32 %v545_v56, %v507_v60  ;;  %v413_v27 = vadd.f32 %v3752_v19, %v313_v44  ;;  %v964_v14 = vmul.f32 %v958_v43, %v3724_v2 }
 0x164   :  { %v490_v15 = vpop.permute.xlu1 %489  ;;  %v488_v52 = vpop.permute.xlu0 %487 }
 0x165   :  { %v510_v32 = vadd.f32 %v490_v15, %v410_v7  ;;  %v509_v23 = vadd.f32 %v488_v52, %v409_v47  ;;  %v962_v7 = vmul.f32 %v958_v43, %v3712_v50  ;;  %v961_v47 = vmul.f32 %v958_v43, %v3714_v51 }
 0x166   :  { %935 = vrot.lane.b32.xlu1 %v914_v53, %s3386_s24  ;;  %933 = vrot.lane.b32.xlu0 %v913_v22, %s3386_s24  ;;  %v963_v15 = vmul.f32 %v958_v43, %v3726_v3  ;;  %v966_v22 = vmul.f32 %v958_v43, %v3736_v8 }
 0x167   :  { %v3886_v45 = vadd.f32 %v548_v17, %v510_v32  ;;  %v3888_v55 = vadd.f32 %v547_v4, %v509_v23  ;;  %v965_v17 = vmul.f32 %v958_v43, %v3738_v9  ;;  %v3940_v4 = vld [vmem:[#allocation2 + $0x20] sm:$0xff]  ;;  %v3954_v43 = vld [vmem:[#allocation2 + $0x78] sm:$0xff] }
 0x168   :  { %v494_v30 = vpop.permute.xlu1 %493  ;;  %v492_v0 = vpop.permute.xlu0 %491 }
 0x169   :  { %v512_v46 = vadd.f32 %v494_v30, %v412_v25  ;;  %v511_v48 = vadd.f32 %v492_v0, %v411_v54  ;;  %v1056_v25 = vmul.f32 %v1054_v5, %v3940_v4  ;;  %v1055_v54 = vmul.f32 %v1054_v5, %v3942_v31  ;;  %v3952_v30 = vld [vmem:[#allocation2 + $0x80] sm:$0xff] }
 0x16a   :  { %939 = vrot.lane.b32.xlu1 %v916_v1, %s3386_s24  ;;  %937 = vrot.lane.b32.xlu0 %v915_v33, %s3386_s24  ;;  %v1058_v33 = vmul.f32 %v1054_v5, %v3952_v30 }
 0x16b   :  { %v3906_v58 = vadd.f32 %v550_v40, %v512_v46  ;;  %v3908_v24 = vadd.f32 %v549_v12, %v511_v48  ;;  %v1057_v40 = vmul.f32 %v1054_v5, %v3954_v43  ;;  %v3964_v12 = vld [vmem:[#allocation2 + $0xe0] sm:$0xff] }
 0x16c   :  { %v498_v59 = vpop.permute.xlu1 %497  ;;  %v496_v28 = vpop.permute.xlu0 %495  ;;  %v1060_v48 = vmul.f32 %v1054_v5, %v3964_v12 }
 0x16d   :  { %v514_v26 = vadd.f32 %v498_v59, %v414_v29  ;;  %v513_v56 = vadd.f32 %v496_v28, %v413_v27  ;;  %v1059_v29 = vmul.f32 %v1054_v5, %v3966_v13  ;;  %v3976_v27 = vld [vmem:[#allocation2 + $0x140] sm:$0xff]  ;;  %v3978_v59 = vld [vmem:[#allocation2 + $0x138] sm:$0xff] }
 0x16e   :  { %977 = vrot.lane.b32.xlu1 %v960_v10, %s3386_s24  ;;  %975 = vrot.lane.b32.xlu0 %v959_v11, %s3386_s24  ;;  %v1062_v11 = vmul.f32 %v1054_v5, %v3976_v27 }
 0x16f   :  { %v3918_v19 = vadd.f32 %v552_v57, %v514_v26  ;;  %v3920_v35 = vadd.f32 %v551_v18, %v513_v56  ;;  %v1061_v26 = vmul.f32 %v1054_v5, %v3978_v59  ;;  %v1104_v56 = vstv %s3276_s11  ;;  %s3302_s11 = sld [smem:[#allocation6 + $0x3b]] }
 0x170   :  { %v582_v36 = vpop.permute.xlu1 %581  ;;  %v580_v60 = vpop.permute.xlu0 %579 }
 0x172   :  { %981 = vrot.lane.b32.xlu1 %v962_v7, %s3386_s24  ;;  %979 = vrot.lane.b32.xlu0 %v961_v47, %s3386_s24  ;;  %v1106_v7 = vmul.f32 %v1104_v56, %v3940_v4  ;;  %v1105_v47 = vmul.f32 %v1104_v56, %v3942_v31 }
 0x174   :  { %v3926_v62 = vpop.permute.xlu1 %585  ;;  %v3928_v63 = vpop.permute.xlu0 %583 }
 0x176   :  { %985 = vrot.lane.b32.xlu1 %v964_v14, %s3386_s24  ;;  %983 = vrot.lane.b32.xlu0 %v963_v15, %s3386_s24  ;;  %v772_v14 = vstv %s3267_s12  ;;  %v604_v15 = vadd.f32 %v582_v36, %v3782_v61  ;;  %v606_v61 = vadd.f32 %v3926_v62, %v3804_v34  ;;  %s3305_s12 = sld [smem:[#allocation6 + $0x19]] }
 0x178   :  { %v3934_v52 = vpop.permute.xlu1 %589  ;;  %v3936_v53 = vpop.permute.xlu0 %587 }
 0x179   :  { %v608_v34 = vadd.f32 %v3934_v52, %v3823_v20  ;;  %v777_v20 = vmul.f32 %v772_v14, %v3726_v3 }
 0x17a   :  { %989 = vrot.lane.b32.xlu1 %v966_v22, %s3386_s24  ;;  %987 = vrot.lane.b32.xlu0 %v965_v17, %s3386_s24  ;;  %v603_v22 = vadd.f32 %v580_v60, %v3784_v6  ;;  %v605_v6 = vadd.f32 %v3928_v63, %v3806_v37  ;;  %v607_v37 = vadd.f32 %v3936_v53, %v3825_v21 }
 0x17c   :  { %v3946_v32 = vpop.permute.xlu1 %593  ;;  %v3948_v23 = vpop.permute.xlu0 %591 }
 0x17d   :  { %v610_v21 = vadd.f32 %v3946_v32, %v3845_v38  ;;  %v609_v52 = vadd.f32 %v3948_v23, %v3847_v41  ;;  %v790_v38 = vstv %s4020_s14  ;;  %s3297_s14 = sld [smem:[#allocation6 + $0x15]] }
 0x17e   :  { %1073 = vrot.lane.b32.xlu1 %v1056_v25, %s3385_s21  ;;  %1071 = vrot.lane.b32.xlu0 %v1055_v54, %s3385_s21  ;;  %v1108_v25 = vmul.f32 %v1104_v56, %v3952_v30  ;;  %v1107_v54 = vmul.f32 %v1104_v56, %v3954_v43 }
 0x180   :  { %v3958_v0 = vpop.permute.xlu1 %631  ;;  %v3960_v1 = vpop.permute.xlu0 %629 }
 0x181   :  { %v654_v41 = vadd.f32 %v3958_v0, %v3865_v16  ;;  %v653_v32 = vadd.f32 %v3960_v1, %v3867_v49  ;;  %v791_v16 = vmul.f32 %v790_v38, %v3702_v42 }
 0x182   :  { %1077 = vrot.lane.b32.xlu1 %v1058_v33, %s3385_s21  ;;  %1075 = vrot.lane.b32.xlu0 %v1057_v40, %s3385_s21 }
 0x184   :  { %v3970_v44 = vpop.permute.xlu1 %635  ;;  %v3972_v46 = vpop.permute.xlu0 %633 }
 0x185   :  { %v656_v49 = vadd.f32 %v3970_v44, %v3886_v45  ;;  %v655_v0 = vadd.f32 %v3972_v46, %v3888_v55 }
 0x186   :  { %1081 = vrot.lane.b32.xlu1 %v1060_v48, %s3385_s21  ;;  %1079 = vrot.lane.b32.xlu0 %v1059_v29, %s3385_s21  ;;  %v774_v48 = vmul.f32 %v772_v14, %v3700_v39  ;;  %v773_v29 = vmul.f32 %v772_v14, %v3702_v42 }
 0x188   :  { %v3982_v28 = vpop.permute.xlu1 %639  ;;  %v3984_v10 = vpop.permute.xlu0 %637 }
 0x189   :  { %v658_v45 = vadd.f32 %v3982_v28, %v3906_v58  ;;  %v657_v55 = vadd.f32 %v3984_v10, %v3908_v24  ;;  %v795_v58 = vmul.f32 %v790_v38, %v3726_v3 }
 0x18a   :  { %1085 = vrot.lane.b32.xlu1 %v1062_v11, %s3385_s21  ;;  %1083 = vrot.lane.b32.xlu0 %v1061_v26, %s3385_s21 }
 0x18c   :  { %v3990_v57 = vpop.permute.xlu1 %643  ;;  %v3992_v18 = vpop.permute.xlu0 %641 }
 0x18d   :  { %v660_v24 = vadd.f32 %v3990_v57, %v3918_v19  ;;  %v659_v28 = vadd.f32 %v3992_v18, %v3920_v35 }
 0x18e   :  { %1123 = vrot.lane.b32.xlu1 %v1106_v7, %s3385_s21  ;;  %1121 = vrot.lane.b32.xlu0 %v1105_v47, %s3385_s21  ;;  %v1110_v7 = vmul.f32 %v1104_v56, %v3964_v12  ;;  %v1109_v47 = vmul.f32 %v1104_v56, %v3966_v13 }
 0x190   :  { %v682_v17 = vpop.permute.xlu1 %681  ;;  %v680_v5 = vpop.permute.xlu0 %679 }
 0x191   :  { %v704_v33 = vadd.f32 %v682_v17, %v604_v15  ;;  %v703_v40 = vadd.f32 %v680_v5, %v603_v22  ;;  %v776_v17 = vmul.f32 %v772_v14, %v3712_v50  ;;  %v775_v5 = vmul.f32 %v772_v14, %v3714_v51 }
 0x192   :  { %1127 = vrot.lane.b32.xlu1 %v1108_v25, %s3385_s21  ;;  %1125 = vrot.lane.b32.xlu0 %v1107_v54, %s3385_s21 }
 0x193   :  { %v4010_v36 = vadd.f32 %v774_v48, %v704_v33  ;;  %v4012_v60 = vadd.f32 %v773_v29, %v703_v40  ;;  %v1112_v33 = vmul.f32 %v1104_v56, %v3976_v27  ;;  %v1111_v40 = vmul.f32 %v1104_v56, %v3978_v59 }
 0x194   :  { %v686_v11 = vpop.permute.xlu1 %685  ;;  %v684_v26 = vpop.permute.xlu0 %683  ;;  %v1154_v48 = vstv %s3277_s13  ;;  %s3306_s13 = sld [smem:[#allocation6 + $0x3d]] }
 0x195   :  { %v706_v15 = vadd.f32 %v686_v11, %v606_v61  ;;  %v705_v22 = vadd.f32 %v684_v26, %v605_v6  ;;  %v778_v6 = vmul.f32 %v772_v14, %v3724_v2  ;;  %v1159_v42 = vmul.f32 %v1154_v48, %v3966_v13 }
 0x196   :  { %1131 = vrot.lane.b32.xlu1 %v1110_v7, %s3385_s21  ;;  %1129 = vrot.lane.b32.xlu0 %v1109_v47, %s3385_s21  ;;  %v1156_v7 = vmul.f32 %v1154_v48, %v3940_v4  ;;  %v1155_v47 = vmul.f32 %v1154_v48, %v3942_v31 }
 0x197   :  { %v4026_v62 = vadd.f32 %v776_v17, %v706_v15  ;;  %v4028_v63 = vadd.f32 %v775_v5, %v705_v22  ;;  %v780_v17 = vmul.f32 %v772_v14, %v3736_v8  ;;  %v779_v5 = vmul.f32 %v772_v14, %v3738_v9 }
 0x198   :  { %v690_v25 = vpop.permute.xlu1 %689  ;;  %v688_v54 = vpop.permute.xlu0 %687  ;;  %v1157_v14 = vmul.f32 %v1154_v48, %v3954_v43 }
 0x199   :  { %v708_v29 = vadd.f32 %v690_v25, %v608_v34  ;;  %v707_v61 = vadd.f32 %v688_v54, %v607_v37  ;;  %v1158_v54 = vmul.f32 %v1154_v48, %v3952_v30 }
 0x19a   :  { %1135 = vrot.lane.b32.xlu1 %v1112_v33, %s3385_s21  ;;  %1133 = vrot.lane.b32.xlu0 %v1111_v40, %s3385_s21 }
 0x19b   :  { %v4040_v53 = vadd.f32 %v778_v6, %v708_v29  ;;  %v4042_v56 = vadd.f32 %v777_v20, %v707_v61  ;;  %v792_v29 = vmul.f32 %v790_v38, %v3700_v39  ;;  %v1160_v39 = vmul.f32 %v1154_v48, %v3964_v12 }
 0x19c   :  { %v694_v11 = vpop.permute.xlu1 %693  ;;  %v692_v26 = vpop.permute.xlu0 %691 }
 0x19d   :  { %v710_v15 = vadd.f32 %v694_v11, %v610_v21  ;;  %v709_v22 = vadd.f32 %v692_v26, %v609_v52  ;;  %v794_v11 = vmul.f32 %v790_v38, %v3712_v50  ;;  %v793_v26 = vmul.f32 %v790_v38, %v3714_v51 }
 0x19e   :  { %1173 = vrot.lane.b32.xlu1 %v1156_v7, %s3386_s24  ;;  %1171 = vrot.lane.b32.xlu0 %v1155_v47, %s3386_s24  ;;  %v1162_v50 = vmul.f32 %v1154_v48, %v3976_v27  ;;  %v1161_v51 = vmul.f32 %v1154_v48, %v3978_v59 }
 0x19f   :  { %v4055_v23 = vadd.f32 %v780_v17, %v710_v15  ;;  %v4057_v34 = vadd.f32 %v779_v5, %v709_v22  ;;  %v1204_v15 = vstv %s3278_s15  ;;  %v796_v5 = vmul.f32 %v790_v38, %v3724_v2  ;;  %s3307_s15 = sld [smem:[#allocation6 + $0x1a]] }
 0x1a0   :  { %v732_v37 = vpop.permute.xlu1 %731  ;;  %v730_v25 = vpop.permute.xlu0 %729  ;;  %v1206_v2 = vmul.f32 %v1204_v15, %v3940_v4  ;;  %v1205_v3 = vmul.f32 %v1204_v15, %v3942_v31 }
 0x1a1   :  { %v754_v33 = vadd.f32 %v732_v37, %v654_v41  ;;  %v753_v40 = vadd.f32 %v730_v25, %v653_v32 }
 0x1a2   :  { %1177 = vrot.lane.b32.xlu1 %v1158_v54, %s3386_s24  ;;  %1175 = vrot.lane.b32.xlu0 %v1157_v14, %s3386_s24  ;;  %v798_v54 = vmul.f32 %v790_v38, %v3736_v8  ;;  %v797_v14 = vmul.f32 %v790_v38, %v3738_v9  ;;  %v1210_v38 = vmul.f32 %v1204_v15, %v3964_v12 }
 0x1a3   :  { %v4069_v1 = vadd.f32 %v792_v29, %v754_v33  ;;  %v4071_v61 = vadd.f32 %v791_v16, %v753_v40  ;;  %v1208_v33 = vmul.f32 %v1204_v15, %v3952_v30  ;;  %v1207_v40 = vmul.f32 %v1204_v15, %v3954_v43 }
 0x1a4   :  { %v736_v6 = vpop.permute.xlu1 %735  ;;  %v734_v20 = vpop.permute.xlu0 %733  ;;  %v1209_v29 = vmul.f32 %v1204_v15, %v3966_v13 }
 0x1a5   :  { %v756_v21 = vadd.f32 %v736_v6, %v656_v49  ;;  %v755_v52 = vadd.f32 %v734_v20, %v655_v0  ;;  %v1212_v0 = vmul.f32 %v1204_v15, %v3976_v27  ;;  %v1211_v6 = vmul.f32 %v1204_v15, %v3978_v59  ;;  %v4129_v20 = vld [vmem:[#allocation2 + $0x21] sm:$0xff] }
 0x1a6   :  { %1181 = vrot.lane.b32.xlu1 %v1160_v39, %s3386_s24  ;;  %1179 = vrot.lane.b32.xlu0 %v1159_v42, %s3386_s24  ;;  %v1300_v39 = vstv %s3281_s16  ;;  %v4131_v42 = vld [vmem:[#allocation2 + $0x19] sm:$0xff]  ;;  %v4153_v15 = vld [vmem:[#allocation2 + $0xe1] sm:$0xff]  ;;  %s4997_s16 = sld [smem:[#allocation6 + $0x39]] }
 0x1a7   :  { %v4083_v44 = vadd.f32 %v794_v11, %v756_v21  ;;  %v4085_v46 = vadd.f32 %v793_v26, %v755_v52  ;;  %v1302_v11 = vmul.f32 %v1300_v39, %v4129_v20  ;;  %v1301_v26 = vmul.f32 %v1300_v39, %v4131_v42 }
 0x1a8   :  { %v740_v7 = vpop.permute.xlu1 %739  ;;  %v738_v47 = vpop.permute.xlu0 %737 }
 0x1a9   :  { %v758_v22 = vadd.f32 %v740_v7, %v658_v45  ;;  %v757_v17 = vadd.f32 %v738_v47, %v657_v55  ;;  %v4141_v45 = vld [vmem:[#allocation2 + $0x81] sm:$0xff]  ;;  %v4143_v55 = vld [vmem:[#allocation2 + $0x79] sm:$0xff] }
 0x1aa   :  { %1185 = vrot.lane.b32.xlu1 %v1162_v50, %s3386_s24  ;;  %1183 = vrot.lane.b32.xlu0 %v1161_v51, %s3386_s24  ;;  %v1304_v50 = vmul.f32 %v1300_v39, %v4141_v45  ;;  %v1303_v51 = vmul.f32 %v1300_v39, %v4143_v55 }
 0x1ab   :  { %v4097_v10 = vadd.f32 %v796_v5, %v758_v22  ;;  %v4099_v48 = vadd.f32 %v795_v58, %v757_v17  ;;  %v4155_v22 = vld [vmem:[#allocation2 + $0xd9] sm:$0xff]  ;;  %v1306_v58 = vmul.f32 %v1300_v39, %v4153_v15 }
 0x1ac   :  { %v744_v41 = vpop.permute.xlu1 %743  ;;  %v742_v32 = vpop.permute.xlu0 %741 }
 0x1ad   :  { %v760_v37 = vadd.f32 %v744_v41, %v660_v24  ;;  %v759_v25 = vadd.f32 %v742_v32, %v659_v28  ;;  %v1305_v24 = vmul.f32 %v1300_v39, %v4155_v22  ;;  %v4165_v28 = vld [vmem:[#allocation2 + $0x141] sm:$0xff]  ;;  %v4167_v41 = vld [vmem:[#allocation2 + $0x139] sm:$0xff] }
 0x1ae   :  { %1223 = vrot.lane.b32.xlu1 %v1206_v2, %s3386_s24  ;;  %1221 = vrot.lane.b32.xlu0 %v1205_v3, %s3386_s24  ;;  %v1308_v3 = vmul.f32 %v1300_v39, %v4165_v28 }
 0x1af   :  { %v4107_v19 = vadd.f32 %v798_v54, %v760_v37  ;;  %v4109_v35 = vadd.f32 %v797_v14, %v759_v25  ;;  %v1307_v37 = vmul.f32 %v1300_v39, %v4167_v41  ;;  %v1350_v25 = vstv %s3282_s17  ;;  %s3308_s17 = sld [smem:[#allocation6 + $0x3e]] }
 0x1b0   :  { %v828_v57 = vpop.permute.xlu1 %827  ;;  %v826_v18 = vpop.permute.xlu0 %825 }
 0x1b2   :  { %1227 = vrot.lane.b32.xlu1 %v1208_v33, %s3386_s24  ;;  %1225 = vrot.lane.b32.xlu0 %v1207_v40, %s3386_s24  ;;  %v1352_v33 = vmul.f32 %v1350_v25, %v4129_v20  ;;  %v1351_v40 = vmul.f32 %v1350_v25, %v4131_v42 }
 0x1b4   :  { %v4115_v8 = vpop.permute.xlu1 %831  ;;  %v4117_v9 = vpop.permute.xlu0 %829 }
 0x1b6   :  { %1231 = vrot.lane.b32.xlu1 %v1210_v38, %s3386_s24  ;;  %1229 = vrot.lane.b32.xlu0 %v1209_v29, %s3386_s24  ;;  %v1018_v38 = vstv %s3273_s18  ;;  %v850_v29 = vadd.f32 %v828_v57, %v4010_v36  ;;  %v852_v36 = vadd.f32 %v4115_v8, %v4026_v62  ;;  %s3311_s18 = sld [smem:[#allocation6 + $0x1c]] }
 0x1b8   :  { %v4123_v16 = vpop.permute.xlu1 %835  ;;  %v4125_v49 = vpop.permute.xlu0 %833 }
 0x1b9   :  { %v854_v62 = vadd.f32 %v4123_v16, %v4040_v53  ;;  %v1023_v53 = vmul.f32 %v1018_v38, %v3966_v13 }
 0x1ba   :  { %1235 = vrot.lane.b32.xlu1 %v1212_v0, %s3386_s24  ;;  %1233 = vrot.lane.b32.xlu0 %v1211_v6, %s3386_s24  ;;  %v849_v0 = vadd.f32 %v826_v18, %v4012_v60  ;;  %v851_v60 = vadd.f32 %v4117_v9, %v4028_v63  ;;  %v853_v63 = vadd.f32 %v4125_v49, %v4042_v56 }
 0x1bc   :  { %v4135_v21 = vpop.permute.xlu1 %839  ;;  %v4137_v52 = vpop.permute.xlu0 %837 }
 0x1bd   :  { %v856_v56 = vadd.f32 %v4135_v21, %v4055_v23  ;;  %v855_v16 = vadd.f32 %v4137_v52, %v4057_v34  ;;  %v1036_v23 = vstv %s4209_s1  ;;  %s3303_s1 = sld [smem:[#allocation6 + $0x18]] }
 0x1be   :  { %1319 = vrot.lane.b32.xlu1 %v1302_v11, %s3385_s21  ;;  %1317 = vrot.lane.b32.xlu0 %v1301_v26, %s3385_s21  ;;  %v1354_v11 = vmul.f32 %v1350_v25, %v4141_v45  ;;  %v1353_v26 = vmul.f32 %v1350_v25, %v4143_v55 }
 0x1c0   :  { %v4147_v7 = vpop.permute.xlu1 %877  ;;  %v4149_v47 = vpop.permute.xlu0 %875 }
 0x1c1   :  { %v900_v34 = vadd.f32 %v4147_v7, %v4069_v1  ;;  %v899_v21 = vadd.f32 %v4149_v47, %v4071_v61  ;;  %v1037_v1 = vmul.f32 %v1036_v23, %v3942_v31 }
 0x1c2   :  { %1323 = vrot.lane.b32.xlu1 %v1304_v50, %s3385_s21  ;;  %1321 = vrot.lane.b32.xlu0 %v1303_v51, %s3385_s21 }
 0x1c4   :  { %v4159_v17 = vpop.permute.xlu1 %881  ;;  %v4161_v5 = vpop.permute.xlu0 %879 }
 0x1c5   :  { %v902_v61 = vadd.f32 %v4159_v17, %v4083_v44  ;;  %v901_v7 = vadd.f32 %v4161_v5, %v4085_v46 }
 0x1c6   :  { %1327 = vrot.lane.b32.xlu1 %v1306_v58, %s3385_s21  ;;  %1325 = vrot.lane.b32.xlu0 %v1305_v24, %s3385_s21  ;;  %v1020_v58 = vmul.f32 %v1018_v38, %v3940_v4  ;;  %v1019_v24 = vmul.f32 %v1018_v38, %v3942_v31 }
 0x1c8   :  { %v4171_v32 = vpop.permute.xlu1 %885  ;;  %v4173_v2 = vpop.permute.xlu0 %883 }
 0x1c9   :  { %v904_v44 = vadd.f32 %v4171_v32, %v4097_v10  ;;  %v903_v46 = vadd.f32 %v4173_v2, %v4099_v48  ;;  %v1041_v10 = vmul.f32 %v1036_v23, %v3966_v13 }
 0x1ca   :  { %1331 = vrot.lane.b32.xlu1 %v1308_v3, %s3385_s21  ;;  %1329 = vrot.lane.b32.xlu0 %v1307_v37, %s3385_s21 }
 0x1cc   :  { %v4179_v54 = vpop.permute.xlu1 %889  ;;  %v4181_v14 = vpop.permute.xlu0 %887 }
 0x1cd   :  { %v906_v48 = vadd.f32 %v4179_v54, %v4107_v19  ;;  %v905_v32 = vadd.f32 %v4181_v14, %v4109_v35 }
 0x1ce   :  { %1369 = vrot.lane.b32.xlu1 %v1352_v33, %s3385_s21  ;;  %1367 = vrot.lane.b32.xlu0 %v1351_v40, %s3385_s21  ;;  %v1356_v33 = vmul.f32 %v1350_v25, %v4153_v15  ;;  %v1355_v40 = vmul.f32 %v1350_v25, %v4155_v22 }
 0x1d0   :  { %v928_v6 = vpop.permute.xlu1 %927  ;;  %v926_v39 = vpop.permute.xlu0 %925 }
 0x1d1   :  { %v950_v50 = vadd.f32 %v928_v6, %v850_v29  ;;  %v949_v51 = vadd.f32 %v926_v39, %v849_v0  ;;  %v1022_v6 = vmul.f32 %v1018_v38, %v3952_v30  ;;  %v1021_v39 = vmul.f32 %v1018_v38, %v3954_v43 }
 0x1d2   :  { %1373 = vrot.lane.b32.xlu1 %v1354_v11, %s3385_s21  ;;  %1371 = vrot.lane.b32.xlu0 %v1353_v26, %s3385_s21 }
 0x1d3   :  { %v4199_v57 = vadd.f32 %v1020_v58, %v950_v50  ;;  %v4201_v18 = vadd.f32 %v1019_v24, %v949_v51  ;;  %v1358_v50 = vmul.f32 %v1350_v25, %v4165_v28  ;;  %v1357_v51 = vmul.f32 %v1350_v25, %v4167_v41 }
 0x1d4   :  { %v932_v3 = vpop.permute.xlu1 %931  ;;  %v930_v37 = vpop.permute.xlu0 %929  ;;  %v1400_v58 = vstv %s3283_s19  ;;  %s3312_s19 = sld [smem:[#allocation6 + $0x40]] }
 0x1d5   :  { %v952_v29 = vadd.f32 %v932_v3, %v852_v36  ;;  %v951_v0 = vadd.f32 %v930_v37, %v851_v60  ;;  %v1024_v60 = vmul.f32 %v1018_v38, %v3964_v12  ;;  %v1405_v31 = vmul.f32 %v1400_v58, %v4155_v22 }
 0x1d6   :  { %1377 = vrot.lane.b32.xlu1 %v1356_v33, %s3385_s21  ;;  %1375 = vrot.lane.b32.xlu0 %v1355_v40, %s3385_s21  ;;  %v1402_v33 = vmul.f32 %v1400_v58, %v4129_v20  ;;  %v1401_v40 = vmul.f32 %v1400_v58, %v4131_v42 }
 0x1d7   :  { %v4215_v8 = vadd.f32 %v1022_v6, %v952_v29  ;;  %v4217_v9 = vadd.f32 %v1021_v39, %v951_v0  ;;  %v1026_v6 = vmul.f32 %v1018_v38, %v3976_v27  ;;  %v1025_v39 = vmul.f32 %v1018_v38, %v3978_v59 }
 0x1d8   :  { %v936_v11 = vpop.permute.xlu1 %935  ;;  %v934_v26 = vpop.permute.xlu0 %933  ;;  %v1403_v38 = vmul.f32 %v1400_v58, %v4143_v55 }
 0x1d9   :  { %v954_v24 = vadd.f32 %v936_v11, %v854_v62  ;;  %v953_v36 = vadd.f32 %v934_v26, %v853_v63  ;;  %v1404_v26 = vmul.f32 %v1400_v58, %v4141_v45 }
 0x1da   :  { %1381 = vrot.lane.b32.xlu1 %v1358_v50, %s3385_s21  ;;  %1379 = vrot.lane.b32.xlu0 %v1357_v51, %s3385_s21 }
 0x1db   :  { %v4229_v49 = vadd.f32 %v1024_v60, %v954_v24  ;;  %v4231_v25 = vadd.f32 %v1023_v53, %v953_v36  ;;  %v1038_v24 = vmul.f32 %v1036_v23, %v3940_v4  ;;  %v1406_v4 = vmul.f32 %v1400_v58, %v4153_v15 }
 0x1dc   :  { %v940_v3 = vpop.permute.xlu1 %939  ;;  %v938_v37 = vpop.permute.xlu0 %937 }
 0x1dd   :  { %v956_v29 = vadd.f32 %v940_v3, %v856_v56  ;;  %v955_v0 = vadd.f32 %v938_v37, %v855_v16  ;;  %v1040_v3 = vmul.f32 %v1036_v23, %v3952_v30  ;;  %v1039_v37 = vmul.f32 %v1036_v23, %v3954_v43 }
 0x1de   :  { %1419 = vrot.lane.b32.xlu1 %v1402_v33, %s3386_s24  ;;  %1417 = vrot.lane.b32.xlu0 %v1401_v40, %s3386_s24  ;;  %v1408_v30 = vmul.f32 %v1400_v58, %v4165_v28  ;;  %v1407_v43 = vmul.f32 %v1400_v58, %v4167_v41 }
 0x1df   :  { %v4244_v52 = vadd.f32 %v1026_v6, %v956_v29  ;;  %v4246_v62 = vadd.f32 %v1025_v39, %v955_v0  ;;  %v1450_v29 = vstv %s3284_s20  ;;  %v1042_v39 = vmul.f32 %v1036_v23, %v3964_v12  ;;  %s3313_s20 = sld [smem:[#allocation6 + $0x1d]] }
 0x1e0   :  { %v978_v63 = vpop.permute.xlu1 %977  ;;  %v976_v11 = vpop.permute.xlu0 %975  ;;  %v1452_v12 = vmul.f32 %v1450_v29, %v4129_v20  ;;  %v1451_v13 = vmul.f32 %v1450_v29, %v4131_v42 }
 0x1e1   :  { %v1000_v50 = vadd.f32 %v978_v63, %v900_v34  ;;  %v999_v51 = vadd.f32 %v976_v11, %v899_v21 }
 0x1e2   :  { %1423 = vrot.lane.b32.xlu1 %v1404_v26, %s3386_s24  ;;  %1421 = vrot.lane.b32.xlu0 %v1403_v38, %s3386_s24  ;;  %v1044_v26 = vmul.f32 %v1036_v23, %v3976_v27  ;;  %v1043_v38 = vmul.f32 %v1036_v23, %v3978_v59  ;;  %v1456_v23 = vmul.f32 %v1450_v29, %v4153_v15 }
 0x1e3   :  { %v4258_v47 = vadd.f32 %v1038_v24, %v1000_v50  ;;  %v4260_v36 = vadd.f32 %v1037_v1, %v999_v51  ;;  %v1454_v50 = vmul.f32 %v1450_v29, %v4141_v45  ;;  %v1453_v51 = vmul.f32 %v1450_v29, %v4143_v55 }
 0x1e4   :  { %v982_v60 = vpop.permute.xlu1 %981  ;;  %v980_v53 = vpop.permute.xlu0 %979  ;;  %v1455_v24 = vmul.f32 %v1450_v29, %v4155_v22 }
 0x1e5   :  { %v1002_v56 = vadd.f32 %v982_v60, %v902_v61  ;;  %v1001_v16 = vadd.f32 %v980_v53, %v901_v7  ;;  %v1458_v7 = vmul.f32 %v1450_v29, %v4165_v28  ;;  %v1457_v60 = vmul.f32 %v1450_v29, %v4167_v41  ;;  %v4318_v53 = vld [vmem:[#allocation2 + $0x22] sm:$0xff] }
 0x1e6   :  { %1427 = vrot.lane.b32.xlu1 %v1406_v4, %s3386_s24  ;;  %1425 = vrot.lane.b32.xlu0 %v1405_v31, %s3386_s24  ;;  %v1546_v4 = vstv %s3287_s0  ;;  %v4320_v31 = vld [vmem:[#allocation2 + $0x1a] sm:$0xff]  ;;  %v4342_v29 = vld [vmem:[#allocation2 + $0xe2] sm:$0xff]  ;;  %s5186_s0 = sld [smem:[#allocation6 + $0x3c]] }
 0x1e7   :  { %v4272_v17 = vadd.f32 %v1040_v3, %v1002_v56  ;;  %v4274_v5 = vadd.f32 %v1039_v37, %v1001_v16  ;;  %v1548_v3 = vmul.f32 %v1546_v4, %v4318_v53  ;;  %v1547_v37 = vmul.f32 %v1546_v4, %v4320_v31 }
 0x1e8   :  { %v986_v33 = vpop.permute.xlu1 %985  ;;  %v984_v40 = vpop.permute.xlu0 %983 }
 0x1e9   :  { %v1004_v0 = vadd.f32 %v986_v33, %v904_v44  ;;  %v1003_v6 = vadd.f32 %v984_v40, %v903_v46  ;;  %v4330_v44 = vld [vmem:[#allocation2 + $0x82] sm:$0xff]  ;;  %v4332_v46 = vld [vmem:[#allocation2 + $0x7a] sm:$0xff] }
 0x1ea   :  { %1431 = vrot.lane.b32.xlu1 %v1408_v30, %s3386_s24  ;;  %1429 = vrot.lane.b32.xlu0 %v1407_v43, %s3386_s24  ;;  %v1550_v30 = vmul.f32 %v1546_v4, %v4330_v44  ;;  %v1549_v43 = vmul.f32 %v1546_v4, %v4332_v46 }
 0x1eb   :  { %v4286_v2 = vadd.f32 %v1042_v39, %v1004_v0  ;;  %v4288_v58 = vadd.f32 %v1041_v10, %v1003_v6  ;;  %v4344_v0 = vld [vmem:[#allocation2 + $0xda] sm:$0xff]  ;;  %v1552_v10 = vmul.f32 %v1546_v4, %v4342_v29 }
 0x1ec   :  { %v990_v34 = vpop.permute.xlu1 %989  ;;  %v988_v21 = vpop.permute.xlu0 %987 }
 0x1ed   :  { %v1006_v63 = vadd.f32 %v990_v34, %v906_v48  ;;  %v1005_v11 = vadd.f32 %v988_v21, %v905_v32  ;;  %v1551_v48 = vmul.f32 %v1546_v4, %v4344_v0  ;;  %v4354_v32 = vld [vmem:[#allocation2 + $0x142] sm:$0xff]  ;;  %v4356_v34 = vld [vmem:[#allocation2 + $0x13a] sm:$0xff] }
 0x1ee   :  { %1469 = vrot.lane.b32.xlu1 %v1452_v12, %s3386_s24  ;;  %1467 = vrot.lane.b32.xlu0 %v1451_v13, %s3386_s24  ;;  %v1554_v13 = vmul.f32 %v1546_v4, %v4354_v32 }
 0x1ef   :  { %v4296_v19 = vadd.f32 %v1044_v26, %v1006_v63  ;;  %v4298_v35 = vadd.f32 %v1043_v38, %v1005_v11  ;;  %v1553_v63 = vmul.f32 %v1546_v4, %v4356_v34  ;;  %v1596_v11 = vstv %s3288_s22  ;;  %s3314_s22 = sld [smem:[#allocation6 + $0x41]] }
 0x1f0   :  { %v1074_v54 = vpop.permute.xlu1 %1073  ;;  %v1072_v14 = vpop.permute.xlu0 %1071 }
 0x1f2   :  { %1473 = vrot.lane.b32.xlu1 %v1454_v50, %s3386_s24  ;;  %1471 = vrot.lane.b32.xlu0 %v1453_v51, %s3386_s24  ;;  %v1598_v50 = vmul.f32 %v1596_v11, %v4318_v53  ;;  %v1597_v51 = vmul.f32 %v1596_v11, %v4320_v31 }
 0x1f4   :  { %v4304_v27 = vpop.permute.xlu1 %1077  ;;  %v4306_v59 = vpop.permute.xlu0 %1075 }
 0x1f6   :  { %1477 = vrot.lane.b32.xlu1 %v1456_v23, %s3386_s24  ;;  %1475 = vrot.lane.b32.xlu0 %v1455_v24, %s3386_s24  ;;  %v1264_v23 = vstv %s3279_s23  ;;  %v1096_v24 = vadd.f32 %v1074_v54, %v4199_v57  ;;  %v1098_v57 = vadd.f32 %v4304_v27, %v4215_v8  ;;  %s3317_s23 = sld [smem:[#allocation6 + $0x1f]] }
 0x1f8   :  { %v4312_v1 = vpop.permute.xlu1 %1081  ;;  %v4314_v61 = vpop.permute.xlu0 %1079 }
 0x1f9   :  { %v1100_v8 = vadd.f32 %v4312_v1, %v4229_v49  ;;  %v1269_v49 = vmul.f32 %v1264_v23, %v4155_v22 }
 0x1fa   :  { %1481 = vrot.lane.b32.xlu1 %v1458_v7, %s3386_s24  ;;  %1479 = vrot.lane.b32.xlu0 %v1457_v60, %s3386_s24  ;;  %v1095_v7 = vadd.f32 %v1072_v14, %v4201_v18  ;;  %v1097_v18 = vadd.f32 %v4306_v59, %v4217_v9  ;;  %v1099_v9 = vadd.f32 %v4314_v61, %v4231_v25 }
 0x1fc   :  { %v4324_v56 = vpop.permute.xlu1 %1085  ;;  %v4326_v16 = vpop.permute.xlu0 %1083 }
 0x1fd   :  { %v1102_v25 = vadd.f32 %v4324_v56, %v4244_v52  ;;  %v1101_v1 = vadd.f32 %v4326_v16, %v4246_v62  ;;  %v1282_v52 = vstv %s4398_s26  ;;  %s3309_s26 = sld [smem:[#allocation6 + $0x1b]] }
 0x1fe   :  { %1565 = vrot.lane.b32.xlu1 %v1548_v3, %s3385_s21  ;;  %1563 = vrot.lane.b32.xlu0 %v1547_v37, %s3385_s21  ;;  %v1600_v3 = vmul.f32 %v1596_v11, %v4330_v44  ;;  %v1599_v37 = vmul.f32 %v1596_v11, %v4332_v46 }
 0x200   :  { %v4336_v33 = vpop.permute.xlu1 %1123  ;;  %v4338_v40 = vpop.permute.xlu0 %1121 }
 0x201   :  { %v1146_v62 = vadd.f32 %v4336_v33, %v4258_v47  ;;  %v1145_v56 = vadd.f32 %v4338_v40, %v4260_v36  ;;  %v1283_v47 = vmul.f32 %v1282_v52, %v4131_v42 }
 0x202   :  { %1569 = vrot.lane.b32.xlu1 %v1550_v30, %s3385_s21  ;;  %1567 = vrot.lane.b32.xlu0 %v1549_v43, %s3385_s21 }
 0x204   :  { %v4348_v6 = vpop.permute.xlu1 %1127  ;;  %v4350_v39 = vpop.permute.xlu0 %1125 }
 0x205   :  { %v1148_v36 = vadd.f32 %v4348_v6, %v4272_v17  ;;  %v1147_v33 = vadd.f32 %v4350_v39, %v4274_v5 }
 0x206   :  { %1573 = vrot.lane.b32.xlu1 %v1552_v10, %s3385_s21  ;;  %1571 = vrot.lane.b32.xlu0 %v1551_v48, %s3385_s21  ;;  %v1266_v10 = vmul.f32 %v1264_v23, %v4129_v20  ;;  %v1265_v48 = vmul.f32 %v1264_v23, %v4131_v42 }
 0x208   :  { %v4360_v21 = vpop.permute.xlu1 %1131  ;;  %v4362_v12 = vpop.permute.xlu0 %1129 }
 0x209   :  { %v1150_v17 = vadd.f32 %v4360_v21, %v4286_v2  ;;  %v1149_v5 = vadd.f32 %v4362_v12, %v4288_v58  ;;  %v1287_v2 = vmul.f32 %v1282_v52, %v4155_v22 }
 0x20a   :  { %1577 = vrot.lane.b32.xlu1 %v1554_v13, %s3385_s21  ;;  %1575 = vrot.lane.b32.xlu0 %v1553_v63, %s3385_s21 }
 0x20c   :  { %v4368_v26 = vpop.permute.xlu1 %1135  ;;  %v4370_v38 = vpop.permute.xlu0 %1133 }
 0x20d   :  { %v1152_v58 = vadd.f32 %v4368_v26, %v4296_v19  ;;  %v1151_v21 = vadd.f32 %v4370_v38, %v4298_v35 }
 0x20e   :  { %1615 = vrot.lane.b32.xlu1 %v1598_v50, %s3385_s21  ;;  %1613 = vrot.lane.b32.xlu0 %v1597_v51, %s3385_s21  ;;  %v1602_v50 = vmul.f32 %v1596_v11, %v4342_v29  ;;  %v1601_v51 = vmul.f32 %v1596_v11, %v4344_v0 }
 0x210   :  { %v1174_v60 = vpop.permute.xlu1 %1173  ;;  %v1172_v4 = vpop.permute.xlu0 %1171 }
 0x211   :  { %v1196_v30 = vadd.f32 %v1174_v60, %v1096_v24  ;;  %v1195_v43 = vadd.f32 %v1172_v4, %v1095_v7  ;;  %v1268_v60 = vmul.f32 %v1264_v23, %v4141_v45  ;;  %v1267_v4 = vmul.f32 %v1264_v23, %v4143_v55 }
 0x212   :  { %1619 = vrot.lane.b32.xlu1 %v1600_v3, %s3385_s21  ;;  %1617 = vrot.lane.b32.xlu0 %v1599_v37, %s3385_s21 }
 0x213   :  { %v4388_v54 = vadd.f32 %v1266_v10, %v1196_v30  ;;  %v4390_v14 = vadd.f32 %v1265_v48, %v1195_v43  ;;  %v1604_v30 = vmul.f32 %v1596_v11, %v4354_v32  ;;  %v1603_v43 = vmul.f32 %v1596_v11, %v4356_v34 }
 0x214   :  { %v1178_v13 = vpop.permute.xlu1 %1177  ;;  %v1176_v63 = vpop.permute.xlu0 %1175  ;;  %v1646_v10 = vstv %s3289_s25  ;;  %s3318_s25 = sld [smem:[#allocation6 + $0x43]] }
 0x215   :  { %v1198_v24 = vadd.f32 %v1178_v13, %v1098_v57  ;;  %v1197_v7 = vadd.f32 %v1176_v63, %v1097_v18  ;;  %v1270_v18 = vmul.f32 %v1264_v23, %v4153_v15  ;;  %v1651_v42 = vmul.f32 %v1646_v10, %v4344_v0 }
 0x216   :  { %1623 = vrot.lane.b32.xlu1 %v1602_v50, %s3385_s21  ;;  %1621 = vrot.lane.b32.xlu0 %v1601_v51, %s3385_s21  ;;  %v1648_v50 = vmul.f32 %v1646_v10, %v4318_v53  ;;  %v1647_v51 = vmul.f32 %v1646_v10, %v4320_v31 }
 0x217   :  { %v4404_v27 = vadd.f32 %v1268_v60, %v1198_v24  ;;  %v4406_v59 = vadd.f32 %v1267_v4, %v1197_v7  ;;  %v1272_v60 = vmul.f32 %v1264_v23, %v4165_v28  ;;  %v1271_v4 = vmul.f32 %v1264_v23, %v4167_v41 }
 0x218   :  { %v1182_v3 = vpop.permute.xlu1 %1181  ;;  %v1180_v37 = vpop.permute.xlu0 %1179  ;;  %v1649_v23 = vmul.f32 %v1646_v10, %v4332_v46 }
 0x219   :  { %v1200_v48 = vadd.f32 %v1182_v3, %v1100_v8  ;;  %v1199_v57 = vadd.f32 %v1180_v37, %v1099_v9  ;;  %v1650_v37 = vmul.f32 %v1646_v10, %v4330_v44 }
 0x21a   :  { %1627 = vrot.lane.b32.xlu1 %v1604_v30, %s3385_s21  ;;  %1625 = vrot.lane.b32.xlu0 %v1603_v43, %s3385_s21 }
 0x21b   :  { %v4418_v61 = vadd.f32 %v1270_v18, %v1200_v48  ;;  %v4420_v11 = vadd.f32 %v1269_v49, %v1199_v57  ;;  %v1284_v48 = vmul.f32 %v1282_v52, %v4129_v20  ;;  %v1652_v20 = vmul.f32 %v1646_v10, %v4342_v29 }
 0x21c   :  { %v1186_v13 = vpop.permute.xlu1 %1185  ;;  %v1184_v63 = vpop.permute.xlu0 %1183 }
 0x21d   :  { %v1202_v24 = vadd.f32 %v1186_v13, %v1102_v25  ;;  %v1201_v7 = vadd.f32 %v1184_v63, %v1101_v1  ;;  %v1286_v13 = vmul.f32 %v1282_v52, %v4141_v45  ;;  %v1285_v63 = vmul.f32 %v1282_v52, %v4143_v55 }
 0x21e   :  { %1665 = vrot.lane.b32.xlu1 %v1648_v50, %s3386_s24  ;;  %1663 = vrot.lane.b32.xlu0 %v1647_v51, %s3386_s24  ;;  %v1654_v45 = vmul.f32 %v1646_v10, %v4354_v32  ;;  %v1653_v55 = vmul.f32 %v1646_v10, %v4356_v34 }
 0x21f   :  { %v4433_v16 = vadd.f32 %v1272_v60, %v1202_v24  ;;  %v4435_v8 = vadd.f32 %v1271_v4, %v1201_v7  ;;  %v1696_v24 = vstv %s3290_s27  ;;  %v1288_v4 = vmul.f32 %v1282_v52, %v4153_v15  ;;  %s3319_s27 = sld [smem:[#allocation6 + $0x20]] }
 0x220   :  { %v1224_v9 = vpop.permute.xlu1 %1223  ;;  %v1222_v3 = vpop.permute.xlu0 %1221  ;;  %v1698_v15 = vmul.f32 %v1696_v24, %v4318_v53  ;;  %v1697_v22 = vmul.f32 %v1696_v24, %v4320_v31 }
 0x221   :  { %v1246_v30 = vadd.f32 %v1224_v9, %v1146_v62  ;;  %v1245_v43 = vadd.f32 %v1222_v3, %v1145_v56 }
 0x222   :  { %1669 = vrot.lane.b32.xlu1 %v1650_v37, %s3386_s24  ;;  %1667 = vrot.lane.b32.xlu0 %v1649_v23, %s3386_s24  ;;  %v1290_v37 = vmul.f32 %v1282_v52, %v4165_v28  ;;  %v1289_v23 = vmul.f32 %v1282_v52, %v4167_v41  ;;  %v1702_v52 = vmul.f32 %v1696_v24, %v4342_v29 }
 0x223   :  { %v4447_v40 = vadd.f32 %v1284_v48, %v1246_v30  ;;  %v4449_v57 = vadd.f32 %v1283_v47, %v1245_v43  ;;  %v1700_v30 = vmul.f32 %v1696_v24, %v4330_v44  ;;  %v1699_v43 = vmul.f32 %v1696_v24, %v4332_v46 }
 0x224   :  { %v1228_v18 = vpop.permute.xlu1 %1227  ;;  %v1226_v49 = vpop.permute.xlu0 %1225  ;;  %v1701_v48 = vmul.f32 %v1696_v24, %v4344_v0 }
 0x225   :  { %v1248_v25 = vadd.f32 %v1228_v18, %v1148_v36  ;;  %v1247_v1 = vadd.f32 %v1226_v49, %v1147_v33  ;;  %v1704_v33 = vmul.f32 %v1696_v24, %v4354_v32  ;;  %v1703_v18 = vmul.f32 %v1696_v24, %v4356_v34  ;;  %v4509_v49 = vld [vmem:[#allocation2 + $0x38] sm:$0xff] }
 0x226   :  { %1673 = vrot.lane.b32.xlu1 %v1652_v20, %s3386_s24  ;;  %1671 = vrot.lane.b32.xlu0 %v1651_v42, %s3386_s24  ;;  %v1792_v20 = vstv %s3293_s28  ;;  %v4511_v42 = vld [vmem:[#allocation2 + $0x30] sm:$0xff]  ;;  %v4533_v24 = vld [vmem:[#allocation2 + $0xf8] sm:$0xff]  ;;  %s5375_s28 = sld [smem:[#allocation6 + $0x3f]] }
 0x227   :  { %v4461_v6 = vadd.f32 %v1286_v13, %v1248_v25  ;;  %v4463_v39 = vadd.f32 %v1285_v63, %v1247_v1  ;;  %v1794_v13 = vmul.f32 %v1792_v20, %v4509_v49  ;;  %v1793_v63 = vmul.f32 %v1792_v20, %v4511_v42 }
 0x228   :  { %v1232_v50 = vpop.permute.xlu1 %1231  ;;  %v1230_v51 = vpop.permute.xlu0 %1229 }
 0x229   :  { %v1250_v7 = vadd.f32 %v1232_v50, %v1150_v17  ;;  %v1249_v60 = vadd.f32 %v1230_v51, %v1149_v5  ;;  %v4521_v17 = vld [vmem:[#allocation2 + $0x98] sm:$0xff]  ;;  %v4523_v5 = vld [vmem:[#allocation2 + $0x90] sm:$0xff] }
 0x22a   :  { %1677 = vrot.lane.b32.xlu1 %v1654_v45, %s3386_s24  ;;  %1675 = vrot.lane.b32.xlu0 %v1653_v55, %s3386_s24  ;;  %v1796_v45 = vmul.f32 %v1792_v20, %v4521_v17  ;;  %v1795_v55 = vmul.f32 %v1792_v20, %v4523_v5 }
 0x22b   :  { %v4475_v12 = vadd.f32 %v1288_v4, %v1250_v7  ;;  %v4477_v10 = vadd.f32 %v1287_v2, %v1249_v60  ;;  %v4535_v7 = vld [vmem:[#allocation2 + $0xf0] sm:$0xff]  ;;  %v1798_v2 = vmul.f32 %v1792_v20, %v4533_v24 }
 0x22c   :  { %v1236_v62 = vpop.permute.xlu1 %1235  ;;  %v1234_v56 = vpop.permute.xlu0 %1233 }
 0x22d   :  { %v1252_v9 = vadd.f32 %v1236_v62, %v1152_v58  ;;  %v1251_v3 = vadd.f32 %v1234_v56, %v1151_v21  ;;  %v1797_v58 = vmul.f32 %v1792_v20, %v4535_v7  ;;  %v4545_v21 = vld [vmem:[#allocation2 + $0x158] sm:$0xff]  ;;  %v4547_v62 = vld [vmem:[#allocation2 + $0x150] sm:$0xff] }
 0x22e   :  { %1715 = vrot.lane.b32.xlu1 %v1698_v15, %s3386_s24  ;;  %1713 = vrot.lane.b32.xlu0 %v1697_v22, %s3386_s24  ;;  %v1800_v22 = vmul.f32 %v1792_v20, %v4545_v21 }
 0x22f   :  { %v4485_v19 = vadd.f32 %v1290_v37, %v1252_v9  ;;  %v4487_v35 = vadd.f32 %v1289_v23, %v1251_v3  ;;  %v1799_v9 = vmul.f32 %v1792_v20, %v4547_v62  ;;  %v1842_v3 = vstv %s3294_s29  ;;  %s3320_s29 = sld [smem:[#allocation6 + $0x44]] }
 0x230   :  { %v1320_v26 = vpop.permute.xlu1 %1319  ;;  %v4489_v38 = vpop.permute.xlu0 %1317  ;;  %v1846_v20 = vmul.f32 %v1842_v3, %v4521_v17 }
 0x232   :  { %1719 = vrot.lane.b32.xlu1 %v1700_v30, %s3386_s24  ;;  %1717 = vrot.lane.b32.xlu0 %v1699_v43, %s3386_s24  ;;  %v1844_v30 = vmul.f32 %v1842_v3, %v4509_v49  ;;  %v1843_v43 = vmul.f32 %v1842_v3, %v4511_v42 }
 0x234   :  { %v4495_v28 = vpop.permute.xlu1 %1323  ;;  %v4497_v41 = vpop.permute.xlu0 %1321 }
 0x236   :  { %1723 = vrot.lane.b32.xlu1 %v1702_v52, %s3386_s24  ;;  %1721 = vrot.lane.b32.xlu0 %v1701_v48, %s3386_s24  ;;  %v4567_v52 = vstv %s3285_s30  ;;  %v1342_v48 = vadd.f32 %v1320_v26, %v4388_v54  ;;  %v1343_v54 = vadd.f32 %v4497_v41, %v4406_v59  ;;  %s3323_s30 = sld [smem:[#allocation6 + $0x22]] }
 0x238   :  { %v4503_v47 = vpop.permute.xlu1 %1327  ;;  %v4505_v36 = vpop.permute.xlu0 %1325 }
 0x239   :  { %v1345_v59 = vadd.f32 %v4505_v36, %v4420_v11 }
 0x23a   :  { %1727 = vrot.lane.b32.xlu1 %v1704_v33, %s3386_s24  ;;  %1725 = vrot.lane.b32.xlu0 %v1703_v18, %s3386_s24 }
 0x23c   :  { %v4515_v25 = vpop.permute.xlu1 %1331  ;;  %v4517_v1 = vpop.permute.xlu0 %1329 }
 0x23d   :  { %v1348_v11 = vadd.f32 %v4515_v25, %v4433_v16  ;;  %v1517_v16 = vmul.f32 %v4567_v52, %v4356_v34 }
 0x23e   :  { %1811 = vrot.lane.b32.xlu1 %v1794_v13, %s3385_s21  ;;  %1809 = vrot.lane.b32.xlu0 %v1793_v63, %s3385_s21  ;;  %v1845_v13 = vmul.f32 %v1842_v3, %v4523_v5 }
 0x240   :  { %v4527_v50 = vpop.permute.xlu1 %1369  ;;  %v4529_v51 = vpop.permute.xlu0 %1367 }
 0x241   :  { %v1392_v25 = vadd.f32 %v4527_v50, %v4447_v40 }
 0x242   :  { %1815 = vrot.lane.b32.xlu1 %v1796_v45, %s3385_s21  ;;  %1813 = vrot.lane.b32.xlu0 %v1795_v55, %s3385_s21  ;;  %v1512_v45 = vmul.f32 %v4567_v52, %v4318_v53  ;;  %v1344_v55 = vadd.f32 %v4495_v28, %v4404_v27  ;;  %v1346_v27 = vadd.f32 %v4503_v47, %v4418_v61 }
 0x243   :  { %v1515_v61 = vmul.f32 %v4567_v52, %v4344_v0  ;;  %v1347_v47 = vadd.f32 %v4517_v1, %v4435_v8  ;;  %v4627_v8 = vstv %s4592_s4  ;;  %s3315_s4 = sld [smem:[#allocation6 + $0x1e]] }
 0x244   :  { %v4539_v60 = vpop.permute.xlu1 %1373  ;;  %v4541_v4 = vpop.permute.xlu0 %1371 }
 0x245   :  { %v1394_v40 = vadd.f32 %v4539_v60, %v4461_v6  ;;  %v1393_v50 = vadd.f32 %v4541_v4, %v4463_v39 }
 0x246   :  { %1819 = vrot.lane.b32.xlu1 %v1798_v2, %s3385_s21  ;;  %1817 = vrot.lane.b32.xlu0 %v1797_v58, %s3385_s21 }
 0x248   :  { %v4551_v56 = vpop.permute.xlu1 %1377  ;;  %v4553_v15 = vpop.permute.xlu0 %1375 }
 0x249   :  { %v1396_v6 = vadd.f32 %v4551_v56, %v4475_v12  ;;  %v1395_v39 = vadd.f32 %v4553_v15, %v4477_v10  ;;  %v1533_v12 = vmul.f32 %v4627_v8, %v4344_v0 }
 0x24a   :  { %1823 = vrot.lane.b32.xlu1 %v1800_v22, %s3385_s21  ;;  %1821 = vrot.lane.b32.xlu0 %v1799_v9, %s3385_s21  ;;  %v1848_v22 = vmul.f32 %v1842_v3, %v4533_v24  ;;  %v1847_v9 = vmul.f32 %v1842_v3, %v4535_v7 }
 0x24c   :  { %v4559_v37 = vpop.permute.xlu1 %1381  ;;  %v4561_v23 = vpop.permute.xlu0 %1379 }
 0x24d   :  { %v1398_v10 = vadd.f32 %v4559_v37, %v4485_v19  ;;  %v1397_v56 = vadd.f32 %v4561_v23, %v4487_v35  ;;  %v1535_v19 = vmul.f32 %v4627_v8, %v4356_v34 }
 0x24e   :  { %1861 = vrot.lane.b32.xlu1 %v1844_v30, %s3385_s21  ;;  %1859 = vrot.lane.b32.xlu0 %v1843_v43, %s3385_s21 }
 0x250   :  { %v1420_v33 = vpop.permute.xlu1 %1419  ;;  %v4570_v18 = vpop.permute.xlu0 %1417 }
 0x251   :  { %v1442_v63 = vadd.f32 %v1420_v33, %v1342_v48  ;;  %v1514_v48 = vmul.f32 %v4567_v52, %v4330_v44  ;;  %v1513_v33 = vmul.f32 %v4567_v52, %v4332_v46 }
 0x252   :  { %1865 = vrot.lane.b32.xlu1 %v1846_v20, %s3385_s21  ;;  %1863 = vrot.lane.b32.xlu0 %v1845_v13, %s3385_s21 }
 0x253   :  { %v4582_v26 = vadd.f32 %v1512_v45, %v1442_v63  ;;  %v1850_v63 = vmul.f32 %v1842_v3, %v4545_v21  ;;  %v1849_v45 = vmul.f32 %v1842_v3, %v4547_v62 }
 0x254   :  { %v1424_v2 = vpop.permute.xlu1 %1423  ;;  %v1422_v58 = vpop.permute.xlu0 %1421 }
 0x255   :  { %v1444_v30 = vadd.f32 %v1424_v2, %v1344_v55  ;;  %v1443_v43 = vadd.f32 %v1422_v58, %v1343_v54  ;;  %v1892_v55 = vstv %s3295_s3  ;;  %v1516_v58 = vmul.f32 %v4567_v52, %v4342_v29  ;;  %s3324_s3 = sld [smem:[#allocation6 + $0x46]] }
 0x256   :  { %1869 = vrot.lane.b32.xlu1 %v1848_v22, %s3385_s21  ;;  %1867 = vrot.lane.b32.xlu0 %v1847_v9, %s3385_s21 }
 0x257   :  { %v4598_v28 = vadd.f32 %v1514_v48, %v1444_v30  ;;  %v4600_v41 = vadd.f32 %v1513_v33, %v1443_v43  ;;  %v1894_v30 = vmul.f32 %v1892_v55, %v4509_v49  ;;  %v1893_v43 = vmul.f32 %v1892_v55, %v4511_v42 }
 0x258   :  { %v1428_v20 = vpop.permute.xlu1 %1427  ;;  %v1426_v13 = vpop.permute.xlu0 %1425 }
 0x259   :  { %v1446_v54 = vadd.f32 %v1428_v20, %v1346_v27  ;;  %v1445_v2 = vadd.f32 %v1426_v13, %v1345_v59  ;;  %v1518_v27 = vmul.f32 %v4567_v52, %v4354_v32 }
 0x25a   :  { %1873 = vrot.lane.b32.xlu1 %v1850_v63, %s3385_s21  ;;  %1871 = vrot.lane.b32.xlu0 %v1849_v45, %s3385_s21  ;;  %v1896_v63 = vmul.f32 %v1892_v55, %v4521_v17  ;;  %v1895_v45 = vmul.f32 %v1892_v55, %v4523_v5 }
 0x25b   :  { %v4614_v36 = vadd.f32 %v1516_v58, %v1446_v54  ;;  %v4616_v3 = vadd.f32 %v1515_v61, %v1445_v2  ;;  %v1530_v2 = vmul.f32 %v4627_v8, %v4318_v53 }
 0x25c   :  { %v1432_v22 = vpop.permute.xlu1 %1431  ;;  %v1430_v9 = vpop.permute.xlu0 %1429 }
 0x25d   :  { %v1448_v48 = vadd.f32 %v1432_v22, %v1348_v11  ;;  %v1447_v33 = vadd.f32 %v1430_v9, %v1347_v47  ;;  %v1898_v47 = vmul.f32 %v1892_v55, %v4533_v24  ;;  %v1897_v22 = vmul.f32 %v1892_v55, %v4535_v7 }
 0x25e   :  { %1911 = vrot.lane.b32.xlu1 %v1894_v30, %s3386_s24  ;;  %1909 = vrot.lane.b32.xlu0 %v1893_v43, %s3386_s24  ;;  %v1532_v30 = vmul.f32 %v4627_v8, %v4330_v44  ;;  %v1531_v43 = vmul.f32 %v4627_v8, %v4332_v46  ;;  %v1900_v44 = vmul.f32 %v1892_v55, %v4545_v21 }
 0x25f   :  { %v4631_v1 = vadd.f32 %v1518_v27, %v1448_v48  ;;  %v4633_v59 = vadd.f32 %v1517_v16, %v1447_v33  ;;  %v1899_v46 = vmul.f32 %v1892_v55, %v4547_v62  ;;  %v1942_v27 = vstv %s3296_s5  ;;  %s3325_s5 = sld [smem:[#allocation6 + $0x23]] }
 0x260   :  { %v1470_v20 = vpop.permute.xlu1 %1469  ;;  %v4635_v13 = vpop.permute.xlu0 %1467  ;;  %v1943_v0 = vmul.f32 %v1942_v27, %v4511_v42 }
 0x261   :  { %v1492_v54 = vadd.f32 %v1470_v20, %v1392_v25  ;;  %v1534_v20 = vmul.f32 %v4627_v8, %v4342_v29  ;;  %v1944_v29 = vmul.f32 %v1942_v27, %v4509_v49 }
 0x262   :  { %1915 = vrot.lane.b32.xlu1 %v1896_v63, %s3386_s24  ;;  %1913 = vrot.lane.b32.xlu0 %v1895_v45, %s3386_s24 }
 0x263   :  { %v4647_v58 = vadd.f32 %v1530_v2, %v1492_v54 }
 0x264   :  { %v1474_v61 = vpop.permute.xlu1 %1473  ;;  %v1472_v11 = vpop.permute.xlu0 %1471 }
 0x265   :  { %v1494_v9 = vadd.f32 %v1474_v61, %v1394_v40  ;;  %v1493_v53 = vadd.f32 %v1472_v11, %v1393_v50  ;;  %v1536_v40 = vmul.f32 %v4627_v8, %v4354_v32  ;;  %v1946_v61 = vmul.f32 %v1942_v27, %v4521_v17 }
 0x266   :  { %1919 = vrot.lane.b32.xlu1 %v1898_v47, %s3386_s24  ;;  %1917 = vrot.lane.b32.xlu0 %v1897_v22, %s3386_s24  ;;  %v1945_v11 = vmul.f32 %v1942_v27, %v4523_v5  ;;  %v1948_v47 = vmul.f32 %v1942_v27, %v4533_v24  ;;  %v1947_v22 = vmul.f32 %v1942_v27, %v4535_v7 }
 0x267   :  { %v4661_v60 = vadd.f32 %v1532_v30, %v1494_v9  ;;  %v4663_v4 = vadd.f32 %v1531_v43, %v1493_v53  ;;  %v1950_v30 = vmul.f32 %v1942_v27, %v4545_v21  ;;  %v1949_v43 = vmul.f32 %v1942_v27, %v4547_v62  ;;  %v4729_v27 = vld [vmem:[#allocation2 + $0x91] sm:$0xff] }
 0x268   :  { %v1478_v48 = vpop.permute.xlu1 %1477  ;;  %v1476_v33 = vpop.permute.xlu0 %1475 }
 0x269   :  { %v1496_v16 = vadd.f32 %v1478_v48, %v1396_v6  ;;  %v1495_v25 = vadd.f32 %v1476_v33, %v1395_v39  ;;  %v4715_v6 = vld [vmem:[#allocation2 + $0x39] sm:$0xff]  ;;  %v2038_v39 = vstv %s3299_s6  ;;  %v4717_v48 = vld [vmem:[#allocation2 + $0x31] sm:$0xff]  ;;  %s3316_s6 = sld [smem:[#allocation6 + $0x42]] }
 0x26a   :  { %1923 = vrot.lane.b32.xlu1 %v1900_v44, %s3386_s24  ;;  %1921 = vrot.lane.b32.xlu0 %v1899_v46, %s3386_s24  ;;  %v2040_v46 = vmul.f32 %v2038_v39, %v4715_v6 }
 0x26b   :  { %v4677_v15 = vadd.f32 %v1534_v20, %v1496_v16  ;;  %v4679_v55 = vadd.f32 %v1533_v12, %v1495_v25  ;;  %v2039_v16 = vmul.f32 %v2038_v39, %v4717_v48  ;;  %v4727_v25 = vld [vmem:[#allocation2 + $0x99] sm:$0xff] }
 0x26c   :  { %v1482_v63 = vpop.permute.xlu1 %1481  ;;  %v1480_v45 = vpop.permute.xlu0 %1479 }
 0x26d   :  { %v1498_v54 = vadd.f32 %v1482_v63, %v1398_v10  ;;  %v1497_v2 = vadd.f32 %v1480_v45, %v1397_v56  ;;  %v2042_v10 = vmul.f32 %v2038_v39, %v4727_v25  ;;  %v2041_v56 = vmul.f32 %v2038_v39, %v4729_v27  ;;  %v4739_v63 = vld [vmem:[#allocation2 + $0xf9] sm:$0xff]  ;;  %v4741_v45 = vld [vmem:[#allocation2 + $0xf1] sm:$0xff] }
 0x26e   :  { %1961 = vrot.lane.b32.xlu1 %v1944_v29, %s3386_s24  ;;  %1959 = vrot.lane.b32.xlu0 %v1943_v0, %s3386_s24 }
 0x26f   :  { %v4689_v35 = vadd.f32 %v1536_v40, %v1498_v54  ;;  %v4691_v37 = vadd.f32 %v1535_v19, %v1497_v2  ;;  %v2044_v54 = vmul.f32 %v2038_v39, %v4739_v63  ;;  %v2043_v2 = vmul.f32 %v2038_v39, %v4741_v45  ;;  %v4751_v40 = vld [vmem:[#allocation2 + $0x159] sm:$0xff]  ;;  %v4753_v19 = vld [vmem:[#allocation2 + $0x151] sm:$0xff] }
 0x270   :  { %v4693_v23 = vpop.permute.xlu1 %1565  ;;  %v4695_v50 = vpop.permute.xlu0 %1563 }
 0x272   :  { %1965 = vrot.lane.b32.xlu1 %v1946_v61, %s3386_s24  ;;  %1963 = vrot.lane.b32.xlu0 %v1945_v11, %s3386_s24  ;;  %v1341_v61 = vadd.f32 %v4489_v38, %v4390_v14 }
 0x274   :  { %v4701_v32 = vpop.permute.xlu1 %1569  ;;  %v4703_v34 = vpop.permute.xlu0 %1567 }
 0x276   :  { %1969 = vrot.lane.b32.xlu1 %v1948_v47, %s3386_s24  ;;  %1967 = vrot.lane.b32.xlu0 %v1947_v22, %s3386_s24  ;;  %v2046_v22 = vmul.f32 %v2038_v39, %v4751_v40 }
 0x278   :  { %v4709_v9 = vpop.permute.xlu1 %1573  ;;  %v4711_v53 = vpop.permute.xlu0 %1571 }
 0x27a   :  { %1973 = vrot.lane.b32.xlu1 %v1950_v30, %s3386_s24  ;;  %1971 = vrot.lane.b32.xlu0 %v1949_v43, %s3386_s24  ;;  %v2045_v30 = vmul.f32 %v2038_v39, %v4753_v19  ;;  %v1441_v43 = vadd.f32 %v4570_v18, %v1341_v61  ;;  %v1756_v18 = vstv %s3291_s8  ;;  %v1588_v39 = vadd.f32 %v4693_v23, %v4582_v26 }
 0x27b   :  { %v1590_v26 = vadd.f32 %v4701_v32, %v4598_v28  ;;  %v1589_v23 = vadd.f32 %v4703_v34, %v4600_v41  ;;  %v1759_v28 = vmul.f32 %v1756_v18, %v4523_v5  ;;  %v1391_v41 = vadd.f32 %v4529_v51, %v4449_v57 }
 0x27c   :  { %v4721_v33 = vpop.permute.xlu1 %1577  ;;  %v4723_v44 = vpop.permute.xlu0 %1575  ;;  %v1592_v32 = vadd.f32 %v4709_v9, %v4614_v36  ;;  %v1591_v34 = vadd.f32 %v4711_v53, %v4616_v3  ;;  %v1761_v9 = vmul.f32 %v1756_v18, %v4535_v7  ;;  %v1529_v3 = vmul.f32 %v4627_v8, %v4320_v31 }
 0x27d   :  { %v1594_v53 = vadd.f32 %v4721_v33, %v4631_v1  ;;  %v1764_v8 = vmul.f32 %v1756_v18, %v4545_v21  ;;  %v1763_v1 = vmul.f32 %v1756_v18, %v4547_v62 }
 0x27e   :  { %2057 = vrot.lane.b32.xlu1 %v2040_v46, %s3385_s21  ;;  %2055 = vrot.lane.b32.xlu0 %v2039_v16, %s3385_s21  ;;  %v2088_v46 = vstv %s3300_s7  ;;  %v1511_v16 = vmul.f32 %v4567_v52, %v4320_v31  ;;  %s3321_s7 = sld [smem:[#allocation6 + $0x21]] }
 0x27f   :  { %v2090_v38 = vmul.f32 %v2088_v46, %v4715_v6  ;;  %v2096_v57 = vmul.f32 %v2088_v46, %v4751_v40  ;;  %v2095_v51 = vmul.f32 %v2088_v46, %v4753_v19 }
 0x280   :  { %v4733_v20 = vpop.permute.xlu1 %1615  ;;  %v4735_v12 = vpop.permute.xlu0 %1613 }
 0x281   :  { %v1638_v33 = vadd.f32 %v4733_v20, %v4647_v58 }
 0x282   :  { %2061 = vrot.lane.b32.xlu1 %v2042_v10, %s3385_s21  ;;  %2059 = vrot.lane.b32.xlu0 %v2041_v56, %s3385_s21  ;;  %v2089_v56 = vmul.f32 %v2088_v46, %v4717_v48 }
 0x284   :  { %v4745_v29 = vpop.permute.xlu1 %1619  ;;  %v4747_v0 = vpop.permute.xlu0 %1617 }
 0x285   :  { %v1640_v58 = vadd.f32 %v4745_v29, %v4661_v60  ;;  %v1639_v20 = vadd.f32 %v4747_v0, %v4663_v4 }
 0x286   :  { %2065 = vrot.lane.b32.xlu1 %v2044_v54, %s3385_s21  ;;  %2063 = vrot.lane.b32.xlu0 %v2043_v2, %s3385_s21  ;;  %v1519_v54 = vadd.f32 %v1511_v16, %v1441_v43  ;;  %v1758_v16 = vmul.f32 %v1756_v18, %v4509_v49 }
 0x288   :  { %v4759_v11 = vpop.permute.xlu1 %1623  ;;  %v4761_v47 = vpop.permute.xlu0 %1621  ;;  %v1587_v2 = vadd.f32 %v4695_v50, %v1519_v54 }
 0x289   :  { %v1642_v60 = vadd.f32 %v4759_v11, %v4677_v15  ;;  %v1641_v4 = vadd.f32 %v4761_v47, %v4679_v55 }
 0x28a   :  { %2069 = vrot.lane.b32.xlu1 %v2046_v22, %s3385_s21  ;;  %2067 = vrot.lane.b32.xlu0 %v2045_v30, %s3385_s21  ;;  %v2092_v22 = vmul.f32 %v2088_v46, %v4727_v25  ;;  %v2091_v30 = vmul.f32 %v2088_v46, %v4729_v27 }
 0x28c   :  { %v4770_v10 = vpop.permute.xlu1 %1627  ;;  %v4772_v14 = vpop.permute.xlu0 %1625 }
 0x28d   :  { %5805 = vst [vmem:[#allocation9_spill] sm:$0xff] %v4772_v14  ;;  %v1644_v55 = vadd.f32 %v4770_v10, %v4689_v35 }
 0x28e   :  { %2107 = vrot.lane.b32.xlu1 %v2090_v38, %s3385_s21  ;;  %2105 = vrot.lane.b32.xlu0 %v2089_v56, %s3385_s21  ;;  %v1757_v38 = vmul.f32 %v1756_v18, %v4511_v42 }
 0x290   :  { %v1666_v52 = vpop.permute.xlu1 %1665  ;;  %v1664_v61 = vpop.permute.xlu0 %1663 }
 0x291   :  { %v1688_v14 = vadd.f32 %v1666_v52, %v1588_v39  ;;  %v1687_v43 = vadd.f32 %v1664_v61, %v1587_v2  ;;  %v2094_v2 = vmul.f32 %v2088_v46, %v4739_v63  ;;  %v2093_v52 = vmul.f32 %v2088_v46, %v4741_v45 }
 0x292   :  { %2111 = vrot.lane.b32.xlu1 %v2092_v22, %s3385_s21  ;;  %2109 = vrot.lane.b32.xlu0 %v2091_v30, %s3385_s21  ;;  %v1760_v30 = vmul.f32 %v1756_v18, %v4521_v17  ;;  %v1593_v46 = vadd.f32 %v4723_v44, %v4633_v59  ;;  %v1774_v59 = vstv %s4805_s10 }
 0x293   :  { %v4793_v50 = vadd.f32 %v1758_v16, %v1688_v14  ;;  %v4795_v56 = vadd.f32 %v1757_v38, %v1687_v43  ;;  %v1779_v15 = vmul.f32 %v1774_v59, %v4535_v7 }
 0x294   :  { %v1670_v54 = vpop.permute.xlu1 %1669  ;;  %v1668_v39 = vpop.permute.xlu0 %1667  ;;  %v5806_v11 = vld [vmem:[#allocation9_spill] sm:$0xff] }
 0x295   :  { %v1690_v61 = vadd.f32 %v1670_v54, %v1590_v26  ;;  %v1689_v22 = vadd.f32 %v1668_v39, %v1589_v23  ;;  %v2138_v26 = vstv %s4783_s9  ;;  %v1762_v23 = vmul.f32 %v1756_v18, %v4533_v24 }
 0x296   :  { %2115 = vrot.lane.b32.xlu1 %v2094_v2, %s3385_s21  ;;  %2113 = vrot.lane.b32.xlu0 %v2093_v52, %s3385_s21  ;;  %v1491_v54 = vadd.f32 %v4635_v13, %v1391_v41  ;;  %v2139_v31 = vmul.f32 %v2138_v26, %v4717_v48  ;;  %v2141_v18 = vmul.f32 %v2138_v26, %v4729_v27 }
 0x297   :  { %v4811_v14 = vadd.f32 %v1760_v30, %v1690_v61  ;;  %v4813_v43 = vadd.f32 %v1759_v28, %v1689_v22  ;;  %v2140_v22 = vmul.f32 %v2138_v26, %v4715_v6  ;;  %v1643_v47 = vadd.f32 %v5806_v11, %v4691_v37 }
 0x298   :  { %v1674_v16 = vpop.permute.xlu1 %1673  ;;  %v1672_v38 = vpop.permute.xlu0 %1671  ;;  %v1537_v30 = vadd.f32 %v1529_v3, %v1491_v54  ;;  %v1776_v54 = vmul.f32 %v1774_v59, %v4509_v49  ;;  %v2144_v49 = vmul.f32 %v2138_v26, %v4739_v63 }
 0x299   :  { %v1692_v39 = vadd.f32 %v1674_v16, %v1592_v32  ;;  %v1691_v36 = vadd.f32 %v1672_v38, %v1591_v34 }
 0x29a   :  { %2119 = vrot.lane.b32.xlu1 %v2096_v57, %s3385_s21  ;;  %2117 = vrot.lane.b32.xlu0 %v2095_v51, %s3385_s21  ;;  %v1637_v44 = vadd.f32 %v4735_v12, %v1537_v30  ;;  %v2142_v57 = vmul.f32 %v2138_v26, %v4727_v25 }
 0x29b   :  { %v4829_v2 = vadd.f32 %v1762_v23, %v1692_v39  ;;  %v4831_v13 = vadd.f32 %v1761_v9, %v1691_v36  ;;  %v1775_v39 = vmul.f32 %v1774_v59, %v4511_v42  ;;  %v2143_v42 = vmul.f32 %v2138_v26, %v4741_v45 }
 0x29c   :  { %v1678_v52 = vpop.permute.xlu1 %1677  ;;  %v1676_v61 = vpop.permute.xlu0 %1675 }
 0x29d   :  { %v1694_v28 = vadd.f32 %v1678_v52, %v1594_v53  ;;  %v1693_v41 = vadd.f32 %v1676_v61, %v1593_v46  ;;  %v1778_v52 = vmul.f32 %v1774_v59, %v4521_v17  ;;  %v1777_v61 = vmul.f32 %v1774_v59, %v4523_v5 }
 0x29e   :  { %2157 = vrot.lane.b32.xlu1 %v2140_v22, %s3386_s24  ;;  %2155 = vrot.lane.b32.xlu0 %v2139_v31, %s3386_s24  ;;  %v2146_v17 = vmul.f32 %v2138_v26, %v4751_v40  ;;  %v2145_v5 = vmul.f32 %v2138_v26, %v4753_v19 }
 0x29f   :  { %v4843_v32 = vadd.f32 %v1764_v8, %v1694_v28  ;;  %v4845_v34 = vadd.f32 %v1763_v1, %v1693_v41  ;;  %v2188_v8 = vstv %s3302_s11  ;;  %v1780_v41 = vmul.f32 %v1774_v59, %v4533_v24 }
 0x2a0   :  { %v1716_v16 = vpop.permute.xlu1 %1715  ;;  %v1714_v38 = vpop.permute.xlu0 %1713  ;;  %v2190_v24 = vmul.f32 %v2188_v8, %v4715_v6  ;;  %v2189_v7 = vmul.f32 %v2188_v8, %v4717_v48 }
 0x2a1   :  { %v1738_v51 = vadd.f32 %v1716_v16, %v1638_v33  ;;  %v1737_v23 = vadd.f32 %v1714_v38, %v1637_v44 }
 0x2a2   :  { %2161 = vrot.lane.b32.xlu1 %v2142_v57, %s3386_s24  ;;  %2159 = vrot.lane.b32.xlu0 %v2141_v18, %s3386_s24  ;;  %v1782_v57 = vmul.f32 %v1774_v59, %v4545_v21  ;;  %v1781_v18 = vmul.f32 %v1774_v59, %v4547_v62  ;;  %v2194_v59 = vmul.f32 %v2188_v8, %v4739_v63 }
 0x2a3   :  { %v4857_v12 = vadd.f32 %v1776_v54, %v1738_v51  ;;  %v4859_v36 = vadd.f32 %v1775_v39, %v1737_v23  ;;  %v2192_v23 = vmul.f32 %v2188_v8, %v4727_v25  ;;  %v2191_v54 = vmul.f32 %v2188_v8, %v4729_v27 }
 0x2a4   :  { %v1720_v9 = vpop.permute.xlu1 %1719  ;;  %v1718_v3 = vpop.permute.xlu0 %1717  ;;  %v2193_v39 = vmul.f32 %v2188_v8, %v4741_v45 }
 0x2a5   :  { %v1740_v53 = vadd.f32 %v1720_v9, %v1640_v58  ;;  %v1739_v46 = vadd.f32 %v1718_v3, %v1639_v20  ;;  %v2196_v9 = vmul.f32 %v2188_v8, %v4751_v40  ;;  %v2195_v3 = vmul.f32 %v2188_v8, %v4753_v19 }
 0x2a6   :  { %2165 = vrot.lane.b32.xlu1 %v2144_v49, %s3386_s24  ;;  %2163 = vrot.lane.b32.xlu0 %v2143_v42, %s3386_s24  ;;  %v4917_v49 = vld [vmem:[#allocation2 + $0x3a] sm:$0xff]  ;;  %v2284_v42 = vstv %s3305_s12 }
 0x2a7   :  { %v4871_v29 = vadd.f32 %v1778_v52, %v1740_v53  ;;  %v4873_v0 = vadd.f32 %v1777_v61, %v1739_v46  ;;  %v4919_v53 = vld [vmem:[#allocation2 + $0x32] sm:$0xff]  ;;  %v2286_v61 = vmul.f32 %v2284_v42, %v4917_v49 }
 0x2a8   :  { %v1724_v22 = vpop.permute.xlu1 %1723  ;;  %v1722_v31 = vpop.permute.xlu0 %1721 }
 0x2a9   :  { %v1742_v30 = vadd.f32 %v1724_v22, %v1642_v60  ;;  %v1741_v28 = vadd.f32 %v1722_v31, %v1641_v4  ;;  %v2285_v60 = vmul.f32 %v2284_v42, %v4919_v53  ;;  %v4929_v4 = vld [vmem:[#allocation2 + $0x9a] sm:$0xff]  ;;  %v4931_v22 = vld [vmem:[#allocation2 + $0x92] sm:$0xff] }
 0x2aa   :  { %2169 = vrot.lane.b32.xlu1 %v2146_v17, %s3386_s24  ;;  %2167 = vrot.lane.b32.xlu0 %v2145_v5, %s3386_s24  ;;  %v2288_v5 = vmul.f32 %v2284_v42, %v4929_v4  ;;  %v2287_v8 = vmul.f32 %v2284_v42, %v4931_v22 }
 0x2ab   :  { %v4885_v1 = vadd.f32 %v1780_v41, %v1742_v30  ;;  %v4887_v26 = vadd.f32 %v1779_v15, %v1741_v28  ;;  %v4941_v30 = vld [vmem:[#allocation2 + $0xfa] sm:$0xff]  ;;  %v4943_v28 = vld [vmem:[#allocation2 + $0xf2] sm:$0xff] }
 0x2ac   :  { %v1728_v33 = vpop.permute.xlu1 %1727  ;;  %v1726_v44 = vpop.permute.xlu0 %1725  ;;  %v2289_v11 = vmul.f32 %v2284_v42, %v4943_v28 }
 0x2ad   :  { %v1744_v16 = vadd.f32 %v1728_v33, %v1644_v55  ;;  %v1743_v38 = vadd.f32 %v1726_v44, %v1643_v47  ;;  %v2290_v55 = vmul.f32 %v2284_v42, %v4941_v30  ;;  %v4953_v47 = vld [vmem:[#allocation2 + $0x15a] sm:$0xff]  ;;  %v4955_v33 = vld [vmem:[#allocation2 + $0x152] sm:$0xff] }
 0x2ae   :  { %2207 = vrot.lane.b32.xlu1 %v2190_v24, %s3386_s24  ;;  %2205 = vrot.lane.b32.xlu0 %v2189_v7, %s3386_s24  ;;  %v2292_v7 = vmul.f32 %v2284_v42, %v4953_v47 }
 0x2af   :  { %v4895_v35 = vadd.f32 %v1782_v57, %v1744_v16  ;;  %v4897_v37 = vadd.f32 %v1781_v18, %v1743_v38  ;;  %v2291_v16 = vmul.f32 %v2284_v42, %v4955_v33  ;;  %v2334_v38 = vstv %s3306_s13 }
 0x2b0   :  { %v1812_v10 = vpop.permute.xlu1 %1811  ;;  %v1810_v51 = vpop.permute.xlu0 %1809 }
 0x2b2   :  { %2211 = vrot.lane.b32.xlu1 %v2192_v23, %s3386_s24  ;;  %2209 = vrot.lane.b32.xlu0 %v2191_v54, %s3386_s24  ;;  %v2336_v23 = vmul.f32 %v2334_v38, %v4917_v49  ;;  %v2335_v54 = vmul.f32 %v2334_v38, %v4919_v53 }
 0x2b4   :  { %v4903_v21 = vpop.permute.xlu1 %1815  ;;  %v4905_v62 = vpop.permute.xlu0 %1813 }
 0x2b6   :  { %2215 = vrot.lane.b32.xlu1 %v2194_v59, %s3386_s24  ;;  %2213 = vrot.lane.b32.xlu0 %v2193_v39, %s3386_s24  ;;  %v2002_v59 = vstv %s3297_s14  ;;  %v1834_v39 = vadd.f32 %v1812_v10, %v4793_v50  ;;  %v1836_v50 = vadd.f32 %v4903_v21, %v4811_v14 }
 0x2b8   :  { %v4911_v58 = vpop.permute.xlu1 %1819  ;;  %v4913_v20 = vpop.permute.xlu0 %1817 }
 0x2b9   :  { %v1838_v14 = vadd.f32 %v4911_v58, %v4829_v2  ;;  %v2007_v2 = vmul.f32 %v2002_v59, %v4741_v45 }
 0x2ba   :  { %2219 = vrot.lane.b32.xlu1 %v2196_v9, %s3386_s24  ;;  %2217 = vrot.lane.b32.xlu0 %v2195_v3, %s3386_s24  ;;  %v1833_v9 = vadd.f32 %v1810_v51, %v4795_v56  ;;  %v1835_v56 = vadd.f32 %v4905_v62, %v4813_v43  ;;  %v1837_v43 = vadd.f32 %v4913_v20, %v4831_v13 }
 0x2bc   :  { %v4923_v46 = vpop.permute.xlu1 %1823  ;;  %v4925_v52 = vpop.permute.xlu0 %1821 }
 0x2bd   :  { %v1840_v13 = vadd.f32 %v4923_v46, %v4843_v32  ;;  %v1839_v58 = vadd.f32 %v4925_v52, %v4845_v34  ;;  %v2020_v32 = vstv %s4997_s16 }
 0x2be   :  { %2303 = vrot.lane.b32.xlu1 %v2286_v61, %s3385_s21  ;;  %2301 = vrot.lane.b32.xlu0 %v2285_v60, %s3385_s21  ;;  %v2338_v61 = vmul.f32 %v2334_v38, %v4929_v4  ;;  %v2337_v60 = vmul.f32 %v2334_v38, %v4931_v22 }
 0x2c0   :  { %v4935_v31 = vpop.permute.xlu1 %1861  ;;  %v4937_v17 = vpop.permute.xlu0 %1859 }
 0x2c1   :  { %v1884_v34 = vadd.f32 %v4935_v31, %v4857_v12  ;;  %v1883_v46 = vadd.f32 %v4937_v17, %v4859_v36  ;;  %v2021_v12 = vmul.f32 %v2020_v32, %v4717_v48 }
 0x2c2   :  { %2307 = vrot.lane.b32.xlu1 %v2288_v5, %s3385_s21  ;;  %2305 = vrot.lane.b32.xlu0 %v2287_v8, %s3385_s21 }
 0x2c4   :  { %v4947_v41 = vpop.permute.xlu1 %1865  ;;  %v4949_v15 = vpop.permute.xlu0 %1863 }
 0x2c5   :  { %v1886_v36 = vadd.f32 %v4947_v41, %v4871_v29  ;;  %v1885_v31 = vadd.f32 %v4949_v15, %v4873_v0 }
 0x2c6   :  { %2311 = vrot.lane.b32.xlu1 %v2290_v55, %s3385_s21  ;;  %2309 = vrot.lane.b32.xlu0 %v2289_v11, %s3385_s21  ;;  %v2004_v55 = vmul.f32 %v2002_v59, %v4715_v6  ;;  %v2003_v11 = vmul.f32 %v2002_v59, %v4717_v48 }
 0x2c8   :  { %v4959_v44 = vpop.permute.xlu1 %1869  ;;  %v4961_v24 = vpop.permute.xlu0 %1867 }
 0x2c9   :  { %v1888_v29 = vadd.f32 %v4959_v44, %v4885_v1  ;;  %v1887_v0 = vadd.f32 %v4961_v24, %v4887_v26  ;;  %v2025_v1 = vmul.f32 %v2020_v32, %v4741_v45 }
 0x2ca   :  { %2315 = vrot.lane.b32.xlu1 %v2292_v7, %s3385_s21  ;;  %2313 = vrot.lane.b32.xlu0 %v2291_v16, %s3385_s21 }
 0x2cc   :  { %v4967_v57 = vpop.permute.xlu1 %1873  ;;  %v4969_v18 = vpop.permute.xlu0 %1871 }
 0x2cd   :  { %v1890_v26 = vadd.f32 %v4967_v57, %v4895_v35  ;;  %v1889_v44 = vadd.f32 %v4969_v18, %v4897_v37 }
 0x2ce   :  { %2353 = vrot.lane.b32.xlu1 %v2336_v23, %s3385_s21  ;;  %2351 = vrot.lane.b32.xlu0 %v2335_v54, %s3385_s21  ;;  %v2340_v23 = vmul.f32 %v2334_v38, %v4941_v30  ;;  %v2339_v54 = vmul.f32 %v2334_v38, %v4943_v28 }
 0x2d0   :  { %v1912_v3 = vpop.permute.xlu1 %1911  ;;  %v1910_v42 = vpop.permute.xlu0 %1909 }
 0x2d1   :  { %v1934_v5 = vadd.f32 %v1912_v3, %v1834_v39  ;;  %v1933_v8 = vadd.f32 %v1910_v42, %v1833_v9  ;;  %v2006_v3 = vmul.f32 %v2002_v59, %v4727_v25  ;;  %v2005_v42 = vmul.f32 %v2002_v59, %v4729_v27 }
 0x2d2   :  { %2357 = vrot.lane.b32.xlu1 %v2338_v61, %s3385_s21  ;;  %2355 = vrot.lane.b32.xlu0 %v2337_v60, %s3385_s21 }
 0x2d3   :  { %v4987_v10 = vadd.f32 %v2004_v55, %v1934_v5  ;;  %v4989_v51 = vadd.f32 %v2003_v11, %v1933_v8  ;;  %v2342_v5 = vmul.f32 %v2334_v38, %v4953_v47  ;;  %v2341_v8 = vmul.f32 %v2334_v38, %v4955_v33 }
 0x2d4   :  { %v1916_v7 = vpop.permute.xlu1 %1915  ;;  %v1914_v16 = vpop.permute.xlu0 %1913  ;;  %v2384_v55 = vstv %s3307_s15 }
 0x2d5   :  { %v1936_v39 = vadd.f32 %v1916_v7, %v1836_v50  ;;  %v1935_v9 = vadd.f32 %v1914_v16, %v1835_v56  ;;  %v2008_v56 = vmul.f32 %v2002_v59, %v4739_v63  ;;  %v2389_v48 = vmul.f32 %v2384_v55, %v4943_v28 }
 0x2d6   :  { %2361 = vrot.lane.b32.xlu1 %v2340_v23, %s3385_s21  ;;  %2359 = vrot.lane.b32.xlu0 %v2339_v54, %s3385_s21  ;;  %v2386_v23 = vmul.f32 %v2384_v55, %v4917_v49  ;;  %v2385_v54 = vmul.f32 %v2384_v55, %v4919_v53 }
 0x2d7   :  { %v5003_v21 = vadd.f32 %v2006_v3, %v1936_v39  ;;  %v5005_v62 = vadd.f32 %v2005_v42, %v1935_v9  ;;  %v2010_v3 = vmul.f32 %v2002_v59, %v4751_v40  ;;  %v2009_v42 = vmul.f32 %v2002_v59, %v4753_v19 }
 0x2d8   :  { %v1920_v61 = vpop.permute.xlu1 %1919  ;;  %v1918_v60 = vpop.permute.xlu0 %1917  ;;  %v2387_v59 = vmul.f32 %v2384_v55, %v4931_v22 }
 0x2d9   :  { %v1938_v11 = vadd.f32 %v1920_v61, %v1838_v14  ;;  %v1937_v50 = vadd.f32 %v1918_v60, %v1837_v43  ;;  %v2388_v60 = vmul.f32 %v2384_v55, %v4929_v4 }
 0x2da   :  { %2365 = vrot.lane.b32.xlu1 %v2342_v5, %s3385_s21  ;;  %2363 = vrot.lane.b32.xlu0 %v2341_v8, %s3385_s21 }
 0x2db   :  { %v5017_v20 = vadd.f32 %v2008_v56, %v1938_v11  ;;  %v5019_v38 = vadd.f32 %v2007_v2, %v1937_v50  ;;  %v2022_v11 = vmul.f32 %v2020_v32, %v4715_v6  ;;  %v2390_v6 = vmul.f32 %v2384_v55, %v4941_v30 }
 0x2dc   :  { %v1924_v7 = vpop.permute.xlu1 %1923  ;;  %v1922_v16 = vpop.permute.xlu0 %1921 }
 0x2dd   :  { %v1940_v39 = vadd.f32 %v1924_v7, %v1840_v13  ;;  %v1939_v9 = vadd.f32 %v1922_v16, %v1839_v58  ;;  %v2024_v7 = vmul.f32 %v2020_v32, %v4727_v25  ;;  %v2023_v16 = vmul.f32 %v2020_v32, %v4729_v27 }
 0x2de   :  { %2403 = vrot.lane.b32.xlu1 %v2386_v23, %s3386_s24  ;;  %2401 = vrot.lane.b32.xlu0 %v2385_v54, %s3386_s24  ;;  %v2392_v25 = vmul.f32 %v2384_v55, %v4953_v47  ;;  %v2391_v27 = vmul.f32 %v2384_v55, %v4955_v33 }
 0x2df   :  { %v5032_v52 = vadd.f32 %v2010_v3, %v1940_v39  ;;  %v5034_v14 = vadd.f32 %v2009_v42, %v1939_v9  ;;  %v2434_v39 = vstv %s3308_s17  ;;  %v2026_v42 = vmul.f32 %v2020_v32, %v4739_v63 }
 0x2e0   :  { %v1962_v43 = vpop.permute.xlu1 %1961  ;;  %v1960_v61 = vpop.permute.xlu0 %1959  ;;  %v2436_v63 = vmul.f32 %v2434_v39, %v4917_v49  ;;  %v2435_v45 = vmul.f32 %v2434_v39, %v4919_v53 }
 0x2e1   :  { %v1984_v5 = vadd.f32 %v1962_v43, %v1884_v34  ;;  %v1983_v8 = vadd.f32 %v1960_v61, %v1883_v46 }
 0x2e2   :  { %2407 = vrot.lane.b32.xlu1 %v2388_v60, %s3386_s24  ;;  %2405 = vrot.lane.b32.xlu0 %v2387_v59, %s3386_s24  ;;  %v2028_v60 = vmul.f32 %v2020_v32, %v4751_v40  ;;  %v2027_v59 = vmul.f32 %v2020_v32, %v4753_v19  ;;  %v2440_v32 = vmul.f32 %v2434_v39, %v4941_v30 }
 0x2e3   :  { %v5046_v17 = vadd.f32 %v2022_v11, %v1984_v5  ;;  %v5048_v50 = vadd.f32 %v2021_v12, %v1983_v8  ;;  %v2438_v5 = vmul.f32 %v2434_v39, %v4929_v4  ;;  %v2437_v8 = vmul.f32 %v2434_v39, %v4931_v22 }
 0x2e4   :  { %v1966_v56 = vpop.permute.xlu1 %1965  ;;  %v1964_v2 = vpop.permute.xlu0 %1963  ;;  %v2439_v11 = vmul.f32 %v2434_v39, %v4943_v28 }
 0x2e5   :  { %v1986_v13 = vadd.f32 %v1966_v56, %v1886_v36  ;;  %v1985_v58 = vadd.f32 %v1964_v2, %v1885_v31  ;;  %v2442_v31 = vmul.f32 %v2434_v39, %v4953_v47  ;;  %v2441_v56 = vmul.f32 %v2434_v39, %v4955_v33  ;;  %v5106_v2 = vld [vmem:[#allocation2 + $0x50] sm:$0xff] }
 0x2e6   :  { %2411 = vrot.lane.b32.xlu1 %v2390_v6, %s3386_s24  ;;  %2409 = vrot.lane.b32.xlu0 %v2389_v48, %s3386_s24  ;;  %v2530_v6 = vstv %s3311_s18  ;;  %v5108_v48 = vld [vmem:[#allocation2 + $0x48] sm:$0xff]  ;;  %v5130_v39 = vld [vmem:[#allocation2 + $0x110] sm:$0xff] }
 0x2e7   :  { %v5060_v41 = vadd.f32 %v2024_v7, %v1986_v13  ;;  %v5062_v15 = vadd.f32 %v2023_v16, %v1985_v58  ;;  %v2532_v7 = vmul.f32 %v2530_v6, %v5106_v2  ;;  %v2531_v16 = vmul.f32 %v2530_v6, %v5108_v48 }
 0x2e8   :  { %v1970_v23 = vpop.permute.xlu1 %1969  ;;  %v1968_v54 = vpop.permute.xlu0 %1967 }
 0x2e9   :  { %v1988_v9 = vadd.f32 %v1970_v23, %v1888_v29  ;;  %v1987_v3 = vadd.f32 %v1968_v54, %v1887_v0  ;;  %v5118_v29 = vld [vmem:[#allocation2 + $0xb0] sm:$0xff]  ;;  %v5120_v0 = vld [vmem:[#allocation2 + $0xa8] sm:$0xff] }
 0x2ea   :  { %2415 = vrot.lane.b32.xlu1 %v2392_v25, %s3386_s24  ;;  %2413 = vrot.lane.b32.xlu0 %v2391_v27, %s3386_s24  ;;  %v2534_v25 = vmul.f32 %v2530_v6, %v5118_v29  ;;  %v2533_v27 = vmul.f32 %v2530_v6, %v5120_v0 }
 0x2eb   :  { %v5074_v24 = vadd.f32 %v2026_v42, %v1988_v9  ;;  %v5076_v55 = vadd.f32 %v2025_v1, %v1987_v3  ;;  %v5132_v9 = vld [vmem:[#allocation2 + $0x108] sm:$0xff]  ;;  %v2536_v1 = vmul.f32 %v2530_v6, %v5130_v39 }
 0x2ec   :  { %v1974_v34 = vpop.permute.xlu1 %1973  ;;  %v1972_v46 = vpop.permute.xlu0 %1971 }
 0x2ed   :  { %v1990_v43 = vadd.f32 %v1974_v34, %v1890_v26  ;;  %v1989_v61 = vadd.f32 %v1972_v46, %v1889_v44  ;;  %v2535_v26 = vmul.f32 %v2530_v6, %v5132_v9  ;;  %v5142_v44 = vld [vmem:[#allocation2 + $0x170] sm:$0xff]  ;;  %v5144_v34 = vld [vmem:[#allocation2 + $0x168] sm:$0xff] }
 0x2ee   :  { %2453 = vrot.lane.b32.xlu1 %v2436_v63, %s3386_s24  ;;  %2451 = vrot.lane.b32.xlu0 %v2435_v45, %s3386_s24  ;;  %v2538_v45 = vmul.f32 %v2530_v6, %v5142_v44 }
 0x2ef   :  { %v5084_v35 = vadd.f32 %v2028_v60, %v1990_v43  ;;  %v5086_v37 = vadd.f32 %v2027_v59, %v1989_v61  ;;  %v2537_v43 = vmul.f32 %v2530_v6, %v5144_v34  ;;  %v2580_v61 = vstv %s3312_s19 }
 0x2f0   :  { %v2058_v57 = vpop.permute.xlu1 %2057  ;;  %v2056_v18 = vpop.permute.xlu0 %2055 }
 0x2f2   :  { %2457 = vrot.lane.b32.xlu1 %v2438_v5, %s3386_s24  ;;  %2455 = vrot.lane.b32.xlu0 %v2437_v8, %s3386_s24  ;;  %v2582_v5 = vmul.f32 %v2580_v61, %v5106_v2  ;;  %v2581_v8 = vmul.f32 %v2580_v61, %v5108_v48 }
 0x2f4   :  { %v5092_v40 = vpop.permute.xlu1 %2061  ;;  %v5094_v19 = vpop.permute.xlu0 %2059 }
 0x2f6   :  { %2461 = vrot.lane.b32.xlu1 %v2440_v32, %s3386_s24  ;;  %2459 = vrot.lane.b32.xlu0 %v2439_v11, %s3386_s24  ;;  %v2248_v32 = vstv %s3303_s1  ;;  %v2080_v11 = vadd.f32 %v2058_v57, %v4987_v10  ;;  %v2082_v10 = vadd.f32 %v5092_v40, %v5003_v21 }
 0x2f8   :  { %v5100_v12 = vpop.permute.xlu1 %2065  ;;  %v5102_v36 = vpop.permute.xlu0 %2063 }
 0x2f9   :  { %v2084_v21 = vadd.f32 %v5100_v12, %v5017_v20  ;;  %v2253_v20 = vmul.f32 %v2248_v32, %v4943_v28 }
 0x2fa   :  { %2465 = vrot.lane.b32.xlu1 %v2442_v31, %s3386_s24  ;;  %2463 = vrot.lane.b32.xlu0 %v2441_v56, %s3386_s24  ;;  %v2079_v31 = vadd.f32 %v2056_v18, %v4989_v51  ;;  %v2081_v51 = vadd.f32 %v5094_v19, %v5005_v62  ;;  %v2083_v62 = vadd.f32 %v5102_v36, %v5019_v38 }
 0x2fc   :  { %v5112_v13 = vpop.permute.xlu1 %2069  ;;  %v5114_v58 = vpop.permute.xlu0 %2067 }
 0x2fd   :  { %v2086_v38 = vadd.f32 %v5112_v13, %v5032_v52  ;;  %v2085_v12 = vadd.f32 %v5114_v58, %v5034_v14  ;;  %v2266_v52 = vstv %s5186_s0 }
 0x2fe   :  { %2549 = vrot.lane.b32.xlu1 %v2532_v7, %s3385_s21  ;;  %2547 = vrot.lane.b32.xlu0 %v2531_v16, %s3385_s21  ;;  %v2584_v7 = vmul.f32 %v2580_v61, %v5118_v29  ;;  %v2583_v16 = vmul.f32 %v2580_v61, %v5120_v0 }
 0x300   :  { %v5124_v23 = vpop.permute.xlu1 %2107  ;;  %v5126_v54 = vpop.permute.xlu0 %2105 }
 0x301   :  { %v2130_v14 = vadd.f32 %v5124_v23, %v5046_v17  ;;  %v2129_v13 = vadd.f32 %v5126_v54, %v5048_v50  ;;  %v2267_v17 = vmul.f32 %v2266_v52, %v4919_v53 }
 0x302   :  { %2553 = vrot.lane.b32.xlu1 %v2534_v25, %s3385_s21  ;;  %2551 = vrot.lane.b32.xlu0 %v2533_v27, %s3385_s21 }
 0x304   :  { %v5136_v3 = vpop.permute.xlu1 %2111  ;;  %v5138_v42 = vpop.permute.xlu0 %2109 }
 0x305   :  { %v2132_v50 = vadd.f32 %v5136_v3, %v5060_v41  ;;  %v2131_v23 = vadd.f32 %v5138_v42, %v5062_v15 }
 0x306   :  { %2557 = vrot.lane.b32.xlu1 %v2536_v1, %s3385_s21  ;;  %2555 = vrot.lane.b32.xlu0 %v2535_v26, %s3385_s21  ;;  %v2250_v1 = vmul.f32 %v2248_v32, %v4917_v49  ;;  %v2249_v26 = vmul.f32 %v2248_v32, %v4919_v53 }
 0x308   :  { %v5148_v46 = vpop.permute.xlu1 %2115  ;;  %v5150_v63 = vpop.permute.xlu0 %2113 }
 0x309   :  { %v2134_v41 = vadd.f32 %v5148_v46, %v5074_v24  ;;  %v2133_v15 = vadd.f32 %v5150_v63, %v5076_v55  ;;  %v2271_v24 = vmul.f32 %v2266_v52, %v4943_v28 }
 0x30a   :  { %2561 = vrot.lane.b32.xlu1 %v2538_v45, %s3385_s21  ;;  %2559 = vrot.lane.b32.xlu0 %v2537_v43, %s3385_s21 }
 0x30c   :  { %v5156_v60 = vpop.permute.xlu1 %2119  ;;  %v5158_v59 = vpop.permute.xlu0 %2117 }
 0x30d   :  { %v2136_v55 = vadd.f32 %v5156_v60, %v5084_v35  ;;  %v2135_v46 = vadd.f32 %v5158_v59, %v5086_v37 }
 0x30e   :  { %2599 = vrot.lane.b32.xlu1 %v2582_v5, %s3385_s21  ;;  %2597 = vrot.lane.b32.xlu0 %v2581_v8, %s3385_s21  ;;  %v2586_v5 = vmul.f32 %v2580_v61, %v5130_v39  ;;  %v2585_v8 = vmul.f32 %v2580_v61, %v5132_v9 }
 0x310   :  { %v2158_v56 = vpop.permute.xlu1 %2157  ;;  %v2156_v6 = vpop.permute.xlu0 %2155 }
 0x311   :  { %v2180_v25 = vadd.f32 %v2158_v56, %v2080_v11  ;;  %v2179_v27 = vadd.f32 %v2156_v6, %v2079_v31  ;;  %v2252_v56 = vmul.f32 %v2248_v32, %v4929_v4  ;;  %v2251_v6 = vmul.f32 %v2248_v32, %v4931_v22 }
 0x312   :  { %2603 = vrot.lane.b32.xlu1 %v2584_v7, %s3385_s21  ;;  %2601 = vrot.lane.b32.xlu0 %v2583_v16, %s3385_s21 }
 0x313   :  { %v5176_v57 = vadd.f32 %v2250_v1, %v2180_v25  ;;  %v5178_v18 = vadd.f32 %v2249_v26, %v2179_v27  ;;  %v2588_v25 = vmul.f32 %v2580_v61, %v5142_v44  ;;  %v2587_v27 = vmul.f32 %v2580_v61, %v5144_v34 }
 0x314   :  { %v2162_v45 = vpop.permute.xlu1 %2161  ;;  %v2160_v43 = vpop.permute.xlu0 %2159  ;;  %v2630_v1 = vstv %s3313_s20 }
 0x315   :  { %v2182_v11 = vadd.f32 %v2162_v45, %v2082_v10  ;;  %v2181_v31 = vadd.f32 %v2160_v43, %v2081_v51  ;;  %v2254_v51 = vmul.f32 %v2248_v32, %v4941_v30  ;;  %v2635_v53 = vmul.f32 %v2630_v1, %v5132_v9 }
 0x316   :  { %2607 = vrot.lane.b32.xlu1 %v2586_v5, %s3385_s21  ;;  %2605 = vrot.lane.b32.xlu0 %v2585_v8, %s3385_s21  ;;  %v2632_v5 = vmul.f32 %v2630_v1, %v5106_v2  ;;  %v2631_v8 = vmul.f32 %v2630_v1, %v5108_v48 }
 0x317   :  { %v5192_v40 = vadd.f32 %v2252_v56, %v2182_v11  ;;  %v5194_v19 = vadd.f32 %v2251_v6, %v2181_v31  ;;  %v2256_v56 = vmul.f32 %v2248_v32, %v4953_v47  ;;  %v2255_v6 = vmul.f32 %v2248_v32, %v4955_v33 }
 0x318   :  { %v2166_v7 = vpop.permute.xlu1 %2165  ;;  %v2164_v16 = vpop.permute.xlu0 %2163  ;;  %v2633_v32 = vmul.f32 %v2630_v1, %v5120_v0 }
 0x319   :  { %v2184_v26 = vadd.f32 %v2166_v7, %v2084_v21  ;;  %v2183_v10 = vadd.f32 %v2164_v16, %v2083_v62  ;;  %v2634_v16 = vmul.f32 %v2630_v1, %v5118_v29 }
 0x31a   :  { %2611 = vrot.lane.b32.xlu1 %v2588_v25, %s3385_s21  ;;  %2609 = vrot.lane.b32.xlu0 %v2587_v27, %s3385_s21 }
 0x31b   :  { %v5206_v36 = vadd.f32 %v2254_v51, %v2184_v26  ;;  %v5208_v61 = vadd.f32 %v2253_v20, %v2183_v10  ;;  %v2268_v26 = vmul.f32 %v2266_v52, %v4917_v49  ;;  %v2636_v49 = vmul.f32 %v2630_v1, %v5130_v39 }
 0x31c   :  { %v2170_v45 = vpop.permute.xlu1 %2169  ;;  %v2168_v43 = vpop.permute.xlu0 %2167 }
 0x31d   :  { %v2186_v11 = vadd.f32 %v2170_v45, %v2086_v38  ;;  %v2185_v31 = vadd.f32 %v2168_v43, %v2085_v12  ;;  %v2270_v45 = vmul.f32 %v2266_v52, %v4929_v4  ;;  %v2269_v43 = vmul.f32 %v2266_v52, %v4931_v22 }
 0x31e   :  { %2649 = vrot.lane.b32.xlu1 %v2632_v5, %s3386_s24  ;;  %2647 = vrot.lane.b32.xlu0 %v2631_v8, %s3386_s24  ;;  %v2638_v4 = vmul.f32 %v2630_v1, %v5142_v44  ;;  %v2637_v22 = vmul.f32 %v2630_v1, %v5144_v34 }
 0x31f   :  { %v5221_v58 = vadd.f32 %v2256_v56, %v2186_v11  ;;  %v5223_v21 = vadd.f32 %v2255_v6, %v2185_v31  ;;  %v2680_v11 = vstv %s3314_s22  ;;  %v2272_v6 = vmul.f32 %v2266_v52, %v4941_v30 }
 0x320   :  { %v2208_v62 = vpop.permute.xlu1 %2207  ;;  %v2206_v7 = vpop.permute.xlu0 %2205  ;;  %v2682_v30 = vmul.f32 %v2680_v11, %v5106_v2  ;;  %v2681_v28 = vmul.f32 %v2680_v11, %v5108_v48 }
 0x321   :  { %v2230_v25 = vadd.f32 %v2208_v62, %v2130_v14  ;;  %v2229_v27 = vadd.f32 %v2206_v7, %v2129_v13 }
 0x322   :  { %2653 = vrot.lane.b32.xlu1 %v2634_v16, %s3386_s24  ;;  %2651 = vrot.lane.b32.xlu0 %v2633_v32, %s3386_s24  ;;  %v2274_v16 = vmul.f32 %v2266_v52, %v4953_v47  ;;  %v2273_v32 = vmul.f32 %v2266_v52, %v4955_v33  ;;  %v2686_v52 = vmul.f32 %v2680_v11, %v5130_v39 }
 0x323   :  { %v5235_v54 = vadd.f32 %v2268_v26, %v2230_v25  ;;  %v5237_v10 = vadd.f32 %v2267_v17, %v2229_v27  ;;  %v2684_v25 = vmul.f32 %v2680_v11, %v5118_v29  ;;  %v2683_v27 = vmul.f32 %v2680_v11, %v5120_v0 }
 0x324   :  { %v2212_v51 = vpop.permute.xlu1 %2211  ;;  %v2210_v20 = vpop.permute.xlu0 %2209  ;;  %v2685_v26 = vmul.f32 %v2680_v11, %v5132_v9 }
 0x325   :  { %v2232_v38 = vadd.f32 %v2212_v51, %v2132_v50  ;;  %v2231_v12 = vadd.f32 %v2210_v20, %v2131_v23  ;;  %v2688_v23 = vmul.f32 %v2680_v11, %v5142_v44  ;;  %v2687_v51 = vmul.f32 %v2680_v11, %v5144_v34  ;;  %v5295_v20 = vld [vmem:[#allocation2 + $0x51] sm:$0xff] }
 0x326   :  { %2657 = vrot.lane.b32.xlu1 %v2636_v49, %s3386_s24  ;;  %2655 = vrot.lane.b32.xlu0 %v2635_v53, %s3386_s24  ;;  %v2776_v49 = vstv %s3317_s23  ;;  %v5297_v53 = vld [vmem:[#allocation2 + $0x49] sm:$0xff]  ;;  %v5319_v11 = vld [vmem:[#allocation2 + $0x111] sm:$0xff] }
 0x327   :  { %v5249_v3 = vadd.f32 %v2270_v45, %v2232_v38  ;;  %v5251_v42 = vadd.f32 %v2269_v43, %v2231_v12  ;;  %v2778_v45 = vmul.f32 %v2776_v49, %v5295_v20  ;;  %v2777_v43 = vmul.f32 %v2776_v49, %v5297_v53 }
 0x328   :  { %v2216_v5 = vpop.permute.xlu1 %2215  ;;  %v2214_v8 = vpop.permute.xlu0 %2213 }
 0x329   :  { %v2234_v31 = vadd.f32 %v2216_v5, %v2134_v41  ;;  %v2233_v56 = vadd.f32 %v2214_v8, %v2133_v15  ;;  %v5307_v41 = vld [vmem:[#allocation2 + $0xb1] sm:$0xff]  ;;  %v5309_v15 = vld [vmem:[#allocation2 + $0xa9] sm:$0xff] }
 0x32a   :  { %2661 = vrot.lane.b32.xlu1 %v2638_v4, %s3386_s24  ;;  %2659 = vrot.lane.b32.xlu0 %v2637_v22, %s3386_s24  ;;  %v2780_v4 = vmul.f32 %v2776_v49, %v5307_v41  ;;  %v2779_v22 = vmul.f32 %v2776_v49, %v5309_v15 }
 0x32b   :  { %v5263_v63 = vadd.f32 %v2272_v6, %v2234_v31  ;;  %v5265_v1 = vadd.f32 %v2271_v24, %v2233_v56  ;;  %v5321_v31 = vld [vmem:[#allocation2 + $0x109] sm:$0xff]  ;;  %v2782_v24 = vmul.f32 %v2776_v49, %v5319_v11 }
 0x32c   :  { %v2220_v14 = vpop.permute.xlu1 %2219  ;;  %v2218_v13 = vpop.permute.xlu0 %2217 }
 0x32d   :  { %v2236_v62 = vadd.f32 %v2220_v14, %v2136_v55  ;;  %v2235_v7 = vadd.f32 %v2218_v13, %v2135_v46  ;;  %v2781_v55 = vmul.f32 %v2776_v49, %v5321_v31  ;;  %v5331_v46 = vld [vmem:[#allocation2 + $0x171] sm:$0xff]  ;;  %v5333_v14 = vld [vmem:[#allocation2 + $0x169] sm:$0xff] }
 0x32e   :  { %2699 = vrot.lane.b32.xlu1 %v2682_v30, %s3386_s24  ;;  %2697 = vrot.lane.b32.xlu0 %v2681_v28, %s3386_s24  ;;  %v2784_v28 = vmul.f32 %v2776_v49, %v5331_v46 }
 0x32f   :  { %v5273_v35 = vadd.f32 %v2274_v16, %v2236_v62  ;;  %v5275_v37 = vadd.f32 %v2273_v32, %v2235_v7  ;;  %v2783_v62 = vmul.f32 %v2776_v49, %v5333_v14  ;;  %v2826_v7 = vstv %s3318_s25 }
 0x330   :  { %v2304_v60 = vpop.permute.xlu1 %2303  ;;  %v2302_v59 = vpop.permute.xlu0 %2301 }
 0x332   :  { %2703 = vrot.lane.b32.xlu1 %v2684_v25, %s3386_s24  ;;  %2701 = vrot.lane.b32.xlu0 %v2683_v27, %s3386_s24  ;;  %v2828_v25 = vmul.f32 %v2826_v7, %v5295_v20  ;;  %v2827_v27 = vmul.f32 %v2826_v7, %v5297_v53 }
 0x334   :  { %v5281_v47 = vpop.permute.xlu1 %2307  ;;  %v5283_v33 = vpop.permute.xlu0 %2305 }
 0x336   :  { %2707 = vrot.lane.b32.xlu1 %v2686_v52, %s3386_s24  ;;  %2705 = vrot.lane.b32.xlu0 %v2685_v26, %s3386_s24  ;;  %v2494_v52 = vstv %s3309_s26  ;;  %v2326_v26 = vadd.f32 %v2304_v60, %v5176_v57  ;;  %v2328_v57 = vadd.f32 %v5281_v47, %v5192_v40 }
 0x338   :  { %v5289_v17 = vpop.permute.xlu1 %2311  ;;  %v5291_v50 = vpop.permute.xlu0 %2309 }
 0x339   :  { %v2330_v40 = vadd.f32 %v5289_v17, %v5206_v36  ;;  %v2499_v36 = vmul.f32 %v2494_v52, %v5132_v9 }
 0x33a   :  { %2711 = vrot.lane.b32.xlu1 %v2688_v23, %s3386_s24  ;;  %2709 = vrot.lane.b32.xlu0 %v2687_v51, %s3386_s24  ;;  %v2325_v23 = vadd.f32 %v2302_v59, %v5178_v18  ;;  %v2327_v18 = vadd.f32 %v5283_v33, %v5194_v19  ;;  %v2329_v19 = vadd.f32 %v5291_v50, %v5208_v61 }
 0x33c   :  { %v5301_v38 = vpop.permute.xlu1 %2315  ;;  %v5303_v12 = vpop.permute.xlu0 %2313 }
 0x33d   :  { %v2332_v61 = vadd.f32 %v5301_v38, %v5221_v58  ;;  %v2331_v17 = vadd.f32 %v5303_v12, %v5223_v21  ;;  %v2512_v58 = vstv %s5375_s28 }
 0x33e   :  { %2795 = vrot.lane.b32.xlu1 %v2778_v45, %s3385_s21  ;;  %2793 = vrot.lane.b32.xlu0 %v2777_v43, %s3385_s21  ;;  %v2830_v45 = vmul.f32 %v2826_v7, %v5307_v41  ;;  %v2829_v43 = vmul.f32 %v2826_v7, %v5309_v15 }
 0x340   :  { %v5313_v5 = vpop.permute.xlu1 %2353  ;;  %v5315_v8 = vpop.permute.xlu0 %2351 }
 0x341   :  { %v2376_v21 = vadd.f32 %v5313_v5, %v5235_v54  ;;  %v2375_v38 = vadd.f32 %v5315_v8, %v5237_v10  ;;  %v2513_v54 = vmul.f32 %v2512_v58, %v5108_v48 }
 0x342   :  { %2799 = vrot.lane.b32.xlu1 %v2780_v4, %s3385_s21  ;;  %2797 = vrot.lane.b32.xlu0 %v2779_v22, %s3385_s21 }
 0x344   :  { %v5325_v56 = vpop.permute.xlu1 %2357  ;;  %v5327_v6 = vpop.permute.xlu0 %2355 }
 0x345   :  { %v2378_v10 = vadd.f32 %v5325_v56, %v5249_v3  ;;  %v2377_v5 = vadd.f32 %v5327_v6, %v5251_v42 }
 0x346   :  { %2803 = vrot.lane.b32.xlu1 %v2782_v24, %s3385_s21  ;;  %2801 = vrot.lane.b32.xlu0 %v2781_v55, %s3385_s21  ;;  %v2496_v24 = vmul.f32 %v2494_v52, %v5106_v2  ;;  %v2495_v55 = vmul.f32 %v2494_v52, %v5108_v48 }
 0x348   :  { %v5337_v13 = vpop.permute.xlu1 %2361  ;;  %v5339_v30 = vpop.permute.xlu0 %2359 }
 0x349   :  { %v2380_v3 = vadd.f32 %v5337_v13, %v5263_v63  ;;  %v2379_v42 = vadd.f32 %v5339_v30, %v5265_v1  ;;  %v2517_v63 = vmul.f32 %v2512_v58, %v5132_v9 }
 0x34a   :  { %2807 = vrot.lane.b32.xlu1 %v2784_v28, %s3385_s21  ;;  %2805 = vrot.lane.b32.xlu0 %v2783_v62, %s3385_s21 }
 0x34c   :  { %v5345_v16 = vpop.permute.xlu1 %2365  ;;  %v5347_v32 = vpop.permute.xlu0 %2363 }
 0x34d   :  { %v2382_v1 = vadd.f32 %v5345_v16, %v5273_v35  ;;  %v2381_v13 = vadd.f32 %v5347_v32, %v5275_v37 }
 0x34e   :  { %2845 = vrot.lane.b32.xlu1 %v2828_v25, %s3385_s21  ;;  %2843 = vrot.lane.b32.xlu0 %v2827_v27, %s3385_s21  ;;  %v2832_v25 = vmul.f32 %v2826_v7, %v5319_v11  ;;  %v2831_v27 = vmul.f32 %v2826_v7, %v5321_v31 }
 0x350   :  { %v2404_v51 = vpop.permute.xlu1 %2403  ;;  %v2402_v49 = vpop.permute.xlu0 %2401 }
 0x351   :  { %v2426_v4 = vadd.f32 %v2404_v51, %v2326_v26  ;;  %v2425_v22 = vadd.f32 %v2402_v49, %v2325_v23  ;;  %v2498_v51 = vmul.f32 %v2494_v52, %v5118_v29  ;;  %v2497_v49 = vmul.f32 %v2494_v52, %v5120_v0 }
 0x352   :  { %2849 = vrot.lane.b32.xlu1 %v2830_v45, %s3385_s21  ;;  %2847 = vrot.lane.b32.xlu0 %v2829_v43, %s3385_s21 }
 0x353   :  { %v5365_v60 = vadd.f32 %v2496_v24, %v2426_v4  ;;  %v5367_v59 = vadd.f32 %v2495_v55, %v2425_v22  ;;  %v2834_v4 = vmul.f32 %v2826_v7, %v5331_v46  ;;  %v2833_v22 = vmul.f32 %v2826_v7, %v5333_v14 }
 0x354   :  { %v2408_v28 = vpop.permute.xlu1 %2407  ;;  %v2406_v62 = vpop.permute.xlu0 %2405  ;;  %v2876_v24 = vstv %s3319_s27 }
 0x355   :  { %v2428_v26 = vadd.f32 %v2408_v28, %v2328_v57  ;;  %v2427_v23 = vadd.f32 %v2406_v62, %v2327_v18  ;;  %v2500_v18 = vmul.f32 %v2494_v52, %v5130_v39  ;;  %v2881_v48 = vmul.f32 %v2876_v24, %v5321_v31 }
 0x356   :  { %2853 = vrot.lane.b32.xlu1 %v2832_v25, %s3385_s21  ;;  %2851 = vrot.lane.b32.xlu0 %v2831_v27, %s3385_s21  ;;  %v2878_v25 = vmul.f32 %v2876_v24, %v5295_v20  ;;  %v2877_v27 = vmul.f32 %v2876_v24, %v5297_v53 }
 0x357   :  { %v5381_v47 = vadd.f32 %v2498_v51, %v2428_v26  ;;  %v5383_v33 = vadd.f32 %v2497_v49, %v2427_v23  ;;  %v2502_v51 = vmul.f32 %v2494_v52, %v5142_v44  ;;  %v2501_v49 = vmul.f32 %v2494_v52, %v5144_v34 }
 0x358   :  { %v2412_v45 = vpop.permute.xlu1 %2411  ;;  %v2410_v43 = vpop.permute.xlu0 %2409  ;;  %v2879_v52 = vmul.f32 %v2876_v24, %v5309_v15 }
 0x359   :  { %v2430_v55 = vadd.f32 %v2412_v45, %v2330_v40  ;;  %v2429_v57 = vadd.f32 %v2410_v43, %v2329_v19  ;;  %v2880_v43 = vmul.f32 %v2876_v24, %v5307_v41 }
 0x35a   :  { %2857 = vrot.lane.b32.xlu1 %v2834_v4, %s3385_s21  ;;  %2855 = vrot.lane.b32.xlu0 %v2833_v22, %s3385_s21 }
 0x35b   :  { %v5395_v50 = vadd.f32 %v2500_v18, %v2430_v55  ;;  %v5397_v7 = vadd.f32 %v2499_v36, %v2429_v57  ;;  %v2514_v55 = vmul.f32 %v2512_v58, %v5106_v2  ;;  %v2882_v2 = vmul.f32 %v2876_v24, %v5319_v11 }
 0x35c   :  { %v2416_v28 = vpop.permute.xlu1 %2415  ;;  %v2414_v62 = vpop.permute.xlu0 %2413 }
 0x35d   :  { %v2432_v26 = vadd.f32 %v2416_v28, %v2332_v61  ;;  %v2431_v23 = vadd.f32 %v2414_v62, %v2331_v17  ;;  %v2516_v28 = vmul.f32 %v2512_v58, %v5118_v29  ;;  %v2515_v62 = vmul.f32 %v2512_v58, %v5120_v0 }
 0x35e   :  { %2895 = vrot.lane.b32.xlu1 %v2878_v25, %s3386_s24  ;;  %2893 = vrot.lane.b32.xlu0 %v2877_v27, %s3386_s24  ;;  %v2884_v29 = vmul.f32 %v2876_v24, %v5331_v46  ;;  %v2883_v0 = vmul.f32 %v2876_v24, %v5333_v14 }
 0x35f   :  { %v5410_v12 = vadd.f32 %v2502_v51, %v2432_v26  ;;  %v5412_v40 = vadd.f32 %v2501_v49, %v2431_v23  ;;  %v2926_v26 = vstv %s3320_s29  ;;  %v2518_v49 = vmul.f32 %v2512_v58, %v5130_v39 }
 0x360   :  { %v2454_v19 = vpop.permute.xlu1 %2453  ;;  %v2452_v45 = vpop.permute.xlu0 %2451  ;;  %v2928_v39 = vmul.f32 %v2926_v26, %v5295_v20  ;;  %v2927_v9 = vmul.f32 %v2926_v26, %v5297_v53 }
 0x361   :  { %v2476_v4 = vadd.f32 %v2454_v19, %v2376_v21  ;;  %v2475_v22 = vadd.f32 %v2452_v45, %v2375_v38 }
 0x362   :  { %2899 = vrot.lane.b32.xlu1 %v2880_v43, %s3386_s24  ;;  %2897 = vrot.lane.b32.xlu0 %v2879_v52, %s3386_s24  ;;  %v2520_v43 = vmul.f32 %v2512_v58, %v5142_v44  ;;  %v2519_v52 = vmul.f32 %v2512_v58, %v5144_v34 }
 0x363   :  { %v5424_v8 = vadd.f32 %v2514_v55, %v2476_v4  ;;  %v5426_v57 = vadd.f32 %v2513_v54, %v2475_v22  ;;  %v2930_v4 = vmul.f32 %v2926_v26, %v5307_v41  ;;  %v2929_v22 = vmul.f32 %v2926_v26, %v5309_v15 }
 0x364   :  { %v2458_v18 = vpop.permute.xlu1 %2457  ;;  %v2456_v36 = vpop.permute.xlu0 %2455  ;;  %v2932_v54 = vmul.f32 %v2926_v26, %v5319_v11 }
 0x365   :  { %v2478_v61 = vadd.f32 %v2458_v18, %v2378_v10  ;;  %v2477_v17 = vadd.f32 %v2456_v36, %v2377_v5  ;;  %v2931_v10 = vmul.f32 %v2926_v26, %v5321_v31  ;;  %v2934_v36 = vmul.f32 %v2926_v26, %v5331_v46 }
 0x366   :  { %2903 = vrot.lane.b32.xlu1 %v2882_v2, %s3386_s24  ;;  %2901 = vrot.lane.b32.xlu0 %v2881_v48, %s3386_s24  ;;  %v2933_v2 = vmul.f32 %v2926_v26, %v5333_v14 }
 0x367   :  { %v5438_v56 = vadd.f32 %v2516_v28, %v2478_v61  ;;  %v5440_v6 = vadd.f32 %v2515_v62, %v2477_v17  ;;  %v5496_v17 = vld [vmem:[#allocation2 + $0x4a] sm:$0xff] }
 0x368   :  { %v2462_v25 = vpop.permute.xlu1 %2461  ;;  %v2460_v27 = vpop.permute.xlu0 %2459 }
 0x369   :  { %v2480_v23 = vadd.f32 %v2462_v25, %v2380_v3  ;;  %v2479_v51 = vadd.f32 %v2460_v27, %v2379_v42  ;;  %v5508_v25 = vld [vmem:[#allocation2 + $0xb2] sm:$0xff]  ;;  %v5510_v27 = vld [vmem:[#allocation2 + $0xaa] sm:$0xff] }
 0x36a   :  { %2907 = vrot.lane.b32.xlu1 %v2884_v29, %s3386_s24  ;;  %2905 = vrot.lane.b32.xlu0 %v2883_v0, %s3386_s24 }
 0x36b   :  { %v5452_v30 = vadd.f32 %v2518_v49, %v2480_v23  ;;  %v5454_v24 = vadd.f32 %v2517_v63, %v2479_v51  ;;  %v5522_v51 = vld [vmem:[#allocation2 + $0x112] sm:$0xff]  ;;  %v5524_v49 = vld [vmem:[#allocation2 + $0x10a] sm:$0xff] }
 0x36c   :  { %v2466_v21 = vpop.permute.xlu1 %2465  ;;  %v2464_v38 = vpop.permute.xlu0 %2463 }
 0x36d   :  { %v2482_v19 = vadd.f32 %v2466_v21, %v2382_v1  ;;  %v2481_v45 = vadd.f32 %v2464_v38, %v2381_v13  ;;  %v5536_v38 = vld [vmem:[#allocation2 + $0x172] sm:$0xff] }
 0x36e   :  { %2945 = vrot.lane.b32.xlu1 %v2928_v39, %s3386_s24  ;;  %2943 = vrot.lane.b32.xlu0 %v2927_v9, %s3386_s24  ;;  %v5538_v39 = vld [vmem:[#allocation2 + $0x16a] sm:$0xff] }
 0x36f   :  { %v5462_v35 = vadd.f32 %v2520_v43, %v2482_v19  ;;  %v5464_v37 = vadd.f32 %v2519_v52, %v2481_v45  ;;  %v3072_v52 = vstv %s3324_s3 }
 0x370   :  { %v2550_v16 = vpop.permute.xlu1 %2549  ;;  %v2548_v32 = vpop.permute.xlu0 %2547 }
 0x371   :  { %v5469_v55 = vadd.f32 %v2550_v16, %v5365_v60  ;;  %v5472_v44 = vadd.f32 %v2548_v32, %v5367_v59 }
 0x372   :  { %2949 = vrot.lane.b32.xlu1 %v2930_v4, %s3386_s24  ;;  %2947 = vrot.lane.b32.xlu0 %v2929_v22, %s3386_s24  ;;  %v3073_v22 = vmul.f32 %v3072_v52, %v5496_v17 }
 0x374   :  { %v2554_v34 = vpop.permute.xlu1 %2553  ;;  %v2552_v58 = vpop.permute.xlu0 %2551 }
 0x375   :  { %v5479_v5 = vadd.f32 %v2554_v34, %v5381_v47  ;;  %v5482_v60 = vadd.f32 %v2552_v58, %v5383_v33  ;;  %v5494_v47 = vld [vmem:[#allocation2 + $0x52] sm:$0xff]  ;;  %v3022_v33 = vstv %s3323_s30 }
 0x376   :  { %2953 = vrot.lane.b32.xlu1 %v2932_v54, %s3386_s24  ;;  %2951 = vrot.lane.b32.xlu0 %v2931_v10, %s3386_s24  ;;  %v3024_v3 = vmul.f32 %v3022_v33, %v5494_v47  ;;  %v3023_v42 = vmul.f32 %v3022_v33, %v5496_v17  ;;  %v3026_v26 = vmul.f32 %v3022_v33, %v5508_v25 }
 0x377   :  { %v3025_v23 = vmul.f32 %v3022_v33, %v5510_v27  ;;  %v3028_v13 = vmul.f32 %v3022_v33, %v5522_v51  ;;  %v3027_v21 = vmul.f32 %v3022_v33, %v5524_v49  ;;  %v3030_v45 = vmul.f32 %v3022_v33, %v5536_v38 }
 0x378   :  { %v2558_v59 = vpop.permute.xlu1 %2557  ;;  %v2556_v18 = vpop.permute.xlu0 %2555  ;;  %v3029_v43 = vmul.f32 %v3022_v33, %v5538_v39  ;;  %v3074_v4 = vmul.f32 %v3072_v52, %v5494_v47  ;;  %v3076_v10 = vmul.f32 %v3072_v52, %v5508_v25 }
 0x379   :  { %v5489_v48 = vadd.f32 %v2558_v59, %v5395_v50  ;;  %v5492_v61 = vadd.f32 %v2556_v18, %v5397_v7  ;;  %v3075_v59 = vmul.f32 %v3072_v52, %v5510_v27 }
 0x37a   :  { %2957 = vrot.lane.b32.xlu1 %v2934_v36, %s3386_s24  ;;  %2955 = vrot.lane.b32.xlu0 %v2933_v2, %s3386_s24 }
 0x37c   :  { %v2562_v28 = vpop.permute.xlu1 %2561  ;;  %v2560_v62 = vpop.permute.xlu0 %2559 }
 0x37d   :  { %v5503_v50 = vadd.f32 %v2562_v28, %v5410_v12  ;;  %v5506_v7 = vadd.f32 %v2560_v62, %v5412_v40 }
 0x37e   :  { %3041 = vrot.lane.b32.xlu1 %v3024_v3, %s3385_s21  ;;  %3039 = vrot.lane.b32.xlu0 %v3023_v42, %s3385_s21  ;;  %v3078_v3 = vmul.f32 %v3072_v52, %v5522_v51 }
 0x380   :  { %v2600_v29 = vpop.permute.xlu1 %2599  ;;  %v2598_v0 = vpop.permute.xlu0 %2597 }
 0x381   :  { %v5517_v12 = vadd.f32 %v2600_v29, %v5424_v8  ;;  %v5520_v40 = vadd.f32 %v2598_v0, %v5426_v57 }
 0x382   :  { %3045 = vrot.lane.b32.xlu1 %v3026_v26, %s3385_s21  ;;  %3043 = vrot.lane.b32.xlu0 %v3025_v23, %s3385_s21 }
 0x384   :  { %v2604_v63 = vpop.permute.xlu1 %2603  ;;  %v2602_v1 = vpop.permute.xlu0 %2601 }
 0x385   :  { %v5531_v8 = vadd.f32 %v2604_v63, %v5438_v56  ;;  %v5534_v57 = vadd.f32 %v2602_v1, %v5440_v6 }
 0x386   :  { %3049 = vrot.lane.b32.xlu1 %v3028_v13, %s3385_s21  ;;  %3047 = vrot.lane.b32.xlu0 %v3027_v21, %s3385_s21  ;;  %v3080_v13 = vmul.f32 %v3072_v52, %v5536_v38 }
 0x388   :  { %v2608_v9 = vpop.permute.xlu1 %2607  ;;  %v2606_v19 = vpop.permute.xlu0 %2605 }
 0x389   :  { %v5545_v56 = vadd.f32 %v2608_v9, %v5452_v30  ;;  %v5548_v6 = vadd.f32 %v2606_v19, %v5454_v24  ;;  %v2740_v24 = vstv %s3315_s4 }
 0x38a   :  { %3053 = vrot.lane.b32.xlu1 %v3030_v45, %s3385_s21  ;;  %3051 = vrot.lane.b32.xlu0 %v3029_v43, %s3385_s21  ;;  %v2742_v36 = vmul.f32 %v2740_v24, %v5295_v20  ;;  %v2744_v29 = vmul.f32 %v2740_v24, %v5307_v41  ;;  %v2743_v0 = vmul.f32 %v2740_v24, %v5309_v15 }
 0x38b   :  { %v2746_v19 = vmul.f32 %v2740_v24, %v5319_v11  ;;  %v2745_v45 = vmul.f32 %v2740_v24, %v5321_v31 }
 0x38c   :  { %v2612_v16 = vpop.permute.xlu1 %2611  ;;  %v2610_v32 = vpop.permute.xlu0 %2609 }
 0x38d   :  { %v5555_v34 = vadd.f32 %v2612_v16, %v5462_v35  ;;  %v5558_v30 = vadd.f32 %v2610_v32, %v5464_v37  ;;  %v2741_v37 = vmul.f32 %v2740_v24, %v5297_v53 }
 0x38e   :  { %3091 = vrot.lane.b32.xlu1 %v3074_v4, %s3385_s21  ;;  %3089 = vrot.lane.b32.xlu0 %v3073_v22, %s3385_s21 }
 0x390   :  { %v2650_v58 = vpop.permute.xlu1 %2649  ;;  %v2648_v54 = vpop.permute.xlu0 %2647 }
 0x391   :  { %v2672_v18 = vadd.f32 %v2650_v58, %v5469_v55  ;;  %v2671_v35 = vadd.f32 %v2648_v54, %v5472_v44  ;;  %v3077_v55 = vmul.f32 %v3072_v52, %v5524_v49  ;;  %v2748_v58 = vmul.f32 %v2740_v24, %v5331_v46 }
 0x392   :  { %3095 = vrot.lane.b32.xlu1 %v3076_v10, %s3385_s21  ;;  %3093 = vrot.lane.b32.xlu0 %v3075_v59, %s3385_s21  ;;  %v2747_v54 = vmul.f32 %v2740_v24, %v5333_v14  ;;  %v2758_v10 = vstv %s3316_s6 }
 0x393   :  { %v5570_v2 = vadd.f32 %v2742_v36, %v2672_v18  ;;  %v5572_v33 = vadd.f32 %v2741_v37, %v2671_v35 }
 0x394   :  { %v2654_v28 = vpop.permute.xlu1 %2653  ;;  %v2652_v62 = vpop.permute.xlu0 %2651 }
 0x395   :  { %v2674_v44 = vadd.f32 %v2654_v28, %v5479_v5  ;;  %v2673_v42 = vadd.f32 %v2652_v62, %v5482_v60  ;;  %v3079_v5 = vmul.f32 %v3072_v52, %v5538_v39  ;;  %v3122_v60 = vstv %s3325_s5 }
 0x396   :  { %3099 = vrot.lane.b32.xlu1 %v3078_v3, %s3385_s21  ;;  %3097 = vrot.lane.b32.xlu0 %v3077_v55, %s3385_s21  ;;  %v3124_v52 = vmul.f32 %v3122_v60, %v5494_v47  ;;  %v3126_v37 = vmul.f32 %v3122_v60, %v5508_v25  ;;  %v2760_v28 = vmul.f32 %v2758_v10, %v5295_v20 }
 0x397   :  { %v5582_v26 = vadd.f32 %v2744_v29, %v2674_v44  ;;  %v5584_v23 = vadd.f32 %v2743_v0, %v2673_v42  ;;  %v2759_v62 = vmul.f32 %v2758_v10, %v5297_v53  ;;  %v3128_v29 = vmul.f32 %v3122_v60, %v5522_v51 }
 0x398   :  { %v2658_v63 = vpop.permute.xlu1 %2657  ;;  %v2656_v1 = vpop.permute.xlu0 %2655  ;;  %v2762_v53 = vmul.f32 %v2758_v10, %v5307_v41  ;;  %v2761_v0 = vmul.f32 %v2758_v10, %v5309_v15  ;;  %v2764_v41 = vmul.f32 %v2758_v10, %v5319_v11  ;;  %v2763_v15 = vmul.f32 %v2758_v10, %v5321_v31 }
 0x399   :  { %v2676_v21 = vadd.f32 %v2658_v63, %v5489_v48  ;;  %v2675_v9 = vadd.f32 %v2656_v1, %v5492_v61  ;;  %v3123_v48 = vmul.f32 %v3122_v60, %v5496_v17  ;;  %v2766_v11 = vmul.f32 %v2758_v10, %v5331_v46 }
 0x39a   :  { %3103 = vrot.lane.b32.xlu1 %v3080_v13, %s3385_s21  ;;  %3101 = vrot.lane.b32.xlu0 %v3079_v5, %s3385_s21  ;;  %s3326_s21 = sld [smem:[#allocation6 + $0x47]]  ;;  %v2765_v31 = vmul.f32 %v2758_v10, %v5333_v14 }
 0x39b   :  { %v5594_v43 = vadd.f32 %v2746_v19, %v2676_v21  ;;  %v5596_v16 = vadd.f32 %v2745_v45, %v2675_v9  ;;  %v3130_v21 = vmul.f32 %v3122_v60, %v5536_v38  ;;  %v3129_v9 = vmul.f32 %v3122_v60, %v5538_v39 }
 0x39c   :  { %v2662_v32 = vpop.permute.xlu1 %2661  ;;  %v2660_v4 = vpop.permute.xlu0 %2659 }
 0x39d   :  { %v2678_v61 = vadd.f32 %v2662_v32, %v5503_v50  ;;  %v2677_v22 = vadd.f32 %v2660_v4, %v5506_v7  ;;  %v3125_v50 = vmul.f32 %v3122_v60, %v5510_v27 }
 0x39e   :  { %3141 = vrot.lane.b32.xlu1 %v3124_v52, %s3386_s24  ;;  %3139 = vrot.lane.b32.xlu0 %v3123_v48, %s3386_s24 }
 0x39f   :  { %v5606_v59 = vadd.f32 %v2748_v58, %v2678_v61  ;;  %v5608_v18 = vadd.f32 %v2747_v54, %v2677_v22 }
 0x3a0   :  { %v2700_v35 = vpop.permute.xlu1 %2699  ;;  %v2698_v36 = vpop.permute.xlu0 %2697  ;;  %v3172_v19 = vstv %s3326_s21 }
 0x3a1   :  { %v2722_v7 = vadd.f32 %v2700_v35, %v5517_v12  ;;  %v2721_v24 = vadd.f32 %v2698_v36, %v5520_v40  ;;  %v3127_v12 = vmul.f32 %v3122_v60, %v5524_v49  ;;  %v3174_v48 = vmul.f32 %v3172_v19, %v5494_v47 }
 0x3a2   :  { %3145 = vrot.lane.b32.xlu1 %v3126_v37, %s3386_s24  ;;  %3143 = vrot.lane.b32.xlu0 %v3125_v50, %s3386_s24  ;;  %v3173_v60 = vmul.f32 %v3172_v19, %v5496_v17  ;;  %v3176_v35 = vmul.f32 %v3172_v19, %v5508_v25  ;;  %v3175_v36 = vmul.f32 %v3172_v19, %v5510_v27 }
 0x3a3   :  { %v5618_v3 = vadd.f32 %v2760_v28, %v2722_v7  ;;  %v5620_v55 = vadd.f32 %v2759_v62, %v2721_v24  ;;  %v3178_v10 = vmul.f32 %v3172_v19, %v5522_v51  ;;  %v3177_v37 = vmul.f32 %v3172_v19, %v5524_v49 }
 0x3a4   :  { %v2704_v44 = vpop.permute.xlu1 %2703  ;;  %v2702_v42 = vpop.permute.xlu0 %2701  ;;  %v3180_v24 = vmul.f32 %v3172_v19, %v5536_v38  ;;  %v3179_v28 = vmul.f32 %v3172_v19, %v5538_v39 }
 0x3a5   :  { %v2724_v40 = vadd.f32 %v2704_v44, %v5531_v8  ;;  %v2723_v20 = vadd.f32 %v2702_v42, %v5534_v57 }
 0x3a6   :  { %3149 = vrot.lane.b32.xlu1 %v3128_v29, %s3386_s24  ;;  %3147 = vrot.lane.b32.xlu0 %v3127_v12, %s3386_s24 }
 0x3a7   :  { %v2770_v63 = vadd.f32 %v2762_v53, %v2724_v40  ;;  %v2769_v1 = vadd.f32 %v2761_v0, %v2723_v20 }
 0x3a8   :  { %v2708_v13 = vpop.permute.xlu1 %2707  ;;  %v2706_v5 = vpop.permute.xlu0 %2705 }
 0x3a9   :  { %v2726_v8 = vadd.f32 %v2708_v13, %v5545_v56  ;;  %v2725_v57 = vadd.f32 %v2706_v5, %v5548_v6 }
 0x3aa   :  { %3153 = vrot.lane.b32.xlu1 %v3130_v21, %s3386_s24  ;;  %3151 = vrot.lane.b32.xlu0 %v3129_v9, %s3386_s24 }
 0x3ab   :  { %v2772_v45 = vadd.f32 %v2764_v41, %v2726_v8  ;;  %v2771_v32 = vadd.f32 %v2763_v15, %v2725_v57  ;;  %v2986_v41 = vstv %s3321_s7 }
 0x3ac   :  { %v2712_v4 = vpop.permute.xlu1 %2711  ;;  %v2710_v52 = vpop.permute.xlu0 %2709 }
 0x3ad   :  { %v2728_v56 = vadd.f32 %v2712_v4, %v5555_v34  ;;  %v2727_v6 = vadd.f32 %v2710_v52, %v5558_v30  ;;  %v2988_v52 = vmul.f32 %v2986_v41, %v5494_v47 }
 0x3ae   :  { %3191 = vrot.lane.b32.xlu1 %v3174_v48, %s3386_s24  ;;  %3189 = vrot.lane.b32.xlu0 %v3173_v60, %s3386_s24 }
 0x3af   :  { %v2774_v61 = vadd.f32 %v2766_v11, %v2728_v56  ;;  %v2773_v22 = vadd.f32 %v2765_v31, %v2727_v6  ;;  %v2990_v6 = vmul.f32 %v2986_v41, %v5508_v25  ;;  %v2989_v11 = vmul.f32 %v2986_v41, %v5510_v27 }
 0x3b0   :  { %v2796_v58 = vpop.permute.xlu1 %2795  ;;  %v2794_v54 = vpop.permute.xlu0 %2793 }
 0x3b1   :  { %v2818_v34 = vadd.f32 %v2796_v58, %v5570_v2  ;;  %v2817_v30 = vadd.f32 %v2794_v54, %v5572_v33 }
 0x3b2   :  { %3195 = vrot.lane.b32.xlu1 %v3176_v35, %s3386_s24  ;;  %3193 = vrot.lane.b32.xlu0 %v3175_v36, %s3386_s24  ;;  %v2992_v36 = vmul.f32 %v2986_v41, %v5522_v51 }
 0x3b4   :  { %v2800_v46 = vpop.permute.xlu1 %2799  ;;  %v2798_v14 = vpop.permute.xlu0 %2797 }
 0x3b5   :  { %v2820_v50 = vadd.f32 %v2800_v46, %v5582_v26  ;;  %v2819_v7 = vadd.f32 %v2798_v14, %v5584_v23 }
 0x3b6   :  { %3199 = vrot.lane.b32.xlu1 %v3178_v10, %s3386_s24  ;;  %3197 = vrot.lane.b32.xlu0 %v3177_v37, %s3386_s24 }
 0x3b8   :  { %v2804_v2 = vpop.permute.xlu1 %2803  ;;  %v2802_v33 = vpop.permute.xlu0 %2801 }
 0x3b9   :  { %v2822_v62 = vadd.f32 %v2804_v2, %v5594_v43  ;;  %v2821_v44 = vadd.f32 %v2802_v33, %v5596_v16  ;;  %v2993_v2 = vmul.f32 %v2986_v41, %v5538_v39 }
 0x3ba   :  { %3203 = vrot.lane.b32.xlu1 %v3180_v24, %s3386_s24  ;;  %3201 = vrot.lane.b32.xlu0 %v3179_v28, %s3386_s24  ;;  %s3322_s24 = sld [smem:[#allocation6 + $0x45]] }
 0x3bc   :  { %v2808_v26 = vpop.permute.xlu1 %2807  ;;  %v2806_v23 = vpop.permute.xlu0 %2805 }
 0x3bd   :  { %v2824_v42 = vadd.f32 %v2808_v26, %v5606_v59  ;;  %v2823_v29 = vadd.f32 %v2806_v23, %v5608_v18 }
 0x3c0   :  { %v2846_v12 = vpop.permute.xlu1 %2845  ;;  %v2844_v40 = vpop.permute.xlu0 %2843  ;;  %v3004_v33 = vstv %s3322_s24 }
 0x3c1   :  { %v2868_v20 = vadd.f32 %v2846_v12, %v5618_v3  ;;  %v2867_v53 = vadd.f32 %v2844_v40, %v5620_v55  ;;  %v3006_v12 = vmul.f32 %v3004_v33, %v5494_v47  ;;  %v3005_v40 = vmul.f32 %v3004_v33, %v5496_v17 }
 0x3c4   :  { %v2850_v0 = vpop.permute.xlu1 %2849  ;;  %v2848_v43 = vpop.permute.xlu0 %2847 }
 0x3c5   :  { %v2870_v13 = vadd.f32 %v2850_v0, %v2770_v63  ;;  %v2869_v16 = vadd.f32 %v2848_v43, %v2769_v1  ;;  %v2987_v63 = vmul.f32 %v2986_v41, %v5496_v17 }
 0x3c8   :  { %v2854_v5 = vpop.permute.xlu1 %2853  ;;  %v2852_v21 = vpop.permute.xlu0 %2851 }
 0x3c9   :  { %v2872_v9 = vadd.f32 %v2854_v5, %v2772_v45  ;;  %v2871_v19 = vadd.f32 %v2852_v21, %v2771_v32 }
 0x3cc   :  { %v2858_v8 = vpop.permute.xlu1 %2857  ;;  %v2856_v57 = vpop.permute.xlu0 %2855 }
 0x3cd   :  { %v5668_v59 = vadd.f32 %v2858_v8, %v2774_v61  ;;  %v5670_v18 = vadd.f32 %v2856_v57, %v2773_v22  ;;  %v3008_v8 = vmul.f32 %v3004_v33, %v5508_v25  ;;  %v3007_v57 = vmul.f32 %v3004_v33, %v5510_v27 }
 0x3d0   :  { %v2896_v15 = vpop.permute.xlu1 %2895  ;;  %v2894_v3 = vpop.permute.xlu0 %2893 }
 0x3d1   :  { %v2918_v4 = vadd.f32 %v2896_v15, %v2818_v34  ;;  %v2917_v55 = vadd.f32 %v2894_v3, %v2817_v30  ;;  %v2991_v34 = vmul.f32 %v2986_v41, %v5524_v49  ;;  %v3010_v3 = vmul.f32 %v3004_v33, %v5522_v51 }
 0x3d3   :  { %v5674_v1 = vadd.f32 %v2988_v52, %v2918_v4  ;;  %v5676_v48 = vadd.f32 %v2987_v63, %v2917_v55  ;;  %v3009_v4 = vmul.f32 %v3004_v33, %v5524_v49  ;;  %v3012_v63 = vmul.f32 %v3004_v33, %v5536_v38 }
 0x3d4   :  { %v2900_v45 = vpop.permute.xlu1 %2899  ;;  %v2898_v32 = vpop.permute.xlu0 %2897 }
 0x3d5   :  { %v2920_v60 = vadd.f32 %v2900_v45, %v2820_v50  ;;  %v2919_v56 = vadd.f32 %v2898_v32, %v2819_v7  ;;  %v2994_v7 = vmul.f32 %v2986_v41, %v5536_v38  ;;  %v3011_v45 = vmul.f32 %v3004_v33, %v5538_v39 }
 0x3d7   :  { %v5680_v31 = vadd.f32 %v2990_v6, %v2920_v60  ;;  %v5682_v61 = vadd.f32 %v2989_v11, %v2919_v56 }
 0x3d8   :  { %v2904_v22 = vpop.permute.xlu1 %2903  ;;  %v2902_v58 = vpop.permute.xlu0 %2901 }
 0x3d9   :  { %v2922_v54 = vadd.f32 %v2904_v22, %v2822_v62  ;;  %v2921_v35 = vadd.f32 %v2902_v58, %v2821_v44 }
 0x3db   :  { %v5686_v30 = vadd.f32 %v2992_v36, %v2922_v54  ;;  %v5688_v46 = vadd.f32 %v2991_v34, %v2921_v35 }
 0x3dc   :  { %v2908_v14 = vpop.permute.xlu1 %2907  ;;  %v2906_v10 = vpop.permute.xlu0 %2905 }
 0x3dd   :  { %v2924_v37 = vadd.f32 %v2908_v14, %v2824_v42  ;;  %v2923_v50 = vadd.f32 %v2906_v10, %v2823_v29 }
 0x3df   :  { %v5692_v24 = vadd.f32 %v2994_v7, %v2924_v37  ;;  %v5694_v28 = vadd.f32 %v2993_v2, %v2923_v50 }
 0x3e0   :  { %v2946_v62 = vpop.permute.xlu1 %2945  ;;  %v2944_v44 = vpop.permute.xlu0 %2943 }
 0x3e1   :  { %v2968_v26 = vadd.f32 %v2946_v62, %v2868_v20  ;;  %v2967_v23 = vadd.f32 %v2944_v44, %v2867_v53 }
 0x3e3   :  { %v5698_v0 = vadd.f32 %v3006_v12, %v2968_v26  ;;  %v5700_v42 = vadd.f32 %v3005_v40, %v2967_v23 }
 0x3e4   :  { %v2950_v29 = vpop.permute.xlu1 %2949  ;;  %v2948_v43 = vpop.permute.xlu0 %2947 }
 0x3e5   :  { %v2970_v5 = vadd.f32 %v2950_v29, %v2870_v13  ;;  %v2969_v21 = vadd.f32 %v2948_v43, %v2869_v16 }
 0x3e7   :  { %v5704_v41 = vadd.f32 %v3008_v8, %v2970_v5  ;;  %v5706_v20 = vadd.f32 %v3007_v57, %v2969_v21 }
 0x3e8   :  { %v2954_v53 = vpop.permute.xlu1 %2953  ;;  %v2952_v47 = vpop.permute.xlu0 %2951 }
 0x3e9   :  { %v2972_v15 = vadd.f32 %v2954_v53, %v2872_v9  ;;  %v2971_v17 = vadd.f32 %v2952_v47, %v2871_v19 }
 0x3eb   :  { %v5710_v55 = vadd.f32 %v3010_v3, %v2972_v15  ;;  %v5712_v13 = vadd.f32 %v3009_v4, %v2971_v17 }
 0x3ec   :  { %v2958_v16 = vpop.permute.xlu1 %2957  ;;  %v2956_v25 = vpop.permute.xlu0 %2955 }
 0x3ed   :  { %v2974_v27 = vadd.f32 %v2958_v16, %v5668_v59  ;;  %v2973_v52 = vadd.f32 %v2956_v25, %v5670_v18 }
 0x3ef   :  { %v5718_v9 = vadd.f32 %v3012_v63, %v2974_v27  ;;  %v5720_v19 = vadd.f32 %v3011_v45, %v2973_v52 }
 0x3f0   :  { %v3042_v51 = vpop.permute.xlu1 %3041  ;;  %v3040_v49 = vpop.permute.xlu0 %3039 }
 0x3f1   :  { %v3064_v34 = vadd.f32 %v3042_v51, %v5674_v1  ;;  %v3063_v14 = vadd.f32 %v3040_v49, %v5676_v48 }
 0x3f4   :  { %v3046_v32 = vpop.permute.xlu1 %3045  ;;  %v3044_v60 = vpop.permute.xlu0 %3043 }
 0x3f5   :  { %v3066_v2 = vadd.f32 %v3046_v32, %v5680_v31  ;;  %v3065_v33 = vadd.f32 %v3044_v60, %v5682_v61 }
 0x3f8   :  { %v3050_v56 = vpop.permute.xlu1 %3049  ;;  %v3048_v6 = vpop.permute.xlu0 %3047 }
 0x3f9   :  { %v3068_v26 = vadd.f32 %v3050_v56, %v5686_v30  ;;  %v3067_v31 = vadd.f32 %v3048_v6, %v5688_v46 }
 0x3fc   :  { %v3054_v11 = vpop.permute.xlu1 %3053  ;;  %v3052_v22 = vpop.permute.xlu0 %3051 }
 0x3fd   :  { %v3070_v29 = vadd.f32 %v3054_v11, %v5692_v24  ;;  %v3069_v30 = vadd.f32 %v3052_v22, %v5694_v28 }
 0x400   :  { %v3092_v58 = vpop.permute.xlu1 %3091  ;;  %v3090_v59 = vpop.permute.xlu0 %3089 }
 0x401   :  { %v3114_v8 = vadd.f32 %v3092_v58, %v5698_v0  ;;  %v3113_v24 = vadd.f32 %v3090_v59, %v5700_v42 }
 0x404   :  { %v3096_v54 = vpop.permute.xlu1 %3095  ;;  %v3094_v18 = vpop.permute.xlu0 %3093 }
 0x405   :  { %v3116_v15 = vadd.f32 %v3096_v54, %v5704_v41  ;;  %v3115_v0 = vadd.f32 %v3094_v18, %v5706_v20 }
 0x408   :  { %v3100_v35 = vpop.permute.xlu1 %3099  ;;  %v3098_v38 = vpop.permute.xlu0 %3097 }
 0x409   :  { %v3118_v16 = vadd.f32 %v3100_v35, %v5710_v55  ;;  %v3117_v41 = vadd.f32 %v3098_v38, %v5712_v13 }
 0x40c   :  { %v3104_v36 = vpop.permute.xlu1 %3103  ;;  %v3102_v39 = vpop.permute.xlu0 %3101 }
 0x40d   :  { %v3120_v63 = vadd.f32 %v3104_v36, %v5718_v9  ;;  %v3119_v55 = vadd.f32 %v3102_v39, %v5720_v19 }
 0x410   :  { %v3142_v10 = vpop.permute.xlu1 %3141  ;;  %v3140_v37 = vpop.permute.xlu0 %3139 }
 0x411   :  { %v3164_v50 = vadd.f32 %v3142_v10, %v3064_v34  ;;  %v3163_v7 = vadd.f32 %v3140_v37, %v3063_v14 }
 0x413   :  { %3223 = vst.msk [vmem:[%s5804_s2 + $0x8] sm:$0xff] %vm3221_vm3, %v3164_v50  ;;  %3222 = vst.msk [vmem:[%s5804_s2] sm:$0xff] %vm3221_vm3, %v3163_v7 }
 0x414   :  { %v3146_v1 = vpop.permute.xlu1 %3145  ;;  %v3144_v48 = vpop.permute.xlu0 %3143 }
 0x415   :  { %v3166_v62 = vadd.f32 %v3146_v1, %v3066_v2  ;;  %v3165_v44 = vadd.f32 %v3144_v48, %v3065_v33 }
 0x417   :  { %3225 = vst.msk [vmem:[%s5804_s2 + $0x28] sm:$0xff] %vm3221_vm3, %v3166_v62  ;;  %3224 = vst.msk [vmem:[%s5804_s2 + $0x20] sm:$0xff] %vm3221_vm3, %v3165_v44 }
 0x418   :  { %v3150_v61 = vpop.permute.xlu1 %3149  ;;  %v3148_v23 = vpop.permute.xlu0 %3147 }
 0x419   :  { %v3168_v12 = vadd.f32 %v3150_v61, %v3068_v26  ;;  %v3167_v40 = vadd.f32 %v3148_v23, %v3067_v31 }
 0x41b   :  { %3227 = vst.msk [vmem:[%s5804_s2 + $0x48] sm:$0xff] %vm3221_vm3, %v3168_v12  ;;  %3226 = vst.msk [vmem:[%s5804_s2 + $0x40] sm:$0xff] %vm3221_vm3, %v3167_v40 }
 0x41c   :  { %v3154_v46 = vpop.permute.xlu1 %3153  ;;  %v3152_v43 = vpop.permute.xlu0 %3151 }
 0x41d   :  { %v3170_v5 = vadd.f32 %v3154_v46, %v3070_v29  ;;  %v3169_v21 = vadd.f32 %v3152_v43, %v3069_v30 }
 0x41f   :  { %3229 = vst.msk [vmem:[%s5804_s2 + $0x68] sm:$0xff] %vm3221_vm3, %v3170_v5  ;;  %3228 = vst.msk [vmem:[%s5804_s2 + $0x60] sm:$0xff] %vm3221_vm3, %v3169_v21 }
 0x420   :  { %v3192_v28 = vpop.permute.xlu1 %3191  ;;  %v3190_v57 = vpop.permute.xlu0 %3189 }
 0x421   :  { %v3214_v53 = vadd.f32 %v3192_v28, %v3114_v8  ;;  %v3213_v47 = vadd.f32 %v3190_v57, %v3113_v24 }
 0x423   :  { %3328 = vst.msk [vmem:[%s5804_s2 + $0x18] sm:$0xff] %vm3221_vm3, %v3214_v53  ;;  %3327 = vst.msk [vmem:[%s5804_s2 + $0x10] sm:$0xff] %vm3221_vm3, %v3213_v47 }
 0x424   :  { %v3196_v42 = vpop.permute.xlu1 %3195  ;;  %v3194_v17 = vpop.permute.xlu0 %3193 }
 0x425   :  { %v3216_v3 = vadd.f32 %v3196_v42, %v3116_v15  ;;  %v3215_v4 = vadd.f32 %v3194_v17, %v3115_v0 }
 0x427   :  { %3330 = vst.msk [vmem:[%s5804_s2 + $0x38] sm:$0xff] %vm3221_vm3, %v3216_v3  ;;  %3329 = vst.msk [vmem:[%s5804_s2 + $0x30] sm:$0xff] %vm3221_vm3, %v3215_v4 }
 0x428   :  { %v3200_v20 = vpop.permute.xlu1 %3199  ;;  %v3198_v25 = vpop.permute.xlu0 %3197 }
 0x429   :  { %v3218_v27 = vadd.f32 %v3200_v20, %v3118_v16  ;;  %v3217_v52 = vadd.f32 %v3198_v25, %v3117_v41 }
 0x42b   :  { %3332 = vst.msk [vmem:[%s5804_s2 + $0x58] sm:$0xff] %vm3221_vm3, %v3218_v27  ;;  %3331 = vst.msk [vmem:[%s5804_s2 + $0x50] sm:$0xff] %vm3221_vm3, %v3217_v52 }
 0x42c   :  { %v3204_v13 = vpop.permute.xlu1 %3203  ;;  %v3202_v45 = vpop.permute.xlu0 %3201 }
 0x42d   :  { %v3220_v51 = vadd.f32 %v3204_v13, %v3120_v63  ;;  %v3219_v49 = vadd.f32 %v3202_v45, %v3119_v55 }
 0x42f   :  { %3334 = vst.msk [vmem:[%s5804_s2 + $0x78] sm:$0xff] %vm3221_vm3, %v3220_v51  ;;  %3333 = vst.msk [vmem:[%s5804_s2 + $0x70] sm:$0xff] %vm3221_vm3, %v3219_v49 }
 0x430   :  { %3243 = vsyncpa [#allocation4], 1 }
 0x431   :  { %3244 = vsyncpa [#allocation5], 1 }

</bundles_post_ra>
